<compile_context>
chip_gen: v7x
topology: tpu7x:2x2x1
jax: 0.10.0
libtpu: 0.0.40
codegen_flags: <defaults>
</compile_context>

<pallas_src>
import math
from functools import partial

import jax
import jax.numpy as jnp
from jax.experimental import pallas as pl
from jax.experimental.pallas import tpu as pltpu

# ----------------------------- configuration -----------------------------
IN_CHANS = 3
EMBED_DIMS = [32, 64, 128, 256]   # PyTorch defaults
DEPTHS = [2, 2, 2, 2]             # small analogue of [3, 3, 6, 18]
LN_EPS = 1e-6
MAX_TM = 512                      # cap on the row tile for large-M matmuls


# ----------------------------- Pallas kernels -----------------------------
def _gelu(x):
    # tanh-approximate GELU (EUP tanh; constants kept in f32)
    return 0.5 * x * (1.0 + jnp.tanh(0.7978845608028654 * (x + 0.044715 * x * x * x)))


def _mm_ln_kernel(a_ref, w_ref, b_ref, g_ref, bt_ref, o_ref, *, eps):
    """(tm,K)@(K,N) + bias, then LayerNorm over N with affine (patch-embed conv+LN)."""
    acc = jnp.dot(a_ref[...], w_ref[...], preferred_element_type=jnp.float32)
    acc = acc + b_ref[...]
    mu = jnp.mean(acc, axis=-1, keepdims=True)
    xc = acc - mu
    var = jnp.mean(xc * xc, axis=-1, keepdims=True)
    y = xc * jax.lax.rsqrt(var + eps)
    o_ref[...] = (y * g_ref[...] + bt_ref[...]).astype(o_ref.dtype)


def _ln_mm_kernel(x_ref, g_ref, bt_ref, w_ref, b_ref, o_ref, *, eps):
    """LayerNorm(x) @ W + bias, GELU.  (block fc1 with fused pre-norm)."""
    x = x_ref[...].astype(jnp.float32)
    mu = jnp.mean(x, axis=-1, keepdims=True)
    xc = x - mu
    var = jnp.mean(xc * xc, axis=-1, keepdims=True)
    xn = (xc * jax.lax.rsqrt(var + eps)) * g_ref[...] + bt_ref[...]
    acc = jnp.dot(xn.astype(w_ref.dtype), w_ref[...],
                  preferred_element_type=jnp.float32)
    o_ref[...] = _gelu(acc + b_ref[...]).astype(o_ref.dtype)


def _mm_res_kernel(a_ref, w_ref, b_ref, r_ref, o_ref):
    """A @ W + bias + residual  (block fc2 with fused residual add)."""
    acc = jnp.dot(a_ref[...], w_ref[...], preferred_element_type=jnp.float32)
    acc = acc + b_ref[...] + r_ref[...].astype(jnp.float32)
    o_ref[...] = acc.astype(o_ref.dtype)


def _ln_kernel(x_ref, g_ref, bt_ref, o_ref, *, eps):
    """Standalone LayerNorm over the channel (lane) axis (norm1..4)."""
    x = x_ref[...].astype(jnp.float32)
    mu = jnp.mean(x, axis=-1, keepdims=True)
    xc = x - mu
    var = jnp.mean(xc * xc, axis=-1, keepdims=True)
    y = (xc * jax.lax.rsqrt(var + eps)) * g_ref[...] + bt_ref[...]
    o_ref[...] = y.astype(o_ref.dtype)


# ----------------------------- launch helper -----------------------------
def _row_tiles(M):
    """Adaptive row tiling: small M -> single full-array block (no padding)."""
    if M <= MAX_TM:
        return M, M
    tm = MAX_TM
    Mp = ((M + tm - 1) // tm) * tm
    return Mp, tm


def _launch(kernel, args, M, N, out_dtype=jnp.bfloat16):
    """args: list of (array, kind) in kernel-argument order.
    kind == 'row'   -> leading dim is M, tiled over the grid.
    kind == 'bcast' -> loaded whole every grid step (weights / bias / gamma / beta)."""
    Mp, tm = _row_tiles(M)
    pad = Mp - M
    arrs, specs = [], []
    for a, kind in args:
        if kind == 'row':
            if pad:
                a = jnp.pad(a, ((0, pad), (0, 0)))
            specs.append(pl.BlockSpec((tm, a.shape[1]), lambda i: (i, 0)))
        else:
            specs.append(pl.BlockSpec(a.shape, lambda i: (0, 0)))
        arrs.append(a)
    out = pl.pallas_call(
        kernel,
        out_shape=jax.ShapeDtypeStruct((Mp, N), out_dtype),
        grid=(Mp // tm,),
        in_specs=specs,
        out_specs=pl.BlockSpec((tm, N), lambda i: (i, 0)),
        compiler_params=pltpu.CompilerParams(dimension_semantics=("parallel",)),
    )(*arrs)
    return out[:M] if pad else out


# ----------------------------- JAX glue ops -----------------------------
def _im2col(x_nhwc, k, stride, padding):
    n, h, w, cin = x_nhwc.shape
    xp = jnp.pad(x_nhwc, ((0, 0), (padding, padding), (padding, padding), (0, 0)))
    out_h = (h + 2 * padding - k) // stride + 1
    out_w = (w + 2 * padding - k) // stride + 1
    cols = []
    for i in range(k):
        for j in range(k):
            cols.append(xp[:, i:i + out_h * stride:stride,
                           j:j + out_w * stride:stride, :])
    pat = jnp.concatenate(cols, axis=-1).reshape(n * out_h * out_w, k * k * cin)
    return pat, out_h, out_w


def patch_embed(p, prefix, x_nhwc, patch, stride):
    """OverlapPatchEmbed: Conv2d(k=patch, stride, pad=patch//2) + channels LayerNorm."""
    n = x_nhwc.shape[0]
    pat, oh, ow = _im2col(x_nhwc, patch, stride, patch // 2)
    cout = p[f'{prefix}_w'].shape[1]
    y = _launch(
        partial(_mm_ln_kernel, eps=LN_EPS),
        [(pat.astype(jnp.bfloat16), 'row'),
         (p[f'{prefix}_w'], 'bcast'),
         (p[f'{prefix}_b'], 'bcast'),
         (p[f'{prefix}_g'], 'bcast'),
         (p[f'{prefix}_bt'], 'bcast')],
        M=n * oh * ow, N=cout)
    return y.reshape(n, oh, ow, cout), oh, ow


def lgl_block(p, prefix, x_nhwc):
    # TODO(synk): LGLBlock definition not provided; pre-norm residual MLP stand-in.
    n, h, w, c = x_nhwc.shape
    x2d = x_nhwc.reshape(n * h * w, c)
    M = x2d.shape[0]
    hid = _launch(
        partial(_ln_mm_kernel, eps=LN_EPS),
        [(x2d, 'row'),
         (p[f'{prefix}_g'], 'bcast'), (p[f'{prefix}_bt'], 'bcast'),
         (p[f'{prefix}_w1'], 'bcast'), (p[f'{prefix}_b1'], 'bcast')],
        M=M, N=p[f'{prefix}_w1'].shape[1])
    y = _launch(
        _mm_res_kernel,
        [(hid, 'row'),
         (p[f'{prefix}_w2'], 'bcast'), (p[f'{prefix}_b2'], 'bcast'),
         (x2d, 'row')],
        M=M, N=c)
    return y.reshape(n, h, w, c)


def layer_norm(p, prefix, x_nhwc):
    n, h, w, c = x_nhwc.shape
    x2d = x_nhwc.reshape(n * h * w, c)
    y = _launch(
        partial(_ln_kernel, eps=LN_EPS),
        [(x2d, 'row'), (p[f'{prefix}_g'], 'bcast'), (p[f'{prefix}_bt'], 'bcast')],
        M=x2d.shape[0], N=c)
    return y.reshape(n, h, w, c)


def spatial_exchange(x1, x2, p=2):
    """Swap columns (W axis) with index % p == 0.  NHWC layout: W is axis 2."""
    w = x1.shape[2]
    mask = (jnp.arange(w) % p == 0)[None, None, :, None]
    return jnp.where(mask, x2, x1), jnp.where(mask, x1, x2)


def channel_exchange(x1, x2, p=2):
    """Swap channels with index % p == 0.  NHWC layout: C is axis 3."""
    c = x1.shape[3]
    mask = (jnp.arange(c) % p == 0)[None, None, None, :]
    return jnp.where(mask, x2, x1), jnp.where(mask, x1, x2)


# ----------------------------- parameters -----------------------------
def init_params(key):
    p = {}
    keys = iter(jax.random.split(key, 256))

    def nrm(shape, std):
        return (jax.random.normal(next(keys), shape, jnp.float32) * std
                ).astype(jnp.bfloat16)

    # patch-embed convs: weight stored in im2col layout (k*k*cin, cout), bf16
    pe_cfg = [(7, IN_CHANS, EMBED_DIMS[0]),
              (3, EMBED_DIMS[0], EMBED_DIMS[1]),
              (3, EMBED_DIMS[1], EMBED_DIMS[2]),
              (3, EMBED_DIMS[2], EMBED_DIMS[3])]
    for i, (k, cin, cout) in enumerate(pe_cfg, start=1):
        std = math.sqrt(2.0 / (k * k * cout))            # PyTorch conv init
        p[f'pe{i}_w'] = nrm((k * k * cin, cout), std)
        p[f'pe{i}_b'] = jnp.zeros((1, cout), jnp.float32)
        p[f'pe{i}_g'] = jnp.ones((1, cout), jnp.float32)
        p[f'pe{i}_bt'] = jnp.zeros((1, cout), jnp.float32)

    for lvl, (dim, depth) in enumerate(zip(EMBED_DIMS, DEPTHS), start=1):
        for d in range(depth):
            pre = f'blk{lvl}_{d}'
            p[f'{pre}_g'] = jnp.ones((1, dim), jnp.float32)
            p[f'{pre}_bt'] = jnp.zeros((1, dim), jnp.float32)
            p[f'{pre}_w1'] = nrm((dim, dim), 0.02)
            p[f'{pre}_b1'] = jnp.zeros((1, dim), jnp.float32)
            p[f'{pre}_w2'] = nrm((dim, dim), 0.02)
            p[f'{pre}_b2'] = jnp.zeros((1, dim), jnp.float32)
        p[f'norm{lvl}_g'] = jnp.ones((1, dim), jnp.float32)
        p[f'norm{lvl}_bt'] = jnp.zeros((1, dim), jnp.float32)
    return p


# ----------------------------- full forward -----------------------------
def encoder_forward(p, x_nchw):
    """x: (2N, 3, H, W) NCHW — the two temporal images stacked along batch.
    Returns 4 NCHW pyramid features (after norm1..4), as in forward_features."""
    feats = jnp.transpose(x_nchw, (0, 2, 3, 1)).astype(jnp.bfloat16)
    outs = []

    # ---- stage 1 ----
    feats, _, _ = patch_embed(p, 'pe1', feats, patch=7, stride=4)
    for d in range(DEPTHS[0]):
        feats = lgl_block(p, f'blk1_{d}', feats)
    feats = layer_norm(p, 'norm1', feats)
    outs.append(feats)

    # ---- stage 2 ----
    feats, _, _ = patch_embed(p, 'pe2', feats, patch=3, stride=2)
    for d in range(DEPTHS[1]):
        feats = lgl_block(p, f'blk2_{d}', feats)
    feats = layer_norm(p, 'norm2', feats)
    outs.append(feats)

    x1, x2 = jnp.split(feats, 2, axis=0)
    x1, x2 = spatial_exchange(x1, x2)
    feats = jnp.concatenate([x1, x2], axis=0)

    # ---- stage 3 ----
    feats, _, _ = patch_embed(p, 'pe3', feats, patch=3, stride=2)
    for d in range(DEPTHS[2]):
        feats = lgl_block(p, f'blk3_{d}', feats)
    feats = layer_norm(p, 'norm3', feats)
    outs.append(feats)

    x1, x2 = jnp.split(feats, 2, axis=0)
    x1, x2 = channel_exchange(x1, x2)
    feats = jnp.concatenate([x1, x2], axis=0)

    # ---- stage 4 ----
    feats, _, _ = patch_embed(p, 'pe4', feats, patch=3, stride=2)
    for d in range(DEPTHS[3]):
        feats = lgl_block(p, f'blk4_{d}', feats)
    x1, x2 = jnp.split(feats, 2, axis=0)
    x1, x2 = channel_exchange(x1, x2)
    feats = jnp.concatenate([x1, x2], axis=0)
    feats = layer_norm(p, 'norm4', feats)
    outs.append(feats)

    return [jnp.transpose(o, (0, 3, 1, 2)).astype(jnp.float32) for o in outs]


forward = jax.jit(encoder_forward)


# ----------------------------- main -----------------------------
if __name__ == "__main__":
    key = jax.random.PRNGKey(0)
    pkey, dkey = jax.random.split(key)
    params = init_params(pkey)

    batch = 2         # the two temporal images (torch.chunk(feats, 2) along batch)
    img = 32          # small analogue of img_size=256
    x = jax.random.normal(dkey, (batch, IN_CHANS, img, img), dtype=jnp.float32)

    outs = forward(params, x)
    for o in outs:
        jax.block_until_ready(o)

    expected = [(batch, EMBED_DIMS[0], img // 4, img // 4),
                (batch, EMBED_DIMS[1], img // 8, img // 8),
                (batch, EMBED_DIMS[2], img // 16, img // 16),
                (batch, EMBED_DIMS[3], img // 32, img // 32)]
    assert [tuple(o.shape) for o in outs] == expected, [o.shape for o in outs]
    assert all(bool(jnp.all(jnp.isfinite(o))) for o in outs)
    print("KERNEL_OK")
</pallas_src>

<mosaic_0001>
module attributes {stable_mosaic.version = 11 : i64} {
  func.func @_mm_res_kernel(%arg0: i32, %arg1: memref<128x32xbf16, #tpu.memory_space<vmem>>, %arg2: memref<32x32xbf16, #tpu.memory_space<vmem>>, %arg3: memref<1x32xf32, #tpu.memory_space<vmem>>, %arg4: memref<128x32xbf16, #tpu.memory_space<vmem>>, %arg5: memref<128x32xbf16, #tpu.memory_space<vmem>>) attributes {dimension_semantics = [#tpu.dimension_semantics<parallel>], iteration_bounds = array<i64: 1>, scalar_prefetch = 0 : i64, scratch_operands = 0 : i64, tpu.core_type = #tpu.core_type<tc>, window_params = [{transform_indices = @transform_0, window_bounds = array<i64: 128, 32>}, {pipeline_mode = #tpu.pipeline_mode<synchronous>, transform_indices = @transform_1, window_bounds = array<i64: 32, 32>}, {pipeline_mode = #tpu.pipeline_mode<synchronous>, transform_indices = @transform_2, window_bounds = array<i64: 1, 32>}, {transform_indices = @transform_3, window_bounds = array<i64: 128, 32>}, {transform_indices = @transform_4, window_bounds = array<i64: 128, 32>}]} {
    %c0 = arith.constant 0 : index
    %c0_0 = arith.constant 0 : index
    %0 = vector.load %arg1[%c0, %c0_0] : memref<128x32xbf16, #tpu.memory_space<vmem>>, vector<128x32xbf16>
    %c0_1 = arith.constant 0 : index
    %c0_2 = arith.constant 0 : index
    %1 = vector.load %arg2[%c0_1, %c0_2] : memref<32x32xbf16, #tpu.memory_space<vmem>>, vector<32x32xbf16>
    %cst = arith.constant dense<0.000000e+00> : vector<128x32xf32>
    %2 = tpu.matmul %0, %1, %cst {dimension_numbers = #tpu.dot_dimension_numbers<[1], [0], [0], [1], [0, 0, 1, 1], [], []>} : vector<128x32xbf16>, vector<32x32xbf16>, vector<128x32xf32> -> vector<128x32xf32>
    %c0_3 = arith.constant 0 : index
    %c0_4 = arith.constant 0 : index
    %3 = vector.load %arg3[%c0_3, %c0_4] : memref<1x32xf32, #tpu.memory_space<vmem>>, vector<1x32xf32>
    %4 = vector.broadcast %3 : vector<1x32xf32> to vector<128x32xf32>
    %5 = arith.addf %2, %4 : vector<128x32xf32>
    %c0_5 = arith.constant 0 : index
    %c0_6 = arith.constant 0 : index
    %6 = vector.load %arg4[%c0_5, %c0_6] : memref<128x32xbf16, #tpu.memory_space<vmem>>, vector<128x32xbf16>
    %7 = arith.extf %6 : vector<128x32xbf16> to vector<128x32xf32>
    %8 = arith.addf %5, %7 : vector<128x32xf32>
    %9 = arith.truncf %8 : vector<128x32xf32> to vector<128x32xbf16>
    %c0_7 = arith.constant 0 : index
    %c0_8 = arith.constant 0 : index
    %10 = vector.load %arg5[%c0_7, %c0_8] : memref<128x32xbf16, #tpu.memory_space<vmem>>, vector<128x32xbf16>
    tpu.vector_store %arg5[%c0_7, %c0_8], %9 {strides = array<i32>} : memref<128x32xbf16, #tpu.memory_space<vmem>>, vector<128x32xbf16>,
    return
  }
  func.func @transform_0(%arg0: i32) -> (i32, i32) {
    %c0_i32 = arith.constant 0 : i32
    %c0_i32_0 = arith.constant 0 : i32
    return %arg0, %c0_i32 : i32, i32
  }
  func.func @transform_1(%arg0: i32) -> (i32, i32) {
    %c0_i32 = arith.constant 0 : i32
    %c0_i32_0 = arith.constant 0 : i32
    %c0_i32_1 = arith.constant 0 : i32
    return %c0_i32, %c0_i32_0 : i32, i32
  }
  func.func @transform_2(%arg0: i32) -> (i32, i32) {
    %c0_i32 = arith.constant 0 : i32
    %c0_i32_0 = arith.constant 0 : i32
    %c0_i32_1 = arith.constant 0 : i32
    return %c0_i32, %c0_i32_0 : i32, i32
  }
  func.func @transform_3(%arg0: i32) -> (i32, i32) {
    %c0_i32 = arith.constant 0 : i32
    %c0_i32_0 = arith.constant 0 : i32
    return %arg0, %c0_i32 : i32, i32
  }
  func.func @transform_4(%arg0: i32) -> (i32, i32) {
    %c0_i32 = arith.constant 0 : i32
    %c0_i32_0 = arith.constant 0 : i32
    return %arg0, %c0_i32 : i32, i32
  }
}

module attributes {stable_mosaic.version = 11 : i64} {
  func.func @_ln_kernel(%arg0: i32, %arg1: memref<128x32xbf16, #tpu.memory_space<vmem>>, %arg2: memref<1x32xf32, #tpu.memory_space<vmem>>, %arg3: memref<1x32xf32, #tpu.memory_space<vmem>>, %arg4: memref<128x32xbf16, #tpu.memory_space<vmem>>) attributes {dimension_semantics = [#tpu.dimension_semantics<parallel>], iteration_bounds = array<i64: 1>, scalar_prefetch = 0 : i64, scratch_operands = 0 : i64, tpu.core_type = #tpu.core_type<tc>, window_params = [{transform_indices = @transform_0, window_bounds = array<i64: 128, 32>}, {pipeline_mode = #tpu.pipeline_mode<synchronous>, transform_indices = @transform_1, window_bounds = array<i64: 1, 32>}, {pipeline_mode = #tpu.pipeline_mode<synchronous>, transform_indices = @transform_2, window_bounds = array<i64: 1, 32>}, {transform_indices = @transform_3, window_bounds = array<i64: 128, 32>}]} {
    %c0 = arith.constant 0 : index
    %c0_0 = arith.constant 0 : index
    %0 = vector.load %arg1[%c0, %c0_0] : memref<128x32xbf16, #tpu.memory_space<vmem>>, vector<128x32xbf16>
    %1 = arith.extf %0 : vector<128x32xbf16> to vector<128x32xf32>
    %cst = arith.constant dense<0.000000e+00> : vector<128xf32>
    %2 = vector.multi_reduction <add>, %1, %cst [1] : vector<128x32xf32> to vector<128xf32>
    %3 = vector.shape_cast %2 : vector<128xf32> to vector<128x1xf32>
    %cst_1 = arith.constant 3.200000e+01 : f32
    %4 = vector.broadcast %cst_1 : f32 to vector<128x1xf32>
    %5 = arith.divf %3, %4 : vector<128x1xf32>
    %6 = vector.broadcast %5 : vector<128x1xf32> to vector<128x32xf32>
    %7 = arith.subf %1, %6 : vector<128x32xf32>
    %8 = arith.mulf %7, %7 : vector<128x32xf32>
    %cst_2 = arith.constant dense<0.000000e+00> : vector<128xf32>
    %9 = vector.multi_reduction <add>, %8, %cst_2 [1] : vector<128x32xf32> to vector<128xf32>
    %10 = vector.shape_cast %9 : vector<128xf32> to vector<128x1xf32>
    %cst_3 = arith.constant 3.200000e+01 : f32
    %11 = vector.broadcast %cst_3 : f32 to vector<128x1xf32>
    %12 = arith.divf %10, %11 : vector<128x1xf32>
    %cst_4 = arith.constant 9.99999997E-7 : f32
    %13 = vector.broadcast %cst_4 : f32 to vector<128x1xf32>
    %14 = arith.addf %12, %13 : vector<128x1xf32>
    %15 = math.rsqrt %14 : vector<128x1xf32>
    %16 = vector.broadcast %15 : vector<128x1xf32> to vector<128x32xf32>
    %17 = arith.mulf %7, %16 : vector<128x32xf32>
    %c0_5 = arith.constant 0 : index
    %c0_6 = arith.constant 0 : index
    %18 = vector.load %arg2[%c0_5, %c0_6] : memref<1x32xf32, #tpu.memory_space<vmem>>, vector<1x32xf32>
    %19 = vector.broadcast %18 : vector<1x32xf32> to vector<128x32xf32>
    %20 = arith.mulf %17, %19 : vector<128x32xf32>
    %c0_7 = arith.constant 0 : index
    %c0_8 = arith.constant 0 : index
    %21 = vector.load %arg3[%c0_7, %c0_8] : memref<1x32xf32, #tpu.memory_space<vmem>>, vector<1x32xf32>
    %22 = vector.broadcast %21 : vector<1x32xf32> to vector<128x32xf32>
    %23 = arith.addf %20, %22 : vector<128x32xf32>
    %24 = arith.truncf %23 : vector<128x32xf32> to vector<128x32xbf16>
    %c0_9 = arith.constant 0 : index
    %c0_10 = arith.constant 0 : index
    %25 = vector.load %arg4[%c0_9, %c0_10] : memref<128x32xbf16, #tpu.memory_space<vmem>>, vector<128x32xbf16>
    tpu.vector_store %arg4[%c0_9, %c0_10], %24 {strides = array<i32>} : memref<128x32xbf16, #tpu.memory_space<vmem>>, vector<128x32xbf16>,
    return
  }
  func.func @transform_0(%arg0: i32) -> (i32, i32) {
    %c0_i32 = arith.constant 0 : i32
    %c0_i32_0 = arith.constant 0 : i32
    return %arg0, %c0_i32 : i32, i32
  }
  func.func @transform_1(%arg0: i32) -> (i32, i32) {
    %c0_i32 = arith.constant 0 : i32
    %c0_i32_0 = arith.constant 0 : i32
    %c0_i32_1 = arith.constant 0 : i32
    return %c0_i32, %c0_i32_0 : i32, i32
  }
  func.func @transform_2(%arg0: i32) -> (i32, i32) {
    %c0_i32 = arith.constant 0 : i32
    %c0_i32_0 = arith.constant 0 : i32
    %c0_i32_1 = arith.constant 0 : i32
    return %c0_i32, %c0_i32_0 : i32, i32
  }
  func.func @transform_3(%arg0: i32) -> (i32, i32) {
    %c0_i32 = arith.constant 0 : i32
    %c0_i32_0 = arith.constant 0 : i32
    return %arg0, %c0_i32 : i32, i32
  }
}

module attributes {stable_mosaic.version = 11 : i64} {
  func.func @_ln_mm_kernel(%arg0: i32, %arg1: memref<128x32xbf16, #tpu.memory_space<vmem>>, %arg2: memref<1x32xf32, #tpu.memory_space<vmem>>, %arg3: memref<1x32xf32, #tpu.memory_space<vmem>>, %arg4: memref<32x32xbf16, #tpu.memory_space<vmem>>, %arg5: memref<1x32xf32, #tpu.memory_space<vmem>>, %arg6: memref<128x32xbf16, #tpu.memory_space<vmem>>) attributes {dimension_semantics = [#tpu.dimension_semantics<parallel>], iteration_bounds = array<i64: 1>, scalar_prefetch = 0 : i64, scratch_operands = 0 : i64, tpu.core_type = #tpu.core_type<tc>, window_params = [{transform_indices = @transform_0, window_bounds = array<i64: 128, 32>}, {pipeline_mode = #tpu.pipeline_mode<synchronous>, transform_indices = @transform_1, window_bounds = array<i64: 1, 32>}, {pipeline_mode = #tpu.pipeline_mode<synchronous>, transform_indices = @transform_2, window_bounds = array<i64: 1, 32>}, {pipeline_mode = #tpu.pipeline_mode<synchronous>, transform_indices = @transform_3, window_bounds = array<i64: 32, 32>}, {pipeline_mode = #tpu.pipeline_mode<synchronous>, transform_indices = @transform_4, window_bounds = array<i64: 1, 32>}, {transform_indices = @transform_5, window_bounds = array<i64: 128, 32>}]} {
    %c0 = arith.constant 0 : index
    %c0_0 = arith.constant 0 : index
    %0 = vector.load %arg1[%c0, %c0_0] : memref<128x32xbf16, #tpu.memory_space<vmem>>, vector<128x32xbf16>
    %1 = arith.extf %0 : vector<128x32xbf16> to vector<128x32xf32>
    %cst = arith.constant dense<0.000000e+00> : vector<128xf32>
    %2 = vector.multi_reduction <add>, %1, %cst [1] : vector<128x32xf32> to vector<128xf32>
    %3 = vector.shape_cast %2 : vector<128xf32> to vector<128x1xf32>
    %cst_1 = arith.constant 3.200000e+01 : f32
    %4 = vector.broadcast %cst_1 : f32 to vector<128x1xf32>
    %5 = arith.divf %3, %4 : vector<128x1xf32>
    %6 = vector.broadcast %5 : vector<128x1xf32> to vector<128x32xf32>
    %7 = arith.subf %1, %6 : vector<128x32xf32>
    %8 = arith.mulf %7, %7 : vector<128x32xf32>
    %cst_2 = arith.constant dense<0.000000e+00> : vector<128xf32>
    %9 = vector.multi_reduction <add>, %8, %cst_2 [1] : vector<128x32xf32> to vector<128xf32>
    %10 = vector.shape_cast %9 : vector<128xf32> to vector<128x1xf32>
    %cst_3 = arith.constant 3.200000e+01 : f32
    %11 = vector.broadcast %cst_3 : f32 to vector<128x1xf32>
    %12 = arith.divf %10, %11 : vector<128x1xf32>
    %cst_4 = arith.constant 9.99999997E-7 : f32
    %13 = vector.broadcast %cst_4 : f32 to vector<128x1xf32>
    %14 = arith.addf %12, %13 : vector<128x1xf32>
    %15 = math.rsqrt %14 : vector<128x1xf32>
    %16 = vector.broadcast %15 : vector<128x1xf32> to vector<128x32xf32>
    %17 = arith.mulf %7, %16 : vector<128x32xf32>
    %c0_5 = arith.constant 0 : index
    %c0_6 = arith.constant 0 : index
    %18 = vector.load %arg2[%c0_5, %c0_6] : memref<1x32xf32, #tpu.memory_space<vmem>>, vector<1x32xf32>
    %19 = vector.broadcast %18 : vector<1x32xf32> to vector<128x32xf32>
    %20 = arith.mulf %17, %19 : vector<128x32xf32>
    %c0_7 = arith.constant 0 : index
    %c0_8 = arith.constant 0 : index
    %21 = vector.load %arg3[%c0_7, %c0_8] : memref<1x32xf32, #tpu.memory_space<vmem>>, vector<1x32xf32>
    %22 = vector.broadcast %21 : vector<1x32xf32> to vector<128x32xf32>
    %23 = arith.addf %20, %22 : vector<128x32xf32>
    %24 = arith.truncf %23 : vector<128x32xf32> to vector<128x32xbf16>
    %c0_9 = arith.constant 0 : index
    %c0_10 = arith.constant 0 : index
    %25 = vector.load %arg4[%c0_9, %c0_10] : memref<32x32xbf16, #tpu.memory_space<vmem>>, vector<32x32xbf16>
    %cst_11 = arith.constant dense<0.000000e+00> : vector<128x32xf32>
    %26 = tpu.matmul %24, %25, %cst_11 {dimension_numbers = #tpu.dot_dimension_numbers<[1], [0], [0], [1], [0, 0, 1, 1], [], []>} : vector<128x32xbf16>, vector<32x32xbf16>, vector<128x32xf32> -> vector<128x32xf32>
    %c0_12 = arith.constant 0 : index
    %c0_13 = arith.constant 0 : index
    %27 = vector.load %arg5[%c0_12, %c0_13] : memref<1x32xf32, #tpu.memory_space<vmem>>, vector<1x32xf32>
    %28 = vector.broadcast %27 : vector<1x32xf32> to vector<128x32xf32>
    %29 = arith.addf %26, %28 : vector<128x32xf32>
    %cst_14 = arith.constant 5.000000e-01 : f32
    %30 = vector.broadcast %cst_14 : f32 to vector<128x32xf32>
    %31 = arith.mulf %30, %29 : vector<128x32xf32>
    %cst_15 = arith.constant 4.471500e-02 : f32
    %32 = vector.broadcast %cst_15 : f32 to vector<128x32xf32>
    %33 = arith.mulf %32, %29 : vector<128x32xf32>
    %34 = arith.mulf %33, %29 : vector<128x32xf32>
    %35 = arith.mulf %34, %29 : vector<128x32xf32>
    %36 = arith.addf %29, %35 : vector<128x32xf32>
    %cst_16 = arith.constant 0.797884583 : f32
    %37 = vector.broadcast %cst_16 : f32 to vector<128x32xf32>
    %38 = arith.mulf %37, %36 : vector<128x32xf32>
    %39 = math.tanh %38 : vector<128x32xf32>
    %cst_17 = arith.constant 1.000000e+00 : f32
    %40 = vector.broadcast %cst_17 : f32 to vector<128x32xf32>
    %41 = arith.addf %40, %39 : vector<128x32xf32>
    %42 = arith.mulf %31, %41 : vector<128x32xf32>
    %43 = arith.truncf %42 : vector<128x32xf32> to vector<128x32xbf16>
    %c0_18 = arith.constant 0 : index
    %c0_19 = arith.constant 0 : index
    %44 = vector.load %arg6[%c0_18, %c0_19] : memref<128x32xbf16, #tpu.memory_space<vmem>>, vector<128x32xbf16>
    tpu.vector_store %arg6[%c0_18, %c0_19], %43 {strides = array<i32>} : memref<128x32xbf16, #tpu.memory_space<vmem>>, vector<128x32xbf16>,
    return
  }
  func.func @transform_0(%arg0: i32) -> (i32, i32) {
    %c0_i32 = arith.constant 0 : i32
    %c0_i32_0 = arith.constant 0 : i32
    return %arg0, %c0_i32 : i32, i32
  }
  func.func @transform_1(%arg0: i32) -> (i32, i32) {
    %c0_i32 = arith.constant 0 : i32
    %c0_i32_0 = arith.constant 0 : i32
    %c0_i32_1 = arith.constant 0 : i32
    return %c0_i32, %c0_i32_0 : i32, i32
  }
  func.func @transform_2(%arg0: i32) -> (i32, i32) {
    %c0_i32 = arith.constant 0 : i32
    %c0_i32_0 = arith.constant 0 : i32
    %c0_i32_1 = arith.constant 0 : i32
    return %c0_i32, %c0_i32_0 : i32, i32
  }
  func.func @transform_3(%arg0: i32) -> (i32, i32) {
    %c0_i32 = arith.constant 0 : i32
    %c0_i32_0 = arith.constant 0 : i32
    %c0_i32_1 = arith.constant 0 : i32
    return %c0_i32, %c0_i32_0 : i32, i32
  }
  func.func @transform_4(%arg0: i32) -> (i32, i32) {
    %c0_i32 = arith.constant 0 : i32
    %c0_i32_0 = arith.constant 0 : i32
    %c0_i32_1 = arith.constant 0 : i32
    return %c0_i32, %c0_i32_0 : i32, i32
  }
  func.func @transform_5(%arg0: i32) -> (i32, i32) {
    %c0_i32 = arith.constant 0 : i32
    %c0_i32_0 = arith.constant 0 : i32
    return %arg0, %c0_i32 : i32, i32
  }
}

module attributes {stable_mosaic.version = 11 : i64} {
  func.func @_mm_ln_kernel(%arg0: i32, %arg1: memref<128x147xbf16, #tpu.memory_space<vmem>>, %arg2: memref<147x32xbf16, #tpu.memory_space<vmem>>, %arg3: memref<1x32xf32, #tpu.memory_space<vmem>>, %arg4: memref<1x32xf32, #tpu.memory_space<vmem>>, %arg5: memref<1x32xf32, #tpu.memory_space<vmem>>, %arg6: memref<128x32xbf16, #tpu.memory_space<vmem>>) attributes {dimension_semantics = [#tpu.dimension_semantics<parallel>], iteration_bounds = array<i64: 1>, scalar_prefetch = 0 : i64, scratch_operands = 0 : i64, tpu.core_type = #tpu.core_type<tc>, window_params = [{transform_indices = @transform_0, window_bounds = array<i64: 128, 147>}, {pipeline_mode = #tpu.pipeline_mode<synchronous>, transform_indices = @transform_1, window_bounds = array<i64: 147, 32>}, {pipeline_mode = #tpu.pipeline_mode<synchronous>, transform_indices = @transform_2, window_bounds = array<i64: 1, 32>}, {pipeline_mode = #tpu.pipeline_mode<synchronous>, transform_indices = @transform_3, window_bounds = array<i64: 1, 32>}, {pipeline_mode = #tpu.pipeline_mode<synchronous>, transform_indices = @transform_4, window_bounds = array<i64: 1, 32>}, {transform_indices = @transform_5, window_bounds = array<i64: 128, 32>}]} {
    %c0 = arith.constant 0 : index
    %c0_0 = arith.constant 0 : index
    %0 = vector.load %arg1[%c0, %c0_0] : memref<128x147xbf16, #tpu.memory_space<vmem>>, vector<128x147xbf16>
    %c0_1 = arith.constant 0 : index
    %c0_2 = arith.constant 0 : index
    %1 = vector.load %arg2[%c0_1, %c0_2] : memref<147x32xbf16, #tpu.memory_space<vmem>>, vector<147x32xbf16>
    %cst = arith.constant dense<0.000000e+00> : vector<128x32xf32>
    %2 = tpu.matmul %0, %1, %cst {dimension_numbers = #tpu.dot_dimension_numbers<[1], [0], [0], [1], [0, 0, 1, 1], [], []>} : vector<128x147xbf16>, vector<147x32xbf16>, vector<128x32xf32> -> vector<128x32xf32>
    %c0_3 = arith.constant 0 : index
    %c0_4 = arith.constant 0 : index
    %3 = vector.load %arg3[%c0_3, %c0_4] : memref<1x32xf32, #tpu.memory_space<vmem>>, vector<1x32xf32>
    %4 = vector.broadcast %3 : vector<1x32xf32> to vector<128x32xf32>
    %5 = arith.addf %2, %4 : vector<128x32xf32>
    %cst_5 = arith.constant dense<0.000000e+00> : vector<128xf32>
    %6 = vector.multi_reduction <add>, %5, %cst_5 [1] : vector<128x32xf32> to vector<128xf32>
    %7 = vector.shape_cast %6 : vector<128xf32> to vector<128x1xf32>
    %cst_6 = arith.constant 3.200000e+01 : f32
    %8 = vector.broadcast %cst_6 : f32 to vector<128x1xf32>
    %9 = arith.divf %7, %8 : vector<128x1xf32>
    %10 = vector.broadcast %9 : vector<128x1xf32> to vector<128x32xf32>
    %11 = arith.subf %5, %10 : vector<128x32xf32>
    %12 = arith.mulf %11, %11 : vector<128x32xf32>
    %cst_7 = arith.constant dense<0.000000e+00> : vector<128xf32>
    %13 = vector.multi_reduction <add>, %12, %cst_7 [1] : vector<128x32xf32> to vector<128xf32>
    %14 = vector.shape_cast %13 : vector<128xf32> to vector<128x1xf32>
    %cst_8 = arith.constant 3.200000e+01 : f32
    %15 = vector.broadcast %cst_8 : f32 to vector<128x1xf32>
    %16 = arith.divf %14, %15 : vector<128x1xf32>
    %cst_9 = arith.constant 9.99999997E-7 : f32
    %17 = vector.broadcast %cst_9 : f32 to vector<128x1xf32>
    %18 = arith.addf %16, %17 : vector<128x1xf32>
    %19 = math.rsqrt %18 : vector<128x1xf32>
    %20 = vector.broadcast %19 : vector<128x1xf32> to vector<128x32xf32>
    %21 = arith.mulf %11, %20 : vector<128x32xf32>
    %c0_10 = arith.constant 0 : index
    %c0_11 = arith.constant 0 : index
    %22 = vector.load %arg4[%c0_10, %c0_11] : memref<1x32xf32, #tpu.memory_space<vmem>>, vector<1x32xf32>
    %23 = vector.broadcast %22 : vector<1x32xf32> to vector<128x32xf32>
    %24 = arith.mulf %21, %23 : vector<128x32xf32>
    %c0_12 = arith.constant 0 : index
    %c0_13 = arith.constant 0 : index
    %25 = vector.load %arg5[%c0_12, %c0_13] : memref<1x32xf32, #tpu.memory_space<vmem>>, vector<1x32xf32>
    %26 = vector.broadcast %25 : vector<1x32xf32> to vector<128x32xf32>
    %27 = arith.addf %24, %26 : vector<128x32xf32>
    %28 = arith.truncf %27 : vector<128x32xf32> to vector<128x32xbf16>
    %c0_14 = arith.constant 0 : index
    %c0_15 = arith.constant 0 : index
    %29 = vector.load %arg6[%c0_14, %c0_15] : memref<128x32xbf16, #tpu.memory_space<vmem>>, vector<128x32xbf16>
    tpu.vector_store %arg6[%c0_14, %c0_15], %28 {strides = array<i32>} : memref<128x32xbf16, #tpu.memory_space<vmem>>, vector<128x32xbf16>,
    return
  }
  func.func @transform_0(%arg0: i32) -> (i32, i32) {
    %c0_i32 = arith.constant 0 : i32
    %c0_i32_0 = arith.constant 0 : i32
    return %arg0, %c0_i32 : i32, i32
  }
  func.func @transform_1(%arg0: i32) -> (i32, i32) {
    %c0_i32 = arith.constant 0 : i32
    %c0_i32_0 = arith.constant 0 : i32
    %c0_i32_1 = arith.constant 0 : i32
    return %c0_i32, %c0_i32_0 : i32, i32
  }
  func.func @transform_2(%arg0: i32) -> (i32, i32) {
    %c0_i32 = arith.constant 0 : i32
    %c0_i32_0 = arith.constant 0 : i32
    %c0_i32_1 = arith.constant 0 : i32
    return %c0_i32, %c0_i32_0 : i32, i32
  }
  func.func @transform_3(%arg0: i32) -> (i32, i32) {
    %c0_i32 = arith.constant 0 : i32
    %c0_i32_0 = arith.constant 0 : i32
    %c0_i32_1 = arith.constant 0 : i32
    return %c0_i32, %c0_i32_0 : i32, i32
  }
  func.func @transform_4(%arg0: i32) -> (i32, i32) {
    %c0_i32 = arith.constant 0 : i32
    %c0_i32_0 = arith.constant 0 : i32
    %c0_i32_1 = arith.constant 0 : i32
    return %c0_i32, %c0_i32_0 : i32, i32
  }
  func.func @transform_5(%arg0: i32) -> (i32, i32) {
    %c0_i32 = arith.constant 0 : i32
    %c0_i32_0 = arith.constant 0 : i32
    return %arg0, %c0_i32 : i32, i32
  }
}

module attributes {stable_mosaic.version = 11 : i64} {
  func.func @_mm_ln_kernel(%arg0: i32, %arg1: memref<32x288xbf16, #tpu.memory_space<vmem>>, %arg2: memref<288x64xbf16, #tpu.memory_space<vmem>>, %arg3: memref<1x64xf32, #tpu.memory_space<vmem>>, %arg4: memref<1x64xf32, #tpu.memory_space<vmem>>, %arg5: memref<1x64xf32, #tpu.memory_space<vmem>>, %arg6: memref<32x64xbf16, #tpu.memory_space<vmem>>) attributes {dimension_semantics = [#tpu.dimension_semantics<parallel>], iteration_bounds = array<i64: 1>, scalar_prefetch = 0 : i64, scratch_operands = 0 : i64, tpu.core_type = #tpu.core_type<tc>, window_params = [{transform_indices = @transform_0, window_bounds = array<i64: 32, 288>}, {pipeline_mode = #tpu.pipeline_mode<synchronous>, transform_indices = @transform_1, window_bounds = array<i64: 288, 64>}, {pipeline_mode = #tpu.pipeline_mode<synchronous>, transform_indices = @transform_2, window_bounds = array<i64: 1, 64>}, {pipeline_mode = #tpu.pipeline_mode<synchronous>, transform_indices = @transform_3, window_bounds = array<i64: 1, 64>}, {pipeline_mode = #tpu.pipeline_mode<synchronous>, transform_indices = @transform_4, window_bounds = array<i64: 1, 64>}, {transform_indices = @transform_5, window_bounds = array<i64: 32, 64>}]} {
    %c0 = arith.constant 0 : index
    %c0_0 = arith.constant 0 : index
    %0 = vector.load %arg1[%c0, %c0_0] : memref<32x288xbf16, #tpu.memory_space<vmem>>, vector<32x288xbf16>
    %c0_1 = arith.constant 0 : index
    %c0_2 = arith.constant 0 : index
    %1 = vector.load %arg2[%c0_1, %c0_2] : memref<288x64xbf16, #tpu.memory_space<vmem>>, vector<288x64xbf16>
    %cst = arith.constant dense<0.000000e+00> : vector<32x64xf32>
    %2 = tpu.matmul %0, %1, %cst {dimension_numbers = #tpu.dot_dimension_numbers<[1], [0], [0], [1], [0, 0, 1, 1], [], []>} : vector<32x288xbf16>, vector<288x64xbf16>, vector<32x64xf32> -> vector<32x64xf32>
    %c0_3 = arith.constant 0 : index
    %c0_4 = arith.constant 0 : index
    %3 = vector.load %arg3[%c0_3, %c0_4] : memref<1x64xf32, #tpu.memory_space<vmem>>, vector<1x64xf32>
    %4 = vector.broadcast %3 : vector<1x64xf32> to vector<32x64xf32>
    %5 = arith.addf %2, %4 : vector<32x64xf32>
    %cst_5 = arith.constant dense<0.000000e+00> : vector<32xf32>
    %6 = vector.multi_reduction <add>, %5, %cst_5 [1] : vector<32x64xf32> to vector<32xf32>
    %7 = vector.shape_cast %6 : vector<32xf32> to vector<32x1xf32>
    %cst_6 = arith.constant 6.400000e+01 : f32
    %8 = vector.broadcast %cst_6 : f32 to vector<32x1xf32>
    %9 = arith.divf %7, %8 : vector<32x1xf32>
    %10 = vector.broadcast %9 : vector<32x1xf32> to vector<32x64xf32>
    %11 = arith.subf %5, %10 : vector<32x64xf32>
    %12 = arith.mulf %11, %11 : vector<32x64xf32>
    %cst_7 = arith.constant dense<0.000000e+00> : vector<32xf32>
    %13 = vector.multi_reduction <add>, %12, %cst_7 [1] : vector<32x64xf32> to vector<32xf32>
    %14 = vector.shape_cast %13 : vector<32xf32> to vector<32x1xf32>
    %cst_8 = arith.constant 6.400000e+01 : f32
    %15 = vector.broadcast %cst_8 : f32 to vector<32x1xf32>
    %16 = arith.divf %14, %15 : vector<32x1xf32>
    %cst_9 = arith.constant 9.99999997E-7 : f32
    %17 = vector.broadcast %cst_9 : f32 to vector<32x1xf32>
    %18 = arith.addf %16, %17 : vector<32x1xf32>
    %19 = math.rsqrt %18 : vector<32x1xf32>
    %20 = vector.broadcast %19 : vector<32x1xf32> to vector<32x64xf32>
    %21 = arith.mulf %11, %20 : vector<32x64xf32>
    %c0_10 = arith.constant 0 : index
    %c0_11 = arith.constant 0 : index
    %22 = vector.load %arg4[%c0_10, %c0_11] : memref<1x64xf32, #tpu.memory_space<vmem>>, vector<1x64xf32>
    %23 = vector.broadcast %22 : vector<1x64xf32> to vector<32x64xf32>
    %24 = arith.mulf %21, %23 : vector<32x64xf32>
    %c0_12 = arith.constant 0 : index
    %c0_13 = arith.constant 0 : index
    %25 = vector.load %arg5[%c0_12, %c0_13] : memref<1x64xf32, #tpu.memory_space<vmem>>, vector<1x64xf32>
    %26 = vector.broadcast %25 : vector<1x64xf32> to vector<32x64xf32>
    %27 = arith.addf %24, %26 : vector<32x64xf32>
    %28 = arith.truncf %27 : vector<32x64xf32> to vector<32x64xbf16>
    %c0_14 = arith.constant 0 : index
    %c0_15 = arith.constant 0 : index
    %29 = vector.load %arg6[%c0_14, %c0_15] : memref<32x64xbf16, #tpu.memory_space<vmem>>, vector<32x64xbf16>
    tpu.vector_store %arg6[%c0_14, %c0_15], %28 {strides = array<i32>} : memref<32x64xbf16, #tpu.memory_space<vmem>>, vector<32x64xbf16>,
    return
  }
  func.func @transform_0(%arg0: i32) -> (i32, i32) {
    %c0_i32 = arith.constant 0 : i32
    %c0_i32_0 = arith.constant 0 : i32
    return %arg0, %c0_i32 : i32, i32
  }
  func.func @transform_1(%arg0: i32) -> (i32, i32) {
    %c0_i32 = arith.constant 0 : i32
    %c0_i32_0 = arith.constant 0 : i32
    %c0_i32_1 = arith.constant 0 : i32
    return %c0_i32, %c0_i32_0 : i32, i32
  }
  func.func @transform_2(%arg0: i32) -> (i32, i32) {
    %c0_i32 = arith.constant 0 : i32
    %c0_i32_0 = arith.constant 0 : i32
    %c0_i32_1 = arith.constant 0 : i32
    return %c0_i32, %c0_i32_0 : i32, i32
  }
  func.func @transform_3(%arg0: i32) -> (i32, i32) {
    %c0_i32 = arith.constant 0 : i32
    %c0_i32_0 = arith.constant 0 : i32
    %c0_i32_1 = arith.constant 0 : i32
    return %c0_i32, %c0_i32_0 : i32, i32
  }
  func.func @transform_4(%arg0: i32) -> (i32, i32) {
    %c0_i32 = arith.constant 0 : i32
    %c0_i32_0 = arith.constant 0 : i32
    %c0_i32_1 = arith.constant 0 : i32
    return %c0_i32, %c0_i32_0 : i32, i32
  }
  func.func @transform_5(%arg0: i32) -> (i32, i32) {
    %c0_i32 = arith.constant 0 : i32
    %c0_i32_0 = arith.constant 0 : i32
    return %arg0, %c0_i32 : i32, i32
  }
}

module attributes {stable_mosaic.version = 11 : i64} {
  func.func @_mm_res_kernel(%arg0: i32, %arg1: memref<32x64xbf16, #tpu.memory_space<vmem>>, %arg2: memref<64x64xbf16, #tpu.memory_space<vmem>>, %arg3: memref<1x64xf32, #tpu.memory_space<vmem>>, %arg4: memref<32x64xbf16, #tpu.memory_space<vmem>>, %arg5: memref<32x64xbf16, #tpu.memory_space<vmem>>) attributes {dimension_semantics = [#tpu.dimension_semantics<parallel>], iteration_bounds = array<i64: 1>, scalar_prefetch = 0 : i64, scratch_operands = 0 : i64, tpu.core_type = #tpu.core_type<tc>, window_params = [{transform_indices = @transform_0, window_bounds = array<i64: 32, 64>}, {pipeline_mode = #tpu.pipeline_mode<synchronous>, transform_indices = @transform_1, window_bounds = array<i64: 64, 64>}, {pipeline_mode = #tpu.pipeline_mode<synchronous>, transform_indices = @transform_2, window_bounds = array<i64: 1, 64>}, {transform_indices = @transform_3, window_bounds = array<i64: 32, 64>}, {transform_indices = @transform_4, window_bounds = array<i64: 32, 64>}]} {
    %c0 = arith.constant 0 : index
    %c0_0 = arith.constant 0 : index
    %0 = vector.load %arg1[%c0, %c0_0] : memref<32x64xbf16, #tpu.memory_space<vmem>>, vector<32x64xbf16>
    %c0_1 = arith.constant 0 : index
    %c0_2 = arith.constant 0 : index
    %1 = vector.load %arg2[%c0_1, %c0_2] : memref<64x64xbf16, #tpu.memory_space<vmem>>, vector<64x64xbf16>
    %cst = arith.constant dense<0.000000e+00> : vector<32x64xf32>
    %2 = tpu.matmul %0, %1, %cst {dimension_numbers = #tpu.dot_dimension_numbers<[1], [0], [0], [1], [0, 0, 1, 1], [], []>} : vector<32x64xbf16>, vector<64x64xbf16>, vector<32x64xf32> -> vector<32x64xf32>
    %c0_3 = arith.constant 0 : index
    %c0_4 = arith.constant 0 : index
    %3 = vector.load %arg3[%c0_3, %c0_4] : memref<1x64xf32, #tpu.memory_space<vmem>>, vector<1x64xf32>
    %4 = vector.broadcast %3 : vector<1x64xf32> to vector<32x64xf32>
    %5 = arith.addf %2, %4 : vector<32x64xf32>
    %c0_5 = arith.constant 0 : index
    %c0_6 = arith.constant 0 : index
    %6 = vector.load %arg4[%c0_5, %c0_6] : memref<32x64xbf16, #tpu.memory_space<vmem>>, vector<32x64xbf16>
    %7 = arith.extf %6 : vector<32x64xbf16> to vector<32x64xf32>
    %8 = arith.addf %5, %7 : vector<32x64xf32>
    %9 = arith.truncf %8 : vector<32x64xf32> to vector<32x64xbf16>
    %c0_7 = arith.constant 0 : index
    %c0_8 = arith.constant 0 : index
    %10 = vector.load %arg5[%c0_7, %c0_8] : memref<32x64xbf16, #tpu.memory_space<vmem>>, vector<32x64xbf16>
    tpu.vector_store %arg5[%c0_7, %c0_8], %9 {strides = array<i32>} : memref<32x64xbf16, #tpu.memory_space<vmem>>, vector<32x64xbf16>,
    return
  }
  func.func @transform_0(%arg0: i32) -> (i32, i32) {
    %c0_i32 = arith.constant 0 : i32
    %c0_i32_0 = arith.constant 0 : i32
    return %arg0, %c0_i32 : i32, i32
  }
  func.func @transform_1(%arg0: i32) -> (i32, i32) {
    %c0_i32 = arith.constant 0 : i32
    %c0_i32_0 = arith.constant 0 : i32
    %c0_i32_1 = arith.constant 0 : i32
    return %c0_i32, %c0_i32_0 : i32, i32
  }
  func.func @transform_2(%arg0: i32) -> (i32, i32) {
    %c0_i32 = arith.constant 0 : i32
    %c0_i32_0 = arith.constant 0 : i32
    %c0_i32_1 = arith.constant 0 : i32
    return %c0_i32, %c0_i32_0 : i32, i32
  }
  func.func @transform_3(%arg0: i32) -> (i32, i32) {
    %c0_i32 = arith.constant 0 : i32
    %c0_i32_0 = arith.constant 0 : i32
    return %arg0, %c0_i32 : i32, i32
  }
  func.func @transform_4(%arg0: i32) -> (i32, i32) {
    %c0_i32 = arith.constant 0 : i32
    %c0_i32_0 = arith.constant 0 : i32
    return %arg0, %c0_i32 : i32, i32
  }
}

module attributes {stable_mosaic.version = 11 : i64} {
  func.func @_ln_mm_kernel(%arg0: i32, %arg1: memref<32x64xbf16, #tpu.memory_space<vmem>>, %arg2: memref<1x64xf32, #tpu.memory_space<vmem>>, %arg3: memref<1x64xf32, #tpu.memory_space<vmem>>, %arg4: memref<64x64xbf16, #tpu.memory_space<vmem>>, %arg5: memref<1x64xf32, #tpu.memory_space<vmem>>, %arg6: memref<32x64xbf16, #tpu.memory_space<vmem>>) attributes {dimension_semantics = [#tpu.dimension_semantics<parallel>], iteration_bounds = array<i64: 1>, scalar_prefetch = 0 : i64, scratch_operands = 0 : i64, tpu.core_type = #tpu.core_type<tc>, window_params = [{transform_indices = @transform_0, window_bounds = array<i64: 32, 64>}, {pipeline_mode = #tpu.pipeline_mode<synchronous>, transform_indices = @transform_1, window_bounds = array<i64: 1, 64>}, {pipeline_mode = #tpu.pipeline_mode<synchronous>, transform_indices = @transform_2, window_bounds = array<i64: 1, 64>}, {pipeline_mode = #tpu.pipeline_mode<synchronous>, transform_indices = @transform_3, window_bounds = array<i64: 64, 64>}, {pipeline_mode = #tpu.pipeline_mode<synchronous>, transform_indices = @transform_4, window_bounds = array<i64: 1, 64>}, {transform_indices = @transform_5, window_bounds = array<i64: 32, 64>}]} {
    %c0 = arith.constant 0 : index
    %c0_0 = arith.constant 0 : index
    %0 = vector.load %arg1[%c0, %c0_0] : memref<32x64xbf16, #tpu.memory_space<vmem>>, vector<32x64xbf16>
    %1 = arith.extf %0 : vector<32x64xbf16> to vector<32x64xf32>
    %cst = arith.constant dense<0.000000e+00> : vector<32xf32>
    %2 = vector.multi_reduction <add>, %1, %cst [1] : vector<32x64xf32> to vector<32xf32>
    %3 = vector.shape_cast %2 : vector<32xf32> to vector<32x1xf32>
    %cst_1 = arith.constant 6.400000e+01 : f32
    %4 = vector.broadcast %cst_1 : f32 to vector<32x1xf32>
    %5 = arith.divf %3, %4 : vector<32x1xf32>
    %6 = vector.broadcast %5 : vector<32x1xf32> to vector<32x64xf32>
    %7 = arith.subf %1, %6 : vector<32x64xf32>
    %8 = arith.mulf %7, %7 : vector<32x64xf32>
    %cst_2 = arith.constant dense<0.000000e+00> : vector<32xf32>
    %9 = vector.multi_reduction <add>, %8, %cst_2 [1] : vector<32x64xf32> to vector<32xf32>
    %10 = vector.shape_cast %9 : vector<32xf32> to vector<32x1xf32>
    %cst_3 = arith.constant 6.400000e+01 : f32
    %11 = vector.broadcast %cst_3 : f32 to vector<32x1xf32>
    %12 = arith.divf %10, %11 : vector<32x1xf32>
    %cst_4 = arith.constant 9.99999997E-7 : f32
    %13 = vector.broadcast %cst_4 : f32 to vector<32x1xf32>
    %14 = arith.addf %12, %13 : vector<32x1xf32>
    %15 = math.rsqrt %14 : vector<32x1xf32>
    %16 = vector.broadcast %15 : vector<32x1xf32> to vector<32x64xf32>
    %17 = arith.mulf %7, %16 : vector<32x64xf32>
    %c0_5 = arith.constant 0 : index
    %c0_6 = arith.constant 0 : index
    %18 = vector.load %arg2[%c0_5, %c0_6] : memref<1x64xf32, #tpu.memory_space<vmem>>, vector<1x64xf32>
    %19 = vector.broadcast %18 : vector<1x64xf32> to vector<32x64xf32>
    %20 = arith.mulf %17, %19 : vector<32x64xf32>
    %c0_7 = arith.constant 0 : index
    %c0_8 = arith.constant 0 : index
    %21 = vector.load %arg3[%c0_7, %c0_8] : memref<1x64xf32, #tpu.memory_space<vmem>>, vector<1x64xf32>
    %22 = vector.broadcast %21 : vector<1x64xf32> to vector<32x64xf32>
    %23 = arith.addf %20, %22 : vector<32x64xf32>
    %24 = arith.truncf %23 : vector<32x64xf32> to vector<32x64xbf16>
    %c0_9 = arith.constant 0 : index
    %c0_10 = arith.constant 0 : index
    %25 = vector.load %arg4[%c0_9, %c0_10] : memref<64x64xbf16, #tpu.memory_space<vmem>>, vector<64x64xbf16>
    %cst_11 = arith.constant dense<0.000000e+00> : vector<32x64xf32>
    %26 = tpu.matmul %24, %25, %cst_11 {dimension_numbers = #tpu.dot_dimension_numbers<[1], [0], [0], [1], [0, 0, 1, 1], [], []>} : vector<32x64xbf16>, vector<64x64xbf16>, vector<32x64xf32> -> vector<32x64xf32>
    %c0_12 = arith.constant 0 : index
    %c0_13 = arith.constant 0 : index
    %27 = vector.load %arg5[%c0_12, %c0_13] : memref<1x64xf32, #tpu.memory_space<vmem>>, vector<1x64xf32>
    %28 = vector.broadcast %27 : vector<1x64xf32> to vector<32x64xf32>
    %29 = arith.addf %26, %28 : vector<32x64xf32>
    %cst_14 = arith.constant 5.000000e-01 : f32
    %30 = vector.broadcast %cst_14 : f32 to vector<32x64xf32>
    %31 = arith.mulf %30, %29 : vector<32x64xf32>
    %cst_15 = arith.constant 4.471500e-02 : f32
    %32 = vector.broadcast %cst_15 : f32 to vector<32x64xf32>
    %33 = arith.mulf %32, %29 : vector<32x64xf32>
    %34 = arith.mulf %33, %29 : vector<32x64xf32>
    %35 = arith.mulf %34, %29 : vector<32x64xf32>
    %36 = arith.addf %29, %35 : vector<32x64xf32>
    %cst_16 = arith.constant 0.797884583 : f32
    %37 = vector.broadcast %cst_16 : f32 to vector<32x64xf32>
    %38 = arith.mulf %37, %36 : vector<32x64xf32>
    %39 = math.tanh %38 : vector<32x64xf32>
    %cst_17 = arith.constant 1.000000e+00 : f32
    %40 = vector.broadcast %cst_17 : f32 to vector<32x64xf32>
    %41 = arith.addf %40, %39 : vector<32x64xf32>
    %42 = arith.mulf %31, %41 : vector<32x64xf32>
    %43 = arith.truncf %42 : vector<32x64xf32> to vector<32x64xbf16>
    %c0_18 = arith.constant 0 : index
    %c0_19 = arith.constant 0 : index
    %44 = vector.load %arg6[%c0_18, %c0_19] : memref<32x64xbf16, #tpu.memory_space<vmem>>, vector<32x64xbf16>
    tpu.vector_store %arg6[%c0_18, %c0_19], %43 {strides = array<i32>} : memref<32x64xbf16, #tpu.memory_space<vmem>>, vector<32x64xbf16>,
    return
  }
  func.func @transform_0(%arg0: i32) -> (i32, i32) {
    %c0_i32 = arith.constant 0 : i32
    %c0_i32_0 = arith.constant 0 : i32
    return %arg0, %c0_i32 : i32, i32
  }
  func.func @transform_1(%arg0: i32) -> (i32, i32) {
    %c0_i32 = arith.constant 0 : i32
    %c0_i32_0 = arith.constant 0 : i32
    %c0_i32_1 = arith.constant 0 : i32
    return %c0_i32, %c0_i32_0 : i32, i32
  }
  func.func @transform_2(%arg0: i32) -> (i32, i32) {
    %c0_i32 = arith.constant 0 : i32
    %c0_i32_0 = arith.constant 0 : i32
    %c0_i32_1 = arith.constant 0 : i32
    return %c0_i32, %c0_i32_0 : i32, i32
  }
  func.func @transform_3(%arg0: i32) -> (i32, i32) {
    %c0_i32 = arith.constant 0 : i32
    %c0_i32_0 = arith.constant 0 : i32
    %c0_i32_1 = arith.constant 0 : i32
    return %c0_i32, %c0_i32_0 : i32, i32
  }
  func.func @transform_4(%arg0: i32) -> (i32, i32) {
    %c0_i32 = arith.constant 0 : i32
    %c0_i32_0 = arith.constant 0 : i32
    %c0_i32_1 = arith.constant 0 : i32
    return %c0_i32, %c0_i32_0 : i32, i32
  }
  func.func @transform_5(%arg0: i32) -> (i32, i32) {
    %c0_i32 = arith.constant 0 : i32
    %c0_i32_0 = arith.constant 0 : i32
    return %arg0, %c0_i32 : i32, i32
  }
}

module attributes {stable_mosaic.version = 11 : i64} {
  func.func @_ln_kernel(%arg0: i32, %arg1: memref<32x64xbf16, #tpu.memory_space<vmem>>, %arg2: memref<1x64xf32, #tpu.memory_space<vmem>>, %arg3: memref<1x64xf32, #tpu.memory_space<vmem>>, %arg4: memref<32x64xbf16, #tpu.memory_space<vmem>>) attributes {dimension_semantics = [#tpu.dimension_semantics<parallel>], iteration_bounds = array<i64: 1>, scalar_prefetch = 0 : i64, scratch_operands = 0 : i64, tpu.core_type = #tpu.core_type<tc>, window_params = [{transform_indices = @transform_0, window_bounds = array<i64: 32, 64>}, {pipeline_mode = #tpu.pipeline_mode<synchronous>, transform_indices = @transform_1, window_bounds = array<i64: 1, 64>}, {pipeline_mode = #tpu.pipeline_mode<synchronous>, transform_indices = @transform_2, window_bounds = array<i64: 1, 64>}, {transform_indices = @transform_3, window_bounds = array<i64: 32, 64>}]} {
    %c0 = arith.constant 0 : index
    %c0_0 = arith.constant 0 : index
    %0 = vector.load %arg1[%c0, %c0_0] : memref<32x64xbf16, #tpu.memory_space<vmem>>, vector<32x64xbf16>
    %1 = arith.extf %0 : vector<32x64xbf16> to vector<32x64xf32>
    %cst = arith.constant dense<0.000000e+00> : vector<32xf32>
    %2 = vector.multi_reduction <add>, %1, %cst [1] : vector<32x64xf32> to vector<32xf32>
    %3 = vector.shape_cast %2 : vector<32xf32> to vector<32x1xf32>
    %cst_1 = arith.constant 6.400000e+01 : f32
    %4 = vector.broadcast %cst_1 : f32 to vector<32x1xf32>
    %5 = arith.divf %3, %4 : vector<32x1xf32>
    %6 = vector.broadcast %5 : vector<32x1xf32> to vector<32x64xf32>
    %7 = arith.subf %1, %6 : vector<32x64xf32>
    %8 = arith.mulf %7, %7 : vector<32x64xf32>
    %cst_2 = arith.constant dense<0.000000e+00> : vector<32xf32>
    %9 = vector.multi_reduction <add>, %8, %cst_2 [1] : vector<32x64xf32> to vector<32xf32>
    %10 = vector.shape_cast %9 : vector<32xf32> to vector<32x1xf32>
    %cst_3 = arith.constant 6.400000e+01 : f32
    %11 = vector.broadcast %cst_3 : f32 to vector<32x1xf32>
    %12 = arith.divf %10, %11 : vector<32x1xf32>
    %cst_4 = arith.constant 9.99999997E-7 : f32
    %13 = vector.broadcast %cst_4 : f32 to vector<32x1xf32>
    %14 = arith.addf %12, %13 : vector<32x1xf32>
    %15 = math.rsqrt %14 : vector<32x1xf32>
    %16 = vector.broadcast %15 : vector<32x1xf32> to vector<32x64xf32>
    %17 = arith.mulf %7, %16 : vector<32x64xf32>
    %c0_5 = arith.constant 0 : index
    %c0_6 = arith.constant 0 : index
    %18 = vector.load %arg2[%c0_5, %c0_6] : memref<1x64xf32, #tpu.memory_space<vmem>>, vector<1x64xf32>
    %19 = vector.broadcast %18 : vector<1x64xf32> to vector<32x64xf32>
    %20 = arith.mulf %17, %19 : vector<32x64xf32>
    %c0_7 = arith.constant 0 : index
    %c0_8 = arith.constant 0 : index
    %21 = vector.load %arg3[%c0_7, %c0_8] : memref<1x64xf32, #tpu.memory_space<vmem>>, vector<1x64xf32>
    %22 = vector.broadcast %21 : vector<1x64xf32> to vector<32x64xf32>
    %23 = arith.addf %20, %22 : vector<32x64xf32>
    %24 = arith.truncf %23 : vector<32x64xf32> to vector<32x64xbf16>
    %c0_9 = arith.constant 0 : index
    %c0_10 = arith.constant 0 : index
    %25 = vector.load %arg4[%c0_9, %c0_10] : memref<32x64xbf16, #tpu.memory_space<vmem>>, vector<32x64xbf16>
    tpu.vector_store %arg4[%c0_9, %c0_10], %24 {strides = array<i32>} : memref<32x64xbf16, #tpu.memory_space<vmem>>, vector<32x64xbf16>,
    return
  }
  func.func @transform_0(%arg0: i32) -> (i32, i32) {
    %c0_i32 = arith.constant 0 : i32
    %c0_i32_0 = arith.constant 0 : i32
    return %arg0, %c0_i32 : i32, i32
  }
  func.func @transform_1(%arg0: i32) -> (i32, i32) {
    %c0_i32 = arith.constant 0 : i32
    %c0_i32_0 = arith.constant 0 : i32
    %c0_i32_1 = arith.constant 0 : i32
    return %c0_i32, %c0_i32_0 : i32, i32
  }
  func.func @transform_2(%arg0: i32) -> (i32, i32) {
    %c0_i32 = arith.constant 0 : i32
    %c0_i32_0 = arith.constant 0 : i32
    %c0_i32_1 = arith.constant 0 : i32
    return %c0_i32, %c0_i32_0 : i32, i32
  }
  func.func @transform_3(%arg0: i32) -> (i32, i32) {
    %c0_i32 = arith.constant 0 : i32
    %c0_i32_0 = arith.constant 0 : i32
    return %arg0, %c0_i32 : i32, i32
  }
}

module attributes {stable_mosaic.version = 11 : i64} {
  func.func @_mm_ln_kernel(%arg0: i32, %arg1: memref<8x576xbf16, #tpu.memory_space<vmem>>, %arg2: memref<576x128xbf16, #tpu.memory_space<vmem>>, %arg3: memref<1x128xf32, #tpu.memory_space<vmem>>, %arg4: memref<1x128xf32, #tpu.memory_space<vmem>>, %arg5: memref<1x128xf32, #tpu.memory_space<vmem>>, %arg6: memref<8x128xbf16, #tpu.memory_space<vmem>>) attributes {dimension_semantics = [#tpu.dimension_semantics<parallel>], iteration_bounds = array<i64: 1>, scalar_prefetch = 0 : i64, scratch_operands = 0 : i64, tpu.core_type = #tpu.core_type<tc>, window_params = [{transform_indices = @transform_0, window_bounds = array<i64: 8, 576>}, {pipeline_mode = #tpu.pipeline_mode<synchronous>, transform_indices = @transform_1, window_bounds = array<i64: 576, 128>}, {pipeline_mode = #tpu.pipeline_mode<synchronous>, transform_indices = @transform_2, window_bounds = array<i64: 1, 128>}, {pipeline_mode = #tpu.pipeline_mode<synchronous>, transform_indices = @transform_3, window_bounds = array<i64: 1, 128>}, {pipeline_mode = #tpu.pipeline_mode<synchronous>, transform_indices = @transform_4, window_bounds = array<i64: 1, 128>}, {transform_indices = @transform_5, window_bounds = array<i64: 8, 128>}]} {
    %c0 = arith.constant 0 : index
    %c0_0 = arith.constant 0 : index
    %0 = vector.load %arg1[%c0, %c0_0] : memref<8x576xbf16, #tpu.memory_space<vmem>>, vector<8x576xbf16>
    %c0_1 = arith.constant 0 : index
    %c0_2 = arith.constant 0 : index
    %1 = vector.load %arg2[%c0_1, %c0_2] : memref<576x128xbf16, #tpu.memory_space<vmem>>, vector<576x128xbf16>
    %cst = arith.constant dense<0.000000e+00> : vector<8x128xf32>
    %2 = tpu.matmul %0, %1, %cst {dimension_numbers = #tpu.dot_dimension_numbers<[1], [0], [0], [1], [0, 0, 1, 1], [], []>} : vector<8x576xbf16>, vector<576x128xbf16>, vector<8x128xf32> -> vector<8x128xf32>
    %c0_3 = arith.constant 0 : index
    %c0_4 = arith.constant 0 : index
    %3 = vector.load %arg3[%c0_3, %c0_4] : memref<1x128xf32, #tpu.memory_space<vmem>>, vector<1x128xf32>
    %4 = vector.broadcast %3 : vector<1x128xf32> to vector<8x128xf32>
    %5 = arith.addf %2, %4 : vector<8x128xf32>
    %cst_5 = arith.constant dense<0.000000e+00> : vector<8xf32>
    %6 = vector.multi_reduction <add>, %5, %cst_5 [1] : vector<8x128xf32> to vector<8xf32>
    %7 = vector.shape_cast %6 : vector<8xf32> to vector<8x1xf32>
    %cst_6 = arith.constant 1.280000e+02 : f32
    %8 = vector.broadcast %cst_6 : f32 to vector<8x1xf32>
    %9 = arith.divf %7, %8 : vector<8x1xf32>
    %10 = vector.broadcast %9 : vector<8x1xf32> to vector<8x128xf32>
    %11 = arith.subf %5, %10 : vector<8x128xf32>
    %12 = arith.mulf %11, %11 : vector<8x128xf32>
    %cst_7 = arith.constant dense<0.000000e+00> : vector<8xf32>
    %13 = vector.multi_reduction <add>, %12, %cst_7 [1] : vector<8x128xf32> to vector<8xf32>
    %14 = vector.shape_cast %13 : vector<8xf32> to vector<8x1xf32>
    %cst_8 = arith.constant 1.280000e+02 : f32
    %15 = vector.broadcast %cst_8 : f32 to vector<8x1xf32>
    %16 = arith.divf %14, %15 : vector<8x1xf32>
    %cst_9 = arith.constant 9.99999997E-7 : f32
    %17 = vector.broadcast %cst_9 : f32 to vector<8x1xf32>
    %18 = arith.addf %16, %17 : vector<8x1xf32>
    %19 = math.rsqrt %18 : vector<8x1xf32>
    %20 = vector.broadcast %19 : vector<8x1xf32> to vector<8x128xf32>
    %21 = arith.mulf %11, %20 : vector<8x128xf32>
    %c0_10 = arith.constant 0 : index
    %c0_11 = arith.constant 0 : index
    %22 = vector.load %arg4[%c0_10, %c0_11] : memref<1x128xf32, #tpu.memory_space<vmem>>, vector<1x128xf32>
    %23 = vector.broadcast %22 : vector<1x128xf32> to vector<8x128xf32>
    %24 = arith.mulf %21, %23 : vector<8x128xf32>
    %c0_12 = arith.constant 0 : index
    %c0_13 = arith.constant 0 : index
    %25 = vector.load %arg5[%c0_12, %c0_13] : memref<1x128xf32, #tpu.memory_space<vmem>>, vector<1x128xf32>
    %26 = vector.broadcast %25 : vector<1x128xf32> to vector<8x128xf32>
    %27 = arith.addf %24, %26 : vector<8x128xf32>
    %28 = arith.truncf %27 : vector<8x128xf32> to vector<8x128xbf16>
    %c0_14 = arith.constant 0 : index
    %c0_15 = arith.constant 0 : index
    %29 = vector.load %arg6[%c0_14, %c0_15] : memref<8x128xbf16, #tpu.memory_space<vmem>>, vector<8x128xbf16>
    tpu.vector_store %arg6[%c0_14, %c0_15], %28 {strides = array<i32>} : memref<8x128xbf16, #tpu.memory_space<vmem>>, vector<8x128xbf16>,
    return
  }
  func.func @transform_0(%arg0: i32) -> (i32, i32) {
    %c0_i32 = arith.constant 0 : i32
    %c0_i32_0 = arith.constant 0 : i32
    return %arg0, %c0_i32 : i32, i32
  }
  func.func @transform_1(%arg0: i32) -> (i32, i32) {
    %c0_i32 = arith.constant 0 : i32
    %c0_i32_0 = arith.constant 0 : i32
    %c0_i32_1 = arith.constant 0 : i32
    return %c0_i32, %c0_i32_0 : i32, i32
  }
  func.func @transform_2(%arg0: i32) -> (i32, i32) {
    %c0_i32 = arith.constant 0 : i32
    %c0_i32_0 = arith.constant 0 : i32
    %c0_i32_1 = arith.constant 0 : i32
    return %c0_i32, %c0_i32_0 : i32, i32
  }
  func.func @transform_3(%arg0: i32) -> (i32, i32) {
    %c0_i32 = arith.constant 0 : i32
    %c0_i32_0 = arith.constant 0 : i32
    %c0_i32_1 = arith.constant 0 : i32
    return %c0_i32, %c0_i32_0 : i32, i32
  }
  func.func @transform_4(%arg0: i32) -> (i32, i32) {
    %c0_i32 = arith.constant 0 : i32
    %c0_i32_0 = arith.constant 0 : i32
    %c0_i32_1 = arith.constant 0 : i32
    return %c0_i32, %c0_i32_0 : i32, i32
  }
  func.func @transform_5(%arg0: i32) -> (i32, i32) {
    %c0_i32 = arith.constant 0 : i32
    %c0_i32_0 = arith.constant 0 : i32
    return %arg0, %c0_i32 : i32, i32
  }
}

module attributes {stable_mosaic.version = 11 : i64} {
  func.func @_ln_mm_kernel(%arg0: i32, %arg1: memref<8x128xbf16, #tpu.memory_space<vmem>>, %arg2: memref<1x128xf32, #tpu.memory_space<vmem>>, %arg3: memref<1x128xf32, #tpu.memory_space<vmem>>, %arg4: memref<128x128xbf16, #tpu.memory_space<vmem>>, %arg5: memref<1x128xf32, #tpu.memory_space<vmem>>, %arg6: memref<8x128xbf16, #tpu.memory_space<vmem>>) attributes {dimension_semantics = [#tpu.dimension_semantics<parallel>], iteration_bounds = array<i64: 1>, scalar_prefetch = 0 : i64, scratch_operands = 0 : i64, tpu.core_type = #tpu.core_type<tc>, window_params = [{transform_indices = @transform_0, window_bounds = array<i64: 8, 128>}, {pipeline_mode = #tpu.pipeline_mode<synchronous>, transform_indices = @transform_1, window_bounds = array<i64: 1, 128>}, {pipeline_mode = #tpu.pipeline_mode<synchronous>, transform_indices = @transform_2, window_bounds = array<i64: 1, 128>}, {pipeline_mode = #tpu.pipeline_mode<synchronous>, transform_indices = @transform_3, window_bounds = array<i64: 128, 128>}, {pipeline_mode = #tpu.pipeline_mode<synchronous>, transform_indices = @transform_4, window_bounds = array<i64: 1, 128>}, {transform_indices = @transform_5, window_bounds = array<i64: 8, 128>}]} {
    %c0 = arith.constant 0 : index
    %c0_0 = arith.constant 0 : index
    %0 = vector.load %arg1[%c0, %c0_0] : memref<8x128xbf16, #tpu.memory_space<vmem>>, vector<8x128xbf16>
    %1 = arith.extf %0 : vector<8x128xbf16> to vector<8x128xf32>
    %cst = arith.constant dense<0.000000e+00> : vector<8xf32>
    %2 = vector.multi_reduction <add>, %1, %cst [1] : vector<8x128xf32> to vector<8xf32>
    %3 = vector.shape_cast %2 : vector<8xf32> to vector<8x1xf32>
    %cst_1 = arith.constant 1.280000e+02 : f32
    %4 = vector.broadcast %cst_1 : f32 to vector<8x1xf32>
    %5 = arith.divf %3, %4 : vector<8x1xf32>
    %6 = vector.broadcast %5 : vector<8x1xf32> to vector<8x128xf32>
    %7 = arith.subf %1, %6 : vector<8x128xf32>
    %8 = arith.mulf %7, %7 : vector<8x128xf32>
    %cst_2 = arith.constant dense<0.000000e+00> : vector<8xf32>
    %9 = vector.multi_reduction <add>, %8, %cst_2 [1] : vector<8x128xf32> to vector<8xf32>
    %10 = vector.shape_cast %9 : vector<8xf32> to vector<8x1xf32>
    %cst_3 = arith.constant 1.280000e+02 : f32
    %11 = vector.broadcast %cst_3 : f32 to vector<8x1xf32>
    %12 = arith.divf %10, %11 : vector<8x1xf32>
    %cst_4 = arith.constant 9.99999997E-7 : f32
    %13 = vector.broadcast %cst_4 : f32 to vector<8x1xf32>
    %14 = arith.addf %12, %13 : vector<8x1xf32>
    %15 = math.rsqrt %14 : vector<8x1xf32>
    %16 = vector.broadcast %15 : vector<8x1xf32> to vector<8x128xf32>
    %17 = arith.mulf %7, %16 : vector<8x128xf32>
    %c0_5 = arith.constant 0 : index
    %c0_6 = arith.constant 0 : index
    %18 = vector.load %arg2[%c0_5, %c0_6] : memref<1x128xf32, #tpu.memory_space<vmem>>, vector<1x128xf32>
    %19 = vector.broadcast %18 : vector<1x128xf32> to vector<8x128xf32>
    %20 = arith.mulf %17, %19 : vector<8x128xf32>
    %c0_7 = arith.constant 0 : index
    %c0_8 = arith.constant 0 : index
    %21 = vector.load %arg3[%c0_7, %c0_8] : memref<1x128xf32, #tpu.memory_space<vmem>>, vector<1x128xf32>
    %22 = vector.broadcast %21 : vector<1x128xf32> to vector<8x128xf32>
    %23 = arith.addf %20, %22 : vector<8x128xf32>
    %24 = arith.truncf %23 : vector<8x128xf32> to vector<8x128xbf16>
    %c0_9 = arith.constant 0 : index
    %c0_10 = arith.constant 0 : index
    %25 = vector.load %arg4[%c0_9, %c0_10] : memref<128x128xbf16, #tpu.memory_space<vmem>>, vector<128x128xbf16>
    %cst_11 = arith.constant dense<0.000000e+00> : vector<8x128xf32>
    %26 = tpu.matmul %24, %25, %cst_11 {dimension_numbers = #tpu.dot_dimension_numbers<[1], [0], [0], [1], [0, 0, 1, 1], [], []>} : vector<8x128xbf16>, vector<128x128xbf16>, vector<8x128xf32> -> vector<8x128xf32>
    %c0_12 = arith.constant 0 : index
    %c0_13 = arith.constant 0 : index
    %27 = vector.load %arg5[%c0_12, %c0_13] : memref<1x128xf32, #tpu.memory_space<vmem>>, vector<1x128xf32>
    %28 = vector.broadcast %27 : vector<1x128xf32> to vector<8x128xf32>
    %29 = arith.addf %26, %28 : vector<8x128xf32>
    %cst_14 = arith.constant 5.000000e-01 : f32
    %30 = vector.broadcast %cst_14 : f32 to vector<8x128xf32>
    %31 = arith.mulf %30, %29 : vector<8x128xf32>
    %cst_15 = arith.constant 4.471500e-02 : f32
    %32 = vector.broadcast %cst_15 : f32 to vector<8x128xf32>
    %33 = arith.mulf %32, %29 : vector<8x128xf32>
    %34 = arith.mulf %33, %29 : vector<8x128xf32>
    %35 = arith.mulf %34, %29 : vector<8x128xf32>
    %36 = arith.addf %29, %35 : vector<8x128xf32>
    %cst_16 = arith.constant 0.797884583 : f32
    %37 = vector.broadcast %cst_16 : f32 to vector<8x128xf32>
    %38 = arith.mulf %37, %36 : vector<8x128xf32>
    %39 = math.tanh %38 : vector<8x128xf32>
    %cst_17 = arith.constant 1.000000e+00 : f32
    %40 = vector.broadcast %cst_17 : f32 to vector<8x128xf32>
    %41 = arith.addf %40, %39 : vector<8x128xf32>
    %42 = arith.mulf %31, %41 : vector<8x128xf32>
    %43 = arith.truncf %42 : vector<8x128xf32> to vector<8x128xbf16>
    %c0_18 = arith.constant 0 : index
    %c0_19 = arith.constant 0 : index
    %44 = vector.load %arg6[%c0_18, %c0_19] : memref<8x128xbf16, #tpu.memory_space<vmem>>, vector<8x128xbf16>
    tpu.vector_store %arg6[%c0_18, %c0_19], %43 {strides = array<i32>} : memref<8x128xbf16, #tpu.memory_space<vmem>>, vector<8x128xbf16>,
    return
  }
  func.func @transform_0(%arg0: i32) -> (i32, i32) {
    %c0_i32 = arith.constant 0 : i32
    %c0_i32_0 = arith.constant 0 : i32
    return %arg0, %c0_i32 : i32, i32
  }
  func.func @transform_1(%arg0: i32) -> (i32, i32) {
    %c0_i32 = arith.constant 0 : i32
    %c0_i32_0 = arith.constant 0 : i32
    %c0_i32_1 = arith.constant 0 : i32
    return %c0_i32, %c0_i32_0 : i32, i32
  }
  func.func @transform_2(%arg0: i32) -> (i32, i32) {
    %c0_i32 = arith.constant 0 : i32
    %c0_i32_0 = arith.constant 0 : i32
    %c0_i32_1 = arith.constant 0 : i32
    return %c0_i32, %c0_i32_0 : i32, i32
  }
  func.func @transform_3(%arg0: i32) -> (i32, i32) {
    %c0_i32 = arith.constant 0 : i32
    %c0_i32_0 = arith.constant 0 : i32
    %c0_i32_1 = arith.constant 0 : i32
    return %c0_i32, %c0_i32_0 : i32, i32
  }
  func.func @transform_4(%arg0: i32) -> (i32, i32) {
    %c0_i32 = arith.constant 0 : i32
    %c0_i32_0 = arith.constant 0 : i32
    %c0_i32_1 = arith.constant 0 : i32
    return %c0_i32, %c0_i32_0 : i32, i32
  }
  func.func @transform_5(%arg0: i32) -> (i32, i32) {
    %c0_i32 = arith.constant 0 : i32
    %c0_i32_0 = arith.constant 0 : i32
    return %arg0, %c0_i32 : i32, i32
  }
}

module attributes {stable_mosaic.version = 11 : i64} {
  func.func @_mm_res_kernel(%arg0: i32, %arg1: memref<8x128xbf16, #tpu.memory_space<vmem>>, %arg2: memref<128x128xbf16, #tpu.memory_space<vmem>>, %arg3: memref<1x128xf32, #tpu.memory_space<vmem>>, %arg4: memref<8x128xbf16, #tpu.memory_space<vmem>>, %arg5: memref<8x128xbf16, #tpu.memory_space<vmem>>) attributes {dimension_semantics = [#tpu.dimension_semantics<parallel>], iteration_bounds = array<i64: 1>, scalar_prefetch = 0 : i64, scratch_operands = 0 : i64, tpu.core_type = #tpu.core_type<tc>, window_params = [{transform_indices = @transform_0, window_bounds = array<i64: 8, 128>}, {pipeline_mode = #tpu.pipeline_mode<synchronous>, transform_indices = @transform_1, window_bounds = array<i64: 128, 128>}, {pipeline_mode = #tpu.pipeline_mode<synchronous>, transform_indices = @transform_2, window_bounds = array<i64: 1, 128>}, {transform_indices = @transform_3, window_bounds = array<i64: 8, 128>}, {transform_indices = @transform_4, window_bounds = array<i64: 8, 128>}]} {
    %c0 = arith.constant 0 : index
    %c0_0 = arith.constant 0 : index
    %0 = vector.load %arg1[%c0, %c0_0] : memref<8x128xbf16, #tpu.memory_space<vmem>>, vector<8x128xbf16>
    %c0_1 = arith.constant 0 : index
    %c0_2 = arith.constant 0 : index
    %1 = vector.load %arg2[%c0_1, %c0_2] : memref<128x128xbf16, #tpu.memory_space<vmem>>, vector<128x128xbf16>
    %cst = arith.constant dense<0.000000e+00> : vector<8x128xf32>
    %2 = tpu.matmul %0, %1, %cst {dimension_numbers = #tpu.dot_dimension_numbers<[1], [0], [0], [1], [0, 0, 1, 1], [], []>} : vector<8x128xbf16>, vector<128x128xbf16>, vector<8x128xf32> -> vector<8x128xf32>
    %c0_3 = arith.constant 0 : index
    %c0_4 = arith.constant 0 : index
    %3 = vector.load %arg3[%c0_3, %c0_4] : memref<1x128xf32, #tpu.memory_space<vmem>>, vector<1x128xf32>
    %4 = vector.broadcast %3 : vector<1x128xf32> to vector<8x128xf32>
    %5 = arith.addf %2, %4 : vector<8x128xf32>
    %c0_5 = arith.constant 0 : index
    %c0_6 = arith.constant 0 : index
    %6 = vector.load %arg4[%c0_5, %c0_6] : memref<8x128xbf16, #tpu.memory_space<vmem>>, vector<8x128xbf16>
    %7 = arith.extf %6 : vector<8x128xbf16> to vector<8x128xf32>
    %8 = arith.addf %5, %7 : vector<8x128xf32>
    %9 = arith.truncf %8 : vector<8x128xf32> to vector<8x128xbf16>
    %c0_7 = arith.constant 0 : index
    %c0_8 = arith.constant 0 : index
    %10 = vector.load %arg5[%c0_7, %c0_8] : memref<8x128xbf16, #tpu.memory_space<vmem>>, vector<8x128xbf16>
    tpu.vector_store %arg5[%c0_7, %c0_8], %9 {strides = array<i32>} : memref<8x128xbf16, #tpu.memory_space<vmem>>, vector<8x128xbf16>,
    return
  }
  func.func @transform_0(%arg0: i32) -> (i32, i32) {
    %c0_i32 = arith.constant 0 : i32
    %c0_i32_0 = arith.constant 0 : i32
    return %arg0, %c0_i32 : i32, i32
  }
  func.func @transform_1(%arg0: i32) -> (i32, i32) {
    %c0_i32 = arith.constant 0 : i32
    %c0_i32_0 = arith.constant 0 : i32
    %c0_i32_1 = arith.constant 0 : i32
    return %c0_i32, %c0_i32_0 : i32, i32
  }
  func.func @transform_2(%arg0: i32) -> (i32, i32) {
    %c0_i32 = arith.constant 0 : i32
    %c0_i32_0 = arith.constant 0 : i32
    %c0_i32_1 = arith.constant 0 : i32
    return %c0_i32, %c0_i32_0 : i32, i32
  }
  func.func @transform_3(%arg0: i32) -> (i32, i32) {
    %c0_i32 = arith.constant 0 : i32
    %c0_i32_0 = arith.constant 0 : i32
    return %arg0, %c0_i32 : i32, i32
  }
  func.func @transform_4(%arg0: i32) -> (i32, i32) {
    %c0_i32 = arith.constant 0 : i32
    %c0_i32_0 = arith.constant 0 : i32
    return %arg0, %c0_i32 : i32, i32
  }
}

module attributes {stable_mosaic.version = 11 : i64} {
  func.func @_ln_kernel(%arg0: i32, %arg1: memref<8x128xbf16, #tpu.memory_space<vmem>>, %arg2: memref<1x128xf32, #tpu.memory_space<vmem>>, %arg3: memref<1x128xf32, #tpu.memory_space<vmem>>, %arg4: memref<8x128xbf16, #tpu.memory_space<vmem>>) attributes {dimension_semantics = [#tpu.dimension_semantics<parallel>], iteration_bounds = array<i64: 1>, scalar_prefetch = 0 : i64, scratch_operands = 0 : i64, tpu.core_type = #tpu.core_type<tc>, window_params = [{transform_indices = @transform_0, window_bounds = array<i64: 8, 128>}, {pipeline_mode = #tpu.pipeline_mode<synchronous>, transform_indices = @transform_1, window_bounds = array<i64: 1, 128>}, {pipeline_mode = #tpu.pipeline_mode<synchronous>, transform_indices = @transform_2, window_bounds = array<i64: 1, 128>}, {transform_indices = @transform_3, window_bounds = array<i64: 8, 128>}]} {
    %c0 = arith.constant 0 : index
    %c0_0 = arith.constant 0 : index
    %0 = vector.load %arg1[%c0, %c0_0] : memref<8x128xbf16, #tpu.memory_space<vmem>>, vector<8x128xbf16>
    %1 = arith.extf %0 : vector<8x128xbf16> to vector<8x128xf32>
    %cst = arith.constant dense<0.000000e+00> : vector<8xf32>
    %2 = vector.multi_reduction <add>, %1, %cst [1] : vector<8x128xf32> to vector<8xf32>
    %3 = vector.shape_cast %2 : vector<8xf32> to vector<8x1xf32>
    %cst_1 = arith.constant 1.280000e+02 : f32
    %4 = vector.broadcast %cst_1 : f32 to vector<8x1xf32>
    %5 = arith.divf %3, %4 : vector<8x1xf32>
    %6 = vector.broadcast %5 : vector<8x1xf32> to vector<8x128xf32>
    %7 = arith.subf %1, %6 : vector<8x128xf32>
    %8 = arith.mulf %7, %7 : vector<8x128xf32>
    %cst_2 = arith.constant dense<0.000000e+00> : vector<8xf32>
    %9 = vector.multi_reduction <add>, %8, %cst_2 [1] : vector<8x128xf32> to vector<8xf32>
    %10 = vector.shape_cast %9 : vector<8xf32> to vector<8x1xf32>
    %cst_3 = arith.constant 1.280000e+02 : f32
    %11 = vector.broadcast %cst_3 : f32 to vector<8x1xf32>
    %12 = arith.divf %10, %11 : vector<8x1xf32>
    %cst_4 = arith.constant 9.99999997E-7 : f32
    %13 = vector.broadcast %cst_4 : f32 to vector<8x1xf32>
    %14 = arith.addf %12, %13 : vector<8x1xf32>
    %15 = math.rsqrt %14 : vector<8x1xf32>
    %16 = vector.broadcast %15 : vector<8x1xf32> to vector<8x128xf32>
    %17 = arith.mulf %7, %16 : vector<8x128xf32>
    %c0_5 = arith.constant 0 : index
    %c0_6 = arith.constant 0 : index
    %18 = vector.load %arg2[%c0_5, %c0_6] : memref<1x128xf32, #tpu.memory_space<vmem>>, vector<1x128xf32>
    %19 = vector.broadcast %18 : vector<1x128xf32> to vector<8x128xf32>
    %20 = arith.mulf %17, %19 : vector<8x128xf32>
    %c0_7 = arith.constant 0 : index
    %c0_8 = arith.constant 0 : index
    %21 = vector.load %arg3[%c0_7, %c0_8] : memref<1x128xf32, #tpu.memory_space<vmem>>, vector<1x128xf32>
    %22 = vector.broadcast %21 : vector<1x128xf32> to vector<8x128xf32>
    %23 = arith.addf %20, %22 : vector<8x128xf32>
    %24 = arith.truncf %23 : vector<8x128xf32> to vector<8x128xbf16>
    %c0_9 = arith.constant 0 : index
    %c0_10 = arith.constant 0 : index
    %25 = vector.load %arg4[%c0_9, %c0_10] : memref<8x128xbf16, #tpu.memory_space<vmem>>, vector<8x128xbf16>
    tpu.vector_store %arg4[%c0_9, %c0_10], %24 {strides = array<i32>} : memref<8x128xbf16, #tpu.memory_space<vmem>>, vector<8x128xbf16>,
    return
  }
  func.func @transform_0(%arg0: i32) -> (i32, i32) {
    %c0_i32 = arith.constant 0 : i32
    %c0_i32_0 = arith.constant 0 : i32
    return %arg0, %c0_i32 : i32, i32
  }
  func.func @transform_1(%arg0: i32) -> (i32, i32) {
    %c0_i32 = arith.constant 0 : i32
    %c0_i32_0 = arith.constant 0 : i32
    %c0_i32_1 = arith.constant 0 : i32
    return %c0_i32, %c0_i32_0 : i32, i32
  }
  func.func @transform_2(%arg0: i32) -> (i32, i32) {
    %c0_i32 = arith.constant 0 : i32
    %c0_i32_0 = arith.constant 0 : i32
    %c0_i32_1 = arith.constant 0 : i32
    return %c0_i32, %c0_i32_0 : i32, i32
  }
  func.func @transform_3(%arg0: i32) -> (i32, i32) {
    %c0_i32 = arith.constant 0 : i32
    %c0_i32_0 = arith.constant 0 : i32
    return %arg0, %c0_i32 : i32, i32
  }
}

module attributes {stable_mosaic.version = 11 : i64} {
  func.func @_mm_ln_kernel(%arg0: i32, %arg1: memref<2x1152xbf16, #tpu.memory_space<vmem>>, %arg2: memref<1152x256xbf16, #tpu.memory_space<vmem>>, %arg3: memref<1x256xf32, #tpu.memory_space<vmem>>, %arg4: memref<1x256xf32, #tpu.memory_space<vmem>>, %arg5: memref<1x256xf32, #tpu.memory_space<vmem>>, %arg6: memref<2x256xbf16, #tpu.memory_space<vmem>>) attributes {dimension_semantics = [#tpu.dimension_semantics<parallel>], iteration_bounds = array<i64: 1>, scalar_prefetch = 0 : i64, scratch_operands = 0 : i64, tpu.core_type = #tpu.core_type<tc>, window_params = [{transform_indices = @transform_0, window_bounds = array<i64: 2, 1152>}, {pipeline_mode = #tpu.pipeline_mode<synchronous>, transform_indices = @transform_1, window_bounds = array<i64: 1152, 256>}, {pipeline_mode = #tpu.pipeline_mode<synchronous>, transform_indices = @transform_2, window_bounds = array<i64: 1, 256>}, {pipeline_mode = #tpu.pipeline_mode<synchronous>, transform_indices = @transform_3, window_bounds = array<i64: 1, 256>}, {pipeline_mode = #tpu.pipeline_mode<synchronous>, transform_indices = @transform_4, window_bounds = array<i64: 1, 256>}, {transform_indices = @transform_5, window_bounds = array<i64: 2, 256>}]} {
    %c0 = arith.constant 0 : index
    %c0_0 = arith.constant 0 : index
    %0 = vector.load %arg1[%c0, %c0_0] : memref<2x1152xbf16, #tpu.memory_space<vmem>>, vector<2x1152xbf16>
    %c0_1 = arith.constant 0 : index
    %c0_2 = arith.constant 0 : index
    %1 = vector.load %arg2[%c0_1, %c0_2] : memref<1152x256xbf16, #tpu.memory_space<vmem>>, vector<1152x256xbf16>
    %cst = arith.constant dense<0.000000e+00> : vector<2x256xf32>
    %2 = tpu.matmul %0, %1, %cst {dimension_numbers = #tpu.dot_dimension_numbers<[1], [0], [0], [1], [0, 0, 1, 1], [], []>} : vector<2x1152xbf16>, vector<1152x256xbf16>, vector<2x256xf32> -> vector<2x256xf32>
    %c0_3 = arith.constant 0 : index
    %c0_4 = arith.constant 0 : index
    %3 = vector.load %arg3[%c0_3, %c0_4] : memref<1x256xf32, #tpu.memory_space<vmem>>, vector<1x256xf32>
    %4 = vector.broadcast %3 : vector<1x256xf32> to vector<2x256xf32>
    %5 = arith.addf %2, %4 : vector<2x256xf32>
    %cst_5 = arith.constant dense<0.000000e+00> : vector<2xf32>
    %6 = vector.multi_reduction <add>, %5, %cst_5 [1] : vector<2x256xf32> to vector<2xf32>
    %7 = vector.shape_cast %6 : vector<2xf32> to vector<2x1xf32>
    %cst_6 = arith.constant 2.560000e+02 : f32
    %8 = vector.broadcast %cst_6 : f32 to vector<2x1xf32>
    %9 = arith.divf %7, %8 : vector<2x1xf32>
    %10 = vector.broadcast %9 : vector<2x1xf32> to vector<2x256xf32>
    %11 = arith.subf %5, %10 : vector<2x256xf32>
    %12 = arith.mulf %11, %11 : vector<2x256xf32>
    %cst_7 = arith.constant dense<0.000000e+00> : vector<2xf32>
    %13 = vector.multi_reduction <add>, %12, %cst_7 [1] : vector<2x256xf32> to vector<2xf32>
    %14 = vector.shape_cast %13 : vector<2xf32> to vector<2x1xf32>
    %cst_8 = arith.constant 2.560000e+02 : f32
    %15 = vector.broadcast %cst_8 : f32 to vector<2x1xf32>
    %16 = arith.divf %14, %15 : vector<2x1xf32>
    %cst_9 = arith.constant 9.99999997E-7 : f32
    %17 = vector.broadcast %cst_9 : f32 to vector<2x1xf32>
    %18 = arith.addf %16, %17 : vector<2x1xf32>
    %19 = math.rsqrt %18 : vector<2x1xf32>
    %20 = vector.broadcast %19 : vector<2x1xf32> to vector<2x256xf32>
    %21 = arith.mulf %11, %20 : vector<2x256xf32>
    %c0_10 = arith.constant 0 : index
    %c0_11 = arith.constant 0 : index
    %22 = vector.load %arg4[%c0_10, %c0_11] : memref<1x256xf32, #tpu.memory_space<vmem>>, vector<1x256xf32>
    %23 = vector.broadcast %22 : vector<1x256xf32> to vector<2x256xf32>
    %24 = arith.mulf %21, %23 : vector<2x256xf32>
    %c0_12 = arith.constant 0 : index
    %c0_13 = arith.constant 0 : index
    %25 = vector.load %arg5[%c0_12, %c0_13] : memref<1x256xf32, #tpu.memory_space<vmem>>, vector<1x256xf32>
    %26 = vector.broadcast %25 : vector<1x256xf32> to vector<2x256xf32>
    %27 = arith.addf %24, %26 : vector<2x256xf32>
    %28 = arith.truncf %27 : vector<2x256xf32> to vector<2x256xbf16>
    %c0_14 = arith.constant 0 : index
    %c0_15 = arith.constant 0 : index
    %29 = vector.load %arg6[%c0_14, %c0_15] : memref<2x256xbf16, #tpu.memory_space<vmem>>, vector<2x256xbf16>
    tpu.vector_store %arg6[%c0_14, %c0_15], %28 {strides = array<i32>} : memref<2x256xbf16, #tpu.memory_space<vmem>>, vector<2x256xbf16>,
    return
  }
  func.func @transform_0(%arg0: i32) -> (i32, i32) {
    %c0_i32 = arith.constant 0 : i32
    %c0_i32_0 = arith.constant 0 : i32
    return %arg0, %c0_i32 : i32, i32
  }
  func.func @transform_1(%arg0: i32) -> (i32, i32) {
    %c0_i32 = arith.constant 0 : i32
    %c0_i32_0 = arith.constant 0 : i32
    %c0_i32_1 = arith.constant 0 : i32
    return %c0_i32, %c0_i32_0 : i32, i32
  }
  func.func @transform_2(%arg0: i32) -> (i32, i32) {
    %c0_i32 = arith.constant 0 : i32
    %c0_i32_0 = arith.constant 0 : i32
    %c0_i32_1 = arith.constant 0 : i32
    return %c0_i32, %c0_i32_0 : i32, i32
  }
  func.func @transform_3(%arg0: i32) -> (i32, i32) {
    %c0_i32 = arith.constant 0 : i32
    %c0_i32_0 = arith.constant 0 : i32
    %c0_i32_1 = arith.constant 0 : i32
    return %c0_i32, %c0_i32_0 : i32, i32
  }
  func.func @transform_4(%arg0: i32) -> (i32, i32) {
    %c0_i32 = arith.constant 0 : i32
    %c0_i32_0 = arith.constant 0 : i32
    %c0_i32_1 = arith.constant 0 : i32
    return %c0_i32, %c0_i32_0 : i32, i32
  }
  func.func @transform_5(%arg0: i32) -> (i32, i32) {
    %c0_i32 = arith.constant 0 : i32
    %c0_i32_0 = arith.constant 0 : i32
    return %arg0, %c0_i32 : i32, i32
  }
}

module attributes {stable_mosaic.version = 11 : i64} {
  func.func @_mm_res_kernel(%arg0: i32, %arg1: memref<2x256xbf16, #tpu.memory_space<vmem>>, %arg2: memref<256x256xbf16, #tpu.memory_space<vmem>>, %arg3: memref<1x256xf32, #tpu.memory_space<vmem>>, %arg4: memref<2x256xbf16, #tpu.memory_space<vmem>>, %arg5: memref<2x256xbf16, #tpu.memory_space<vmem>>) attributes {dimension_semantics = [#tpu.dimension_semantics<parallel>], iteration_bounds = array<i64: 1>, scalar_prefetch = 0 : i64, scratch_operands = 0 : i64, tpu.core_type = #tpu.core_type<tc>, window_params = [{transform_indices = @transform_0, window_bounds = array<i64: 2, 256>}, {pipeline_mode = #tpu.pipeline_mode<synchronous>, transform_indices = @transform_1, window_bounds = array<i64: 256, 256>}, {pipeline_mode = #tpu.pipeline_mode<synchronous>, transform_indices = @transform_2, window_bounds = array<i64: 1, 256>}, {transform_indices = @transform_3, window_bounds = array<i64: 2, 256>}, {transform_indices = @transform_4, window_bounds = array<i64: 2, 256>}]} {
    %c0 = arith.constant 0 : index
    %c0_0 = arith.constant 0 : index
    %0 = vector.load %arg1[%c0, %c0_0] : memref<2x256xbf16, #tpu.memory_space<vmem>>, vector<2x256xbf16>
    %c0_1 = arith.constant 0 : index
    %c0_2 = arith.constant 0 : index
    %1 = vector.load %arg2[%c0_1, %c0_2] : memref<256x256xbf16, #tpu.memory_space<vmem>>, vector<256x256xbf16>
    %cst = arith.constant dense<0.000000e+00> : vector<2x256xf32>
    %2 = tpu.matmul %0, %1, %cst {dimension_numbers = #tpu.dot_dimension_numbers<[1], [0], [0], [1], [0, 0, 1, 1], [], []>} : vector<2x256xbf16>, vector<256x256xbf16>, vector<2x256xf32> -> vector<2x256xf32>
    %c0_3 = arith.constant 0 : index
    %c0_4 = arith.constant 0 : index
    %3 = vector.load %arg3[%c0_3, %c0_4] : memref<1x256xf32, #tpu.memory_space<vmem>>, vector<1x256xf32>
    %4 = vector.broadcast %3 : vector<1x256xf32> to vector<2x256xf32>
    %5 = arith.addf %2, %4 : vector<2x256xf32>
    %c0_5 = arith.constant 0 : index
    %c0_6 = arith.constant 0 : index
    %6 = vector.load %arg4[%c0_5, %c0_6] : memref<2x256xbf16, #tpu.memory_space<vmem>>, vector<2x256xbf16>
    %7 = arith.extf %6 : vector<2x256xbf16> to vector<2x256xf32>
    %8 = arith.addf %5, %7 : vector<2x256xf32>
    %9 = arith.truncf %8 : vector<2x256xf32> to vector<2x256xbf16>
    %c0_7 = arith.constant 0 : index
    %c0_8 = arith.constant 0 : index
    %10 = vector.load %arg5[%c0_7, %c0_8] : memref<2x256xbf16, #tpu.memory_space<vmem>>, vector<2x256xbf16>
    tpu.vector_store %arg5[%c0_7, %c0_8], %9 {strides = array<i32>} : memref<2x256xbf16, #tpu.memory_space<vmem>>, vector<2x256xbf16>,
    return
  }
  func.func @transform_0(%arg0: i32) -> (i32, i32) {
    %c0_i32 = arith.constant 0 : i32
    %c0_i32_0 = arith.constant 0 : i32
    return %arg0, %c0_i32 : i32, i32
  }
  func.func @transform_1(%arg0: i32) -> (i32, i32) {
    %c0_i32 = arith.constant 0 : i32
    %c0_i32_0 = arith.constant 0 : i32
    %c0_i32_1 = arith.constant 0 : i32
    return %c0_i32, %c0_i32_0 : i32, i32
  }
  func.func @transform_2(%arg0: i32) -> (i32, i32) {
    %c0_i32 = arith.constant 0 : i32
    %c0_i32_0 = arith.constant 0 : i32
    %c0_i32_1 = arith.constant 0 : i32
    return %c0_i32, %c0_i32_0 : i32, i32
  }
  func.func @transform_3(%arg0: i32) -> (i32, i32) {
    %c0_i32 = arith.constant 0 : i32
    %c0_i32_0 = arith.constant 0 : i32
    return %arg0, %c0_i32 : i32, i32
  }
  func.func @transform_4(%arg0: i32) -> (i32, i32) {
    %c0_i32 = arith.constant 0 : i32
    %c0_i32_0 = arith.constant 0 : i32
    return %arg0, %c0_i32 : i32, i32
  }
}

module attributes {stable_mosaic.version = 11 : i64} {
  func.func @_ln_mm_kernel(%arg0: i32, %arg1: memref<2x256xbf16, #tpu.memory_space<vmem>>, %arg2: memref<1x256xf32, #tpu.memory_space<vmem>>, %arg3: memref<1x256xf32, #tpu.memory_space<vmem>>, %arg4: memref<256x256xbf16, #tpu.memory_space<vmem>>, %arg5: memref<1x256xf32, #tpu.memory_space<vmem>>, %arg6: memref<2x256xbf16, #tpu.memory_space<vmem>>) attributes {dimension_semantics = [#tpu.dimension_semantics<parallel>], iteration_bounds = array<i64: 1>, scalar_prefetch = 0 : i64, scratch_operands = 0 : i64, tpu.core_type = #tpu.core_type<tc>, window_params = [{transform_indices = @transform_0, window_bounds = array<i64: 2, 256>}, {pipeline_mode = #tpu.pipeline_mode<synchronous>, transform_indices = @transform_1, window_bounds = array<i64: 1, 256>}, {pipeline_mode = #tpu.pipeline_mode<synchronous>, transform_indices = @transform_2, window_bounds = array<i64: 1, 256>}, {pipeline_mode = #tpu.pipeline_mode<synchronous>, transform_indices = @transform_3, window_bounds = array<i64: 256, 256>}, {pipeline_mode = #tpu.pipeline_mode<synchronous>, transform_indices = @transform_4, window_bounds = array<i64: 1, 256>}, {transform_indices = @transform_5, window_bounds = array<i64: 2, 256>}]} {
    %c0 = arith.constant 0 : index
    %c0_0 = arith.constant 0 : index
    %0 = vector.load %arg1[%c0, %c0_0] : memref<2x256xbf16, #tpu.memory_space<vmem>>, vector<2x256xbf16>
    %1 = arith.extf %0 : vector<2x256xbf16> to vector<2x256xf32>
    %cst = arith.constant dense<0.000000e+00> : vector<2xf32>
    %2 = vector.multi_reduction <add>, %1, %cst [1] : vector<2x256xf32> to vector<2xf32>
    %3 = vector.shape_cast %2 : vector<2xf32> to vector<2x1xf32>
    %cst_1 = arith.constant 2.560000e+02 : f32
    %4 = vector.broadcast %cst_1 : f32 to vector<2x1xf32>
    %5 = arith.divf %3, %4 : vector<2x1xf32>
    %6 = vector.broadcast %5 : vector<2x1xf32> to vector<2x256xf32>
    %7 = arith.subf %1, %6 : vector<2x256xf32>
    %8 = arith.mulf %7, %7 : vector<2x256xf32>
    %cst_2 = arith.constant dense<0.000000e+00> : vector<2xf32>
    %9 = vector.multi_reduction <add>, %8, %cst_2 [1] : vector<2x256xf32> to vector<2xf32>
    %10 = vector.shape_cast %9 : vector<2xf32> to vector<2x1xf32>
    %cst_3 = arith.constant 2.560000e+02 : f32
    %11 = vector.broadcast %cst_3 : f32 to vector<2x1xf32>
    %12 = arith.divf %10, %11 : vector<2x1xf32>
    %cst_4 = arith.constant 9.99999997E-7 : f32
    %13 = vector.broadcast %cst_4 : f32 to vector<2x1xf32>
    %14 = arith.addf %12, %13 : vector<2x1xf32>
    %15 = math.rsqrt %14 : vector<2x1xf32>
    %16 = vector.broadcast %15 : vector<2x1xf32> to vector<2x256xf32>
    %17 = arith.mulf %7, %16 : vector<2x256xf32>
    %c0_5 = arith.constant 0 : index
    %c0_6 = arith.constant 0 : index
    %18 = vector.load %arg2[%c0_5, %c0_6] : memref<1x256xf32, #tpu.memory_space<vmem>>, vector<1x256xf32>
    %19 = vector.broadcast %18 : vector<1x256xf32> to vector<2x256xf32>
    %20 = arith.mulf %17, %19 : vector<2x256xf32>
    %c0_7 = arith.constant 0 : index
    %c0_8 = arith.constant 0 : index
    %21 = vector.load %arg3[%c0_7, %c0_8] : memref<1x256xf32, #tpu.memory_space<vmem>>, vector<1x256xf32>
    %22 = vector.broadcast %21 : vector<1x256xf32> to vector<2x256xf32>
    %23 = arith.addf %20, %22 : vector<2x256xf32>
    %24 = arith.truncf %23 : vector<2x256xf32> to vector<2x256xbf16>
    %c0_9 = arith.constant 0 : index
    %c0_10 = arith.constant 0 : index
    %25 = vector.load %arg4[%c0_9, %c0_10] : memref<256x256xbf16, #tpu.memory_space<vmem>>, vector<256x256xbf16>
    %cst_11 = arith.constant dense<0.000000e+00> : vector<2x256xf32>
    %26 = tpu.matmul %24, %25, %cst_11 {dimension_numbers = #tpu.dot_dimension_numbers<[1], [0], [0], [1], [0, 0, 1, 1], [], []>} : vector<2x256xbf16>, vector<256x256xbf16>, vector<2x256xf32> -> vector<2x256xf32>
    %c0_12 = arith.constant 0 : index
    %c0_13 = arith.constant 0 : index
    %27 = vector.load %arg5[%c0_12, %c0_13] : memref<1x256xf32, #tpu.memory_space<vmem>>, vector<1x256xf32>
    %28 = vector.broadcast %27 : vector<1x256xf32> to vector<2x256xf32>
    %29 = arith.addf %26, %28 : vector<2x256xf32>
    %cst_14 = arith.constant 5.000000e-01 : f32
    %30 = vector.broadcast %cst_14 : f32 to vector<2x256xf32>
    %31 = arith.mulf %30, %29 : vector<2x256xf32>
    %cst_15 = arith.constant 4.471500e-02 : f32
    %32 = vector.broadcast %cst_15 : f32 to vector<2x256xf32>
    %33 = arith.mulf %32, %29 : vector<2x256xf32>
    %34 = arith.mulf %33, %29 : vector<2x256xf32>
    %35 = arith.mulf %34, %29 : vector<2x256xf32>
    %36 = arith.addf %29, %35 : vector<2x256xf32>
    %cst_16 = arith.constant 0.797884583 : f32
    %37 = vector.broadcast %cst_16 : f32 to vector<2x256xf32>
    %38 = arith.mulf %37, %36 : vector<2x256xf32>
    %39 = math.tanh %38 : vector<2x256xf32>
    %cst_17 = arith.constant 1.000000e+00 : f32
    %40 = vector.broadcast %cst_17 : f32 to vector<2x256xf32>
    %41 = arith.addf %40, %39 : vector<2x256xf32>
    %42 = arith.mulf %31, %41 : vector<2x256xf32>
    %43 = arith.truncf %42 : vector<2x256xf32> to vector<2x256xbf16>
    %c0_18 = arith.constant 0 : index
    %c0_19 = arith.constant 0 : index
    %44 = vector.load %arg6[%c0_18, %c0_19] : memref<2x256xbf16, #tpu.memory_space<vmem>>, vector<2x256xbf16>
    tpu.vector_store %arg6[%c0_18, %c0_19], %43 {strides = array<i32>} : memref<2x256xbf16, #tpu.memory_space<vmem>>, vector<2x256xbf16>,
    return
  }
  func.func @transform_0(%arg0: i32) -> (i32, i32) {
    %c0_i32 = arith.constant 0 : i32
    %c0_i32_0 = arith.constant 0 : i32
    return %arg0, %c0_i32 : i32, i32
  }
  func.func @transform_1(%arg0: i32) -> (i32, i32) {
    %c0_i32 = arith.constant 0 : i32
    %c0_i32_0 = arith.constant 0 : i32
    %c0_i32_1 = arith.constant 0 : i32
    return %c0_i32, %c0_i32_0 : i32, i32
  }
  func.func @transform_2(%arg0: i32) -> (i32, i32) {
    %c0_i32 = arith.constant 0 : i32
    %c0_i32_0 = arith.constant 0 : i32
    %c0_i32_1 = arith.constant 0 : i32
    return %c0_i32, %c0_i32_0 : i32, i32
  }
  func.func @transform_3(%arg0: i32) -> (i32, i32) {
    %c0_i32 = arith.constant 0 : i32
    %c0_i32_0 = arith.constant 0 : i32
    %c0_i32_1 = arith.constant 0 : i32
    return %c0_i32, %c0_i32_0 : i32, i32
  }
  func.func @transform_4(%arg0: i32) -> (i32, i32) {
    %c0_i32 = arith.constant 0 : i32
    %c0_i32_0 = arith.constant 0 : i32
    %c0_i32_1 = arith.constant 0 : i32
    return %c0_i32, %c0_i32_0 : i32, i32
  }
  func.func @transform_5(%arg0: i32) -> (i32, i32) {
    %c0_i32 = arith.constant 0 : i32
    %c0_i32_0 = arith.constant 0 : i32
    return %arg0, %c0_i32 : i32, i32
  }
}

module attributes {stable_mosaic.version = 11 : i64} {
  func.func @_ln_kernel(%arg0: i32, %arg1: memref<2x256xbf16, #tpu.memory_space<vmem>>, %arg2: memref<1x256xf32, #tpu.memory_space<vmem>>, %arg3: memref<1x256xf32, #tpu.memory_space<vmem>>, %arg4: memref<2x256xbf16, #tpu.memory_space<vmem>>) attributes {dimension_semantics = [#tpu.dimension_semantics<parallel>], iteration_bounds = array<i64: 1>, scalar_prefetch = 0 : i64, scratch_operands = 0 : i64, tpu.core_type = #tpu.core_type<tc>, window_params = [{transform_indices = @transform_0, window_bounds = array<i64: 2, 256>}, {pipeline_mode = #tpu.pipeline_mode<synchronous>, transform_indices = @transform_1, window_bounds = array<i64: 1, 256>}, {pipeline_mode = #tpu.pipeline_mode<synchronous>, transform_indices = @transform_2, window_bounds = array<i64: 1, 256>}, {transform_indices = @transform_3, window_bounds = array<i64: 2, 256>}]} {
    %c0 = arith.constant 0 : index
    %c0_0 = arith.constant 0 : index
    %0 = vector.load %arg1[%c0, %c0_0] : memref<2x256xbf16, #tpu.memory_space<vmem>>, vector<2x256xbf16>
    %1 = arith.extf %0 : vector<2x256xbf16> to vector<2x256xf32>
    %cst = arith.constant dense<0.000000e+00> : vector<2xf32>
    %2 = vector.multi_reduction <add>, %1, %cst [1] : vector<2x256xf32> to vector<2xf32>
    %3 = vector.shape_cast %2 : vector<2xf32> to vector<2x1xf32>
    %cst_1 = arith.constant 2.560000e+02 : f32
    %4 = vector.broadcast %cst_1 : f32 to vector<2x1xf32>
    %5 = arith.divf %3, %4 : vector<2x1xf32>
    %6 = vector.broadcast %5 : vector<2x1xf32> to vector<2x256xf32>
    %7 = arith.subf %1, %6 : vector<2x256xf32>
    %8 = arith.mulf %7, %7 : vector<2x256xf32>
    %cst_2 = arith.constant dense<0.000000e+00> : vector<2xf32>
    %9 = vector.multi_reduction <add>, %8, %cst_2 [1] : vector<2x256xf32> to vector<2xf32>
    %10 = vector.shape_cast %9 : vector<2xf32> to vector<2x1xf32>
    %cst_3 = arith.constant 2.560000e+02 : f32
    %11 = vector.broadcast %cst_3 : f32 to vector<2x1xf32>
    %12 = arith.divf %10, %11 : vector<2x1xf32>
    %cst_4 = arith.constant 9.99999997E-7 : f32
    %13 = vector.broadcast %cst_4 : f32 to vector<2x1xf32>
    %14 = arith.addf %12, %13 : vector<2x1xf32>
    %15 = math.rsqrt %14 : vector<2x1xf32>
    %16 = vector.broadcast %15 : vector<2x1xf32> to vector<2x256xf32>
    %17 = arith.mulf %7, %16 : vector<2x256xf32>
    %c0_5 = arith.constant 0 : index
    %c0_6 = arith.constant 0 : index
    %18 = vector.load %arg2[%c0_5, %c0_6] : memref<1x256xf32, #tpu.memory_space<vmem>>, vector<1x256xf32>
    %19 = vector.broadcast %18 : vector<1x256xf32> to vector<2x256xf32>
    %20 = arith.mulf %17, %19 : vector<2x256xf32>
    %c0_7 = arith.constant 0 : index
    %c0_8 = arith.constant 0 : index
    %21 = vector.load %arg3[%c0_7, %c0_8] : memref<1x256xf32, #tpu.memory_space<vmem>>, vector<1x256xf32>
    %22 = vector.broadcast %21 : vector<1x256xf32> to vector<2x256xf32>
    %23 = arith.addf %20, %22 : vector<2x256xf32>
    %24 = arith.truncf %23 : vector<2x256xf32> to vector<2x256xbf16>
    %c0_9 = arith.constant 0 : index
    %c0_10 = arith.constant 0 : index
    %25 = vector.load %arg4[%c0_9, %c0_10] : memref<2x256xbf16, #tpu.memory_space<vmem>>, vector<2x256xbf16>
    tpu.vector_store %arg4[%c0_9, %c0_10], %24 {strides = array<i32>} : memref<2x256xbf16, #tpu.memory_space<vmem>>, vector<2x256xbf16>,
    return
  }
  func.func @transform_0(%arg0: i32) -> (i32, i32) {
    %c0_i32 = arith.constant 0 : i32
    %c0_i32_0 = arith.constant 0 : i32
    return %arg0, %c0_i32 : i32, i32
  }
  func.func @transform_1(%arg0: i32) -> (i32, i32) {
    %c0_i32 = arith.constant 0 : i32
    %c0_i32_0 = arith.constant 0 : i32
    %c0_i32_1 = arith.constant 0 : i32
    return %c0_i32, %c0_i32_0 : i32, i32
  }
  func.func @transform_2(%arg0: i32) -> (i32, i32) {
    %c0_i32 = arith.constant 0 : i32
    %c0_i32_0 = arith.constant 0 : i32
    %c0_i32_1 = arith.constant 0 : i32
    return %c0_i32, %c0_i32_0 : i32, i32
  }
  func.func @transform_3(%arg0: i32) -> (i32, i32) {
    %c0_i32 = arith.constant 0 : i32
    %c0_i32_0 = arith.constant 0 : i32
    return %arg0, %c0_i32 : i32, i32
  }
}

</mosaic_0001>

<bundles_post_ra>
// kernel: encoder_forward.29
= control target key start
LH: loop header
LB: loop body
LE: loop exit
PB: predicated region body
PF: predicated region fallthrough
CT: control target
= control target key end

     0   :  { %vm46_vm0 = vcmask 261120   ;;  %vm366_vm1 = vcmask 257024   ;;  %s842_s0 = inlined_call_operand.vmem [shape: bf16[128,32], index: 0, kind: input, shape index: {}]   ;;  %s843_s1 = inlined_call_operand.vmem [shape: f32[1,32], index: 1, kind: input, shape index: {}]   ;;  %s844_s2 = inlined_call_operand.vmem [shape: f32[1,32], index: 2, kind: input, shape index: {}]   ;;  %s845_s3 = inlined_call_operand.vmem [shape: bf16[128,32], index: 3, kind: output, shape index: {}]  }
   0x1   :  { %v515_v0 = vld [vmem:[%s842_s0] sm:$0xff]   ;;  %v520_v1 = vld [vmem:[%s842_s0 + $0x8] sm:$0xff]   ;;  %v529_v6 = vld [vmem:[%s842_s0 + $0x10] sm:$0xff]  }
   0x2   :  { %v423_v2 = vunpack.c.l.bf16 %v515_v0  ;;  %v427_v3 = vunpack.c.l.bf16 %v520_v1  ;;  %v424_v4 = vunpack.c.h.bf16 %v515_v0  ;;  %v428_v5 = vunpack.c.h.bf16 %v520_v1  ;;  %v544_v13 = vld [vmem:[%s842_s0 + $0x18] sm:$0xff]   ;;  %v557_v18 = vld [vmem:[%s842_s0 + $0x20] sm:$0xff]   ;;  %v570_v23 = vld [vmem:[%s842_s0 + $0x28] sm:$0xff]  }
   0x3   :  { %v431_v11 = vunpack.c.l.bf16 %v529_v6  ;;  %v432_v12 = vunpack.c.h.bf16 %v529_v6  ;;  %v435_v16 = vunpack.c.l.bf16 %v544_v13  ;;  %v436_v17 = vunpack.c.h.bf16 %v544_v13  ;;  %v583_v28 = vld [vmem:[%s842_s0 + $0x30] sm:$0xff]   ;;  %v596_v33 = vld [vmem:[%s842_s0 + $0x38] sm:$0xff]  }
   0x4   :  { %v47_v7 = vsel %vm46_vm0, %v423_v2, 0.0  ;;  %v53_v8 = vsel %vm46_vm0, %v427_v3, 0.0  ;;  %v50_v9 = vsel %vm46_vm0, %v424_v4, 0.0  ;;  %v56_v10 = vsel %vm46_vm0, %v428_v5, 0.0 }
   0x5   :  { %48 = vadd.xlane.f32.xlu0 %v47_v7  ;;  %54 = vadd.xlane.f32.xlu1 %v53_v8  ;;  %v59_v14 = vsel %vm46_vm0, %v431_v11, 0.0  ;;  %v62_v15 = vsel %vm46_vm0, %v432_v12, 0.0  ;;  %v65_v19 = vsel %vm46_vm0, %v435_v16, 0.0  ;;  %v68_v20 = vsel %vm46_vm0, %v436_v17, 0.0 }
   0x6   :  { %v439_v21 = vunpack.c.l.bf16 %v557_v18  ;;  %v440_v22 = vunpack.c.h.bf16 %v557_v18  ;;  %v443_v26 = vunpack.c.l.bf16 %v570_v23  ;;  %v444_v27 = vunpack.c.h.bf16 %v570_v23 }
   0x7   :  { %v447_v31 = vunpack.c.l.bf16 %v583_v28  ;;  %v448_v32 = vunpack.c.h.bf16 %v583_v28  ;;  %v451_v36 = vunpack.c.l.bf16 %v596_v33  ;;  %v452_v37 = vunpack.c.h.bf16 %v596_v33 }
   0x8   :  { %v71_v24 = vsel %vm46_vm0, %v439_v21, 0.0  ;;  %v74_v25 = vsel %vm46_vm0, %v440_v22, 0.0  ;;  %v77_v29 = vsel %vm46_vm0, %v443_v26, 0.0  ;;  %v80_v30 = vsel %vm46_vm0, %v444_v27, 0.0 }
   0x9   :  { %51 = vadd.xlane.f32.xlu0 %v50_v9  ;;  %57 = vadd.xlane.f32.xlu1 %v56_v10  ;;  %v83_v34 = vsel %vm46_vm0, %v447_v31, 0.0  ;;  %v86_v35 = vsel %vm46_vm0, %v448_v32, 0.0  ;;  %v89_v38 = vsel %vm46_vm0, %v451_v36, 0.0  ;;  %v92_v39 = vsel %vm46_vm0, %v452_v37, 0.0 }
   0xd   :  { %60 = vadd.xlane.f32.xlu0 %v59_v14  ;;  %63 = vadd.xlane.f32.xlu1 %v62_v15 }
  0x11   :  { %66 = vadd.xlane.f32.xlu0 %v65_v19  ;;  %69 = vadd.xlane.f32.xlu1 %v68_v20 }
  0x15   :  { %72 = vadd.xlane.f32.xlu0 %v71_v24  ;;  %75 = vadd.xlane.f32.xlu1 %v74_v25 }
  0x19   :  { %78 = vadd.xlane.f32.xlu0 %v77_v29  ;;  %81 = vadd.xlane.f32.xlu1 %v80_v30 }
  0x1d   :  { %84 = vadd.xlane.f32.xlu0 %v83_v34  ;;  %87 = vadd.xlane.f32.xlu1 %v86_v35 }
  0x21   :  { %90 = vadd.xlane.f32.xlu0 %v89_v38  ;;  %93 = vadd.xlane.f32.xlu1 %v92_v39 }
  0x92   :  { %v49_v40 = vpop.xlane.xlu0 %48  ;;  %v55_v41 = vpop.xlane.xlu1 %54 }
  0x93   :  { %v96_v42 = vmul.f32 0.03125, %v49_v40  ;;  %v98_v43 = vmul.f32 0.03125, %v55_v41 }
  0x95   :  { %v612_v44 = vsub.f32 %v423_v2, %v96_v42  ;;  %v614_v45 = vsub.f32 %v427_v3, %v98_v43 }
  0x96   :  { %v52_v46 = vpop.xlane.xlu0 %51  ;;  %v58_v47 = vpop.xlane.xlu1 %57 }
  0x97   :  { %v97_v48 = vmul.f32 0.03125, %v52_v46  ;;  %v99_v49 = vmul.f32 0.03125, %v58_v47  ;;  %v128_v50 = vmul.f32 %v612_v44, %v612_v44  ;;  %v130_v51 = vmul.f32 %v614_v45, %v614_v45 }
  0x99   :  { %v622_v52 = vsub.f32 %v424_v4, %v97_v48  ;;  %v626_v53 = vsub.f32 %v428_v5, %v99_v49  ;;  %v144_v54 = vsel %vm46_vm0, %v128_v50, 0.0  ;;  %v150_v57 = vsel %vm46_vm0, %v130_v51, 0.0 }
  0x9a   :  { %145 = vadd.xlane.f32.xlu0 %v144_v54  ;;  %v61_v55 = vpop.xlane.xlu0 %60  ;;  %v64_v56 = vpop.xlane.xlu1 %63 }
  0x9b   :  { %v100_v58 = vmul.f32 0.03125, %v61_v55  ;;  %v101_v59 = vmul.f32 0.03125, %v64_v56  ;;  %v129_v60 = vmul.f32 %v622_v52, %v622_v52  ;;  %v131_v61 = vmul.f32 %v626_v53, %v626_v53 }
  0x9d   :  { %v636_v62 = vsub.f32 %v431_v11, %v100_v58  ;;  %v640_v63 = vsub.f32 %v432_v12, %v101_v59  ;;  %v147_v0 = vsel %vm46_vm0, %v129_v60, 0.0  ;;  %v153_v3 = vsel %vm46_vm0, %v131_v61, 0.0 }
  0x9e   :  { %151 = vadd.xlane.f32.xlu0 %v150_v57  ;;  %148 = vadd.xlane.f32.xlu1 %v147_v0  ;;  %v67_v1 = vpop.xlane.xlu0 %66  ;;  %v70_v2 = vpop.xlane.xlu1 %69 }
  0x9f   :  { %v102_v4 = vmul.f32 0.03125, %v67_v1  ;;  %v103_v5 = vmul.f32 0.03125, %v70_v2  ;;  %v132_v7 = vmul.f32 %v636_v62, %v636_v62  ;;  %v133_v8 = vmul.f32 %v640_v63, %v640_v63 }
  0xa1   :  { %v650_v6 = vsub.f32 %v435_v16, %v102_v4  ;;  %v654_v9 = vsub.f32 %v436_v17, %v103_v5  ;;  %v156_v10 = vsel %vm46_vm0, %v132_v7, 0.0  ;;  %v159_v14 = vsel %vm46_vm0, %v133_v8, 0.0 }
  0xa2   :  { %154 = vadd.xlane.f32.xlu1 %v153_v3  ;;  %157 = vadd.xlane.f32.xlu0 %v156_v10  ;;  %v73_v11 = vpop.xlane.xlu0 %72  ;;  %v76_v12 = vpop.xlane.xlu1 %75 }
  0xa3   :  { %v104_v15 = vmul.f32 0.03125, %v73_v11  ;;  %v105_v19 = vmul.f32 0.03125, %v76_v12  ;;  %v134_v20 = vmul.f32 %v650_v6, %v650_v6  ;;  %v135_v16 = vmul.f32 %v654_v9, %v654_v9 }
  0xa5   :  { %v664_v13 = vsub.f32 %v439_v21, %v104_v15  ;;  %v668_v17 = vsub.f32 %v440_v22, %v105_v19  ;;  %v162_v24 = vsel %vm46_vm0, %v134_v20, 0.0  ;;  %v165_v30 = vsel %vm46_vm0, %v135_v16, 0.0 }
  0xa6   :  { %160 = vadd.xlane.f32.xlu1 %v159_v14  ;;  %163 = vadd.xlane.f32.xlu0 %v162_v24  ;;  %v79_v25 = vpop.xlane.xlu0 %78  ;;  %v82_v29 = vpop.xlane.xlu1 %81 }
  0xa7   :  { %v106_v34 = vmul.f32 0.03125, %v79_v25  ;;  %v107_v35 = vmul.f32 0.03125, %v82_v29  ;;  %v136_v38 = vmul.f32 %v664_v13, %v664_v13  ;;  %v137_v21 = vmul.f32 %v668_v17, %v668_v17  ;;  %v723_v29 = vld [vmem:[%s843_s1] ss:$0 sm:$0xff] }
  0xa9   :  { %v678_v18 = vsub.f32 %v443_v26, %v106_v34  ;;  %v682_v22 = vsub.f32 %v444_v27, %v107_v35  ;;  %v168_v39 = vsel %vm46_vm0, %v136_v38, 0.0  ;;  %v171_v42 = vsel %vm46_vm0, %v137_v21, 0.0 }
  0xaa   :  { %166 = vadd.xlane.f32.xlu1 %v165_v30  ;;  %169 = vadd.xlane.f32.xlu0 %v168_v39  ;;  %v85_v40 = vpop.xlane.xlu0 %84  ;;  %v88_v41 = vpop.xlane.xlu1 %87  ;;  %v729_v39 = vld [vmem:[%s844_s2] ss:$0 sm:$0xff] }
  0xab   :  { %v108_v43 = vmul.f32 0.03125, %v85_v40  ;;  %v109_v46 = vmul.f32 0.03125, %v88_v41  ;;  %v138_v47 = vmul.f32 %v678_v18, %v678_v18  ;;  %v139_v26 = vmul.f32 %v682_v22, %v682_v22 }
  0xad   :  { %v692_v23 = vsub.f32 %v447_v31, %v108_v43  ;;  %v696_v27 = vsub.f32 %v448_v32, %v109_v46  ;;  %v174_v48 = vsel %vm46_vm0, %v138_v47, 0.0  ;;  %v177_v51 = vsel %vm46_vm0, %v139_v26, 0.0 }
  0xae   :  { %172 = vadd.xlane.f32.xlu1 %v171_v42  ;;  %175 = vadd.xlane.f32.xlu0 %v174_v48  ;;  %v91_v49 = vpop.xlane.xlu0 %90  ;;  %v94_v50 = vpop.xlane.xlu1 %93 }
  0xaf   :  { %v110_v54 = vmul.f32 0.03125, %v91_v49  ;;  %v111_v55 = vmul.f32 0.03125, %v94_v50  ;;  %v140_v56 = vmul.f32 %v692_v23, %v692_v23  ;;  %v141_v31 = vmul.f32 %v696_v27, %v696_v27 }
  0xb1   :  { %v706_v28 = vsub.f32 %v451_v36, %v110_v54  ;;  %v710_v32 = vsub.f32 %v452_v37, %v111_v55  ;;  %v180_v57 = vsel %vm46_vm0, %v140_v56, 0.0  ;;  %v183_v58 = vsel %vm46_vm0, %v141_v31, 0.0 }
  0xb2   :  { %178 = vadd.xlane.f32.xlu1 %v177_v51  ;;  %181 = vadd.xlane.f32.xlu0 %v180_v57 }
  0xb3   :  { %v142_v59 = vmul.f32 %v706_v28, %v706_v28  ;;  %v143_v60 = vmul.f32 %v710_v32, %v710_v32 }
  0xb5   :  { %v186_v61 = vsel %vm46_vm0, %v142_v59, 0.0  ;;  %v189_v33 = vsel %vm46_vm0, %v143_v60, 0.0 }
  0xb6   :  { %184 = vadd.xlane.f32.xlu1 %v183_v58  ;;  %187 = vadd.xlane.f32.xlu0 %v186_v61 }
  0xba   :  { %190 = vadd.xlane.f32.xlu1 %v189_v33 }
 0x127   :  { %v146_v36 = vpop.xlane.xlu0 %145 }
 0x128   :  { %v192_v37 = vmul.f32 0.03125, %v146_v36 }
 0x12a   :  { %v208_v0 = vadd.f32 1e-06, %v192_v37 }
 0x12b   :  { %v149_v1 = vpop.xlane.xlu1 %148  ;;  %v152_v2 = vpop.xlane.xlu0 %151 }
 0x12c   :  { %460 = vrsqrt.f32 %v208_v0  ;;  %v193_v3 = vmul.f32 0.03125, %v149_v1  ;;  %v194_v4 = vmul.f32 0.03125, %v152_v2 }
 0x12e   :  { %v209_v5 = vadd.f32 1e-06, %v193_v3  ;;  %v210_v7 = vadd.f32 1e-06, %v194_v4 }
 0x12f   :  { %v155_v8 = vpop.xlane.xlu1 %154  ;;  %v158_v10 = vpop.xlane.xlu0 %157 }
 0x130   :  { %462 = vrsqrt.f32 %v209_v5  ;;  %v195_v11 = vmul.f32 0.03125, %v155_v8  ;;  %v196_v12 = vmul.f32 0.03125, %v158_v10 }
 0x131   :  { %464 = vrsqrt.f32 %v210_v7 }
 0x132   :  { %v211_v14 = vadd.f32 1e-06, %v195_v11  ;;  %v212_v15 = vadd.f32 1e-06, %v196_v12 }
 0x133   :  { %v161_v19 = vpop.xlane.xlu1 %160  ;;  %v164_v20 = vpop.xlane.xlu0 %163 }
 0x134   :  { %466 = vrsqrt.f32 %v211_v14  ;;  %v197_v16 = vmul.f32 0.03125, %v161_v19  ;;  %v198_v24 = vmul.f32 0.03125, %v164_v20 }
 0x135   :  { %468 = vrsqrt.f32 %v212_v15 }
 0x136   :  { %v461_v25 = vpop.eup %460  ;;  %v213_v30 = vadd.f32 1e-06, %v197_v16  ;;  %v214_v34 = vadd.f32 1e-06, %v198_v24 }
 0x137   :  { %v240_v35 = vmul.f32 %v461_v25, %v612_v44  ;;  %v167_v38 = vpop.xlane.xlu1 %166  ;;  %v170_v21 = vpop.xlane.xlu0 %169 }
 0x138   :  { %470 = vrsqrt.f32 %v213_v30  ;;  %v199_v40 = vmul.f32 0.03125, %v167_v38  ;;  %v200_v41 = vmul.f32 0.03125, %v170_v21 }
 0x139   :  { %v263_v42 = vmul.f32 %v723_v29, %v240_v35  ;;  %472 = vrsqrt.f32 %v214_v34 }
 0x13a   :  { %v463_v43 = vpop.eup %462  ;;  %v215_v46 = vadd.f32 1e-06, %v199_v40  ;;  %v216_v47 = vadd.f32 1e-06, %v200_v41 }
 0x13b   :  { %v465_v26 = vpop.eup %464  ;;  %v286_v44 = vadd.f32 %v729_v39, %v263_v42  ;;  %v241_v48 = vmul.f32 %v463_v43, %v622_v52  ;;  %v173_v49 = vpop.xlane.xlu1 %172 }
 0x13c   :  { %v176_v50 = vpop.xlane.xlu0 %175  ;;  %v242_v51 = vmul.f32 %v465_v26, %v614_v45  ;;  %474 = vrsqrt.f32 %v215_v46  ;;  %v201_v54 = vmul.f32 0.03125, %v173_v49 }
 0x13d   :  { %v202_v55 = vmul.f32 0.03125, %v176_v50  ;;  %v405_v56 = vpack.c.bf16 %v286_v44, %v286_v44  ;;  %v264_v31 = vmul.f32 %v723_v29, %v241_v48  ;;  %476 = vrsqrt.f32 %v216_v47 }
 0x13e   :  { %v467_v57 = vpop.eup %466  ;;  %v265_v58 = vmul.f32 %v723_v29, %v242_v51  ;;  %v217_v59 = vadd.f32 1e-06, %v201_v54 }
 0x13f   :  { %v218_v60 = vadd.f32 1e-06, %v202_v55  ;;  %v469_v61 = vpop.eup %468  ;;  %367 = vst.msk [vmem:[%s845_s3] sm:$0xf] %vm366_vm1, %v405_v56  ;;  %v287_v45 = vadd.f32 %v729_v39, %v264_v31  ;;  %v243_v52 = vmul.f32 %v467_v57, %v626_v53  ;;  %v179_v33 = vpop.xlane.xlu1 %178 }
 0x140   :  { %v182_v36 = vpop.xlane.xlu0 %181  ;;  %v288_v37 = vadd.f32 %v729_v39, %v265_v58  ;;  %v244_v0 = vmul.f32 %v469_v61, %v636_v62  ;;  %478 = vrsqrt.f32 %v217_v59  ;;  %v203_v1 = vmul.f32 0.03125, %v179_v33 }
 0x141   :  { %v406_v2 = vpack.c.bf16 %v287_v45, %v287_v45  ;;  %v266_v3 = vmul.f32 %v723_v29, %v243_v52  ;;  %480 = vrsqrt.f32 %v218_v60  ;;  %v204_v4 = vmul.f32 0.03125, %v182_v36 }
 0x142   :  { %v471_v5 = vpop.eup %470  ;;  %v407_v7 = vpack.c.bf16 %v288_v37, %v288_v37  ;;  %v267_v8 = vmul.f32 %v723_v29, %v244_v0  ;;  %v219_v10 = vadd.f32 1e-06, %v203_v1 }
 0x143   :  { %v473_v11 = vpop.eup %472  ;;  %368 = vst.msk [vmem:[%s845_s3 + $0x4] sm:$0xf] %vm366_vm1, %v406_v2  ;;  %v289_v53 = vadd.f32 %v729_v39, %v266_v3  ;;  %v245_v62 = vmul.f32 %v471_v5, %v640_v63  ;;  %v220_v12 = vadd.f32 1e-06, %v204_v4  ;;  %v185_v14 = vpop.xlane.xlu1 %184 }
 0x144   :  { %v188_v15 = vpop.xlane.xlu0 %187  ;;  %369 = vst.msk [vmem:[%s845_s3 + $0x8] sm:$0xf] %vm366_vm1, %v407_v7  ;;  %v290_v19 = vadd.f32 %v729_v39, %v267_v8  ;;  %v246_v20 = vmul.f32 %v473_v11, %v650_v6  ;;  %482 = vrsqrt.f32 %v219_v10  ;;  %v205_v16 = vmul.f32 0.03125, %v185_v14 }
 0x145   :  { %v408_v24 = vpack.c.bf16 %v289_v53, %v289_v53  ;;  %v268_v25 = vmul.f32 %v723_v29, %v245_v62  ;;  %484 = vrsqrt.f32 %v220_v12  ;;  %v206_v30 = vmul.f32 0.03125, %v188_v15 }
 0x146   :  { %v475_v63 = vpop.eup %474  ;;  %v409_v34 = vpack.c.bf16 %v290_v19, %v290_v19  ;;  %v269_v35 = vmul.f32 %v723_v29, %v246_v20  ;;  %v221_v38 = vadd.f32 1e-06, %v205_v16 }
 0x147   :  { %v477_v21 = vpop.eup %476  ;;  %370 = vst.msk [vmem:[%s845_s3 + $0xc] sm:$0xf] %vm366_vm1, %v408_v24  ;;  %v291_v6 = vadd.f32 %v729_v39, %v268_v25  ;;  %v247_v40 = vmul.f32 %v475_v63, %v654_v9  ;;  %v222_v41 = vadd.f32 1e-06, %v206_v30  ;;  %v191_v42 = vpop.xlane.xlu1 %190 }
 0x148   :  { %371 = vst.msk [vmem:[%s845_s3 + $0x10] sm:$0xf] %vm366_vm1, %v409_v34  ;;  %v292_v43 = vadd.f32 %v729_v39, %v269_v35  ;;  %v248_v46 = vmul.f32 %v477_v21, %v664_v13  ;;  %486 = vrsqrt.f32 %v221_v38  ;;  %v207_v47 = vmul.f32 0.03125, %v191_v42 }
 0x149   :  { %v410_v26 = vpack.c.bf16 %v291_v6, %v291_v6  ;;  %v270_v44 = vmul.f32 %v723_v29, %v247_v40  ;;  %488 = vrsqrt.f32 %v222_v41 }
 0x14a   :  { %v479_v48 = vpop.eup %478  ;;  %v411_v49 = vpack.c.bf16 %v292_v43, %v292_v43  ;;  %v271_v9 = vmul.f32 %v723_v29, %v248_v46  ;;  %v223_v50 = vadd.f32 1e-06, %v207_v47 }
 0x14b   :  { %v481_v51 = vpop.eup %480  ;;  %372 = vst.msk [vmem:[%s845_s3 + $0x14] sm:$0xf] %vm366_vm1, %v410_v26  ;;  %v293_v54 = vadd.f32 %v729_v39, %v270_v44  ;;  %v249_v13 = vmul.f32 %v479_v48, %v668_v17 }
 0x14c   :  { %373 = vst.msk [vmem:[%s845_s3 + $0x18] sm:$0xf] %vm366_vm1, %v411_v49  ;;  %v294_v55 = vadd.f32 %v729_v39, %v271_v9  ;;  %v250_v56 = vmul.f32 %v481_v51, %v678_v18  ;;  %490 = vrsqrt.f32 %v223_v50 }
 0x14d   :  { %v412_v31 = vpack.c.bf16 %v293_v54, %v293_v54  ;;  %v272_v57 = vmul.f32 %v723_v29, %v249_v13 }
 0x14e   :  { %v483_v58 = vpop.eup %482  ;;  %v413_v59 = vpack.c.bf16 %v294_v55, %v294_v55  ;;  %v273_v60 = vmul.f32 %v723_v29, %v250_v56 }
 0x14f   :  { %v485_v61 = vpop.eup %484  ;;  %374 = vst.msk [vmem:[%s845_s3 + $0x1c] sm:$0xf] %vm366_vm1, %v412_v31  ;;  %v295_v17 = vadd.f32 %v729_v39, %v272_v57  ;;  %v251_v45 = vmul.f32 %v483_v58, %v682_v22 }
 0x150   :  { %375 = vst.msk [vmem:[%s845_s3 + $0x20] sm:$0xf] %vm366_vm1, %v413_v59  ;;  %v296_v18 = vadd.f32 %v729_v39, %v273_v60  ;;  %v252_v52 = vmul.f32 %v485_v61, %v692_v23 }
 0x151   :  { %v414_v33 = vpack.c.bf16 %v295_v17, %v295_v17  ;;  %v274_v36 = vmul.f32 %v723_v29, %v251_v45 }
 0x152   :  { %v487_v37 = vpop.eup %486  ;;  %v415_v0 = vpack.c.bf16 %v296_v18, %v296_v18  ;;  %v275_v1 = vmul.f32 %v723_v29, %v252_v52 }
 0x153   :  { %v489_v2 = vpop.eup %488  ;;  %376 = vst.msk [vmem:[%s845_s3 + $0x24] sm:$0xf] %vm366_vm1, %v414_v33  ;;  %v297_v22 = vadd.f32 %v729_v39, %v274_v36  ;;  %v253_v3 = vmul.f32 %v487_v37, %v696_v27 }
 0x154   :  { %377 = vst.msk [vmem:[%s845_s3 + $0x28] sm:$0xf] %vm366_vm1, %v415_v0  ;;  %v298_v23 = vadd.f32 %v729_v39, %v275_v1  ;;  %v254_v4 = vmul.f32 %v489_v2, %v706_v28 }
 0x155   :  { %v416_v5 = vpack.c.bf16 %v297_v22, %v297_v22  ;;  %v276_v7 = vmul.f32 %v723_v29, %v253_v3 }
 0x156   :  { %v491_v8 = vpop.eup %490  ;;  %v417_v10 = vpack.c.bf16 %v298_v23, %v298_v23  ;;  %v277_v11 = vmul.f32 %v723_v29, %v254_v4 }
 0x157   :  { %378 = vst.msk [vmem:[%s845_s3 + $0x2c] sm:$0xf] %vm366_vm1, %v416_v5  ;;  %v299_v27 = vadd.f32 %v729_v39, %v276_v7  ;;  %v255_v53 = vmul.f32 %v491_v8, %v710_v32 }
 0x158   :  { %379 = vst.msk [vmem:[%s845_s3 + $0x30] sm:$0xf] %vm366_vm1, %v417_v10  ;;  %v300_v28 = vadd.f32 %v729_v39, %v277_v11 }
 0x159   :  { %v418_v62 = vpack.c.bf16 %v299_v27, %v299_v27  ;;  %v278_v12 = vmul.f32 %v723_v29, %v255_v53 }
 0x15a   :  { %v419_v14 = vpack.c.bf16 %v300_v28, %v300_v28 }
 0x15b   :  { %380 = vst.msk [vmem:[%s845_s3 + $0x34] sm:$0xf] %vm366_vm1, %v418_v62  ;;  %v301_v15 = vadd.f32 %v729_v39, %v278_v12 }
 0x15c   :  { %381 = vst.msk [vmem:[%s845_s3 + $0x38] sm:$0xf] %vm366_vm1, %v419_v14 }
 0x15d   :  { %v420_v32 = vpack.c.bf16 %v301_v15, %v301_v15 }
 0x15f   :  { %382 = vst.msk [vmem:[%s845_s3 + $0x3c] sm:$0xf] %vm366_vm1, %v420_v32 }

// kernel: encoder_forward.26
= control target key start
LH: loop header
LB: loop body
LE: loop exit
PB: predicated region body
PF: predicated region fallthrough
CT: control target
= control target key end

     0   :  { %vm97_vm0 = vcmask 261120   ;;  %vm331_vm1 = vcmask 257024   ;;  %s658_s1 = inlined_call_operand.vmem [shape: bf16[32,32], index: 1, kind: input, shape index: {}]   ;;  %s659_s0 = inlined_call_operand.vmem [shape: bf16[128,32], index: 0, kind: input, shape index: {}]   ;;  %s660_s3 = inlined_call_operand.vmem [shape: bf16[128,32], index: 3, kind: input, shape index: {}]   ;;  %s661_s2 = inlined_call_operand.vmem [shape: f32[1,32], index: 2, kind: input, shape index: {}]   ;;  %s662_s4 = inlined_call_operand.vmem [shape: bf16[128,32], index: 4, kind: output, shape index: {}]  }
   0x1   :  { %v476_v0 = vld [vmem:[%s658_s1] sm:$0xff]   ;;  %v477_v1 = vld [vmem:[%s658_s1 + $0x8] sm:$0xff]   ;;  %v482_v6 = vld [vmem:[%s659_s0 + $0x10] sm:$0xff]  }
   0x2   :  { %452 = vmatprep.subr.bf16.mxu0 %v476_v0  ;;  %472 = vmatprep.subr.bf16.mxu1 %v476_v0  ;;  %v478_v2 = vld [vmem:[%s659_s0] sm:$0xff]   ;;  %v480_v4 = vld [vmem:[%s659_s0 + $0x8] sm:$0xff]   ;;  %v483_v7 = vld [vmem:[%s659_s0 + $0x30] sm:$0xff]  }
   0x3   :  { %453 = vmatpush3.bf16.msra.mxu0 %v476_v0  ;;  %474 = vmatpush3.bf16.msra.mxu1 %v476_v0  ;;  %v479_v3 = vld [vmem:[%s659_s0 + $0x20] sm:$0xff]   ;;  %v481_v5 = vld [vmem:[%s659_s0 + $0x28] sm:$0xff]   ;;  %v484_v8 = vld [vmem:[%s659_s0 + $0x18] sm:$0xff]  }
   0x4   :  { %454 = vmatprep.subr.bf16.mxu0 %v477_v1  ;;  %473 = vmatprep.subr.bf16.mxu1 %v477_v1  ;;  %v485_v9 = vld [vmem:[%s659_s0 + $0x38] sm:$0xff]   ;;  %v435_v10 = vld [vmem:[%s660_s3 + $0x8] sm:$0xff]   ;;  %v404_v12 = vld [vmem:[%s660_s3] sm:$0xff]  }
   0x5   :  { %456 = vmatprep.mubr.msk.bf16.mxu0 %vm97_vm0, %v478_v2  ;;  %464 = vmatprep.mubr.msk.bf16.mxu1 %vm97_vm0, %v479_v3  ;;  %v439_v11 = vld [vmem:[%s660_s3 + $0x28] sm:$0xff]   ;;  %v438_v13 = vld [vmem:[%s660_s3 + $0x20] sm:$0xff]   ;;  %v409_v15 = vunpack.c.l.bf16 %v435_v10  ;;  %v405_v19 = vunpack.c.l.bf16 %v404_v12  ;;  %v410_v21 = vunpack.c.h.bf16 %v435_v10  ;;  %v406_v27 = vunpack.c.h.bf16 %v404_v12  ;;  %v437_v43 = vld [vmem:[%s660_s3 + $0x18] sm:$0xff]  }
   0x6   :  { %v564_v14 = vld [vmem:[%s661_s2] ss:$0 sm:$0xff]  ;;  %v425_v16 = vunpack.c.l.bf16 %v439_v11  ;;  %v421_v20 = vunpack.c.l.bf16 %v438_v13  ;;  %v426_v26 = vunpack.c.h.bf16 %v439_v11  ;;  %v422_v32 = vunpack.c.h.bf16 %v438_v13  ;;  %v441_v44 = vld [vmem:[%s660_s3 + $0x38] sm:$0xff]   ;;  %v436_v49 = vld [vmem:[%s660_s3 + $0x10] sm:$0xff]  }
   0x7   :  { %455 = vmatpush3.bf16.msra.mxu0 %v477_v1  ;;  %475 = vmatpush3.bf16.msra.mxu1 %v477_v1  ;;  %v440_v50 = vld [vmem:[%s660_s3 + $0x30] sm:$0xff]   ;;  %v417_v57 = vunpack.c.l.bf16 %v437_v43  ;;  %v433_v58 = vunpack.c.l.bf16 %v441_v44  ;;  %v413_v63 = vunpack.c.l.bf16 %v436_v49  ;;  %v414_v11 = vunpack.c.h.bf16 %v436_v49 }
   0x8   :  { %v429_v0 = vunpack.c.l.bf16 %v440_v50  ;;  %v430_v12 = vunpack.c.h.bf16 %v440_v50 }
   0xa   :  { %457 = vmatmul.mubr.msk.bf16.vlgmr.msra.gmra.mrb[0].mxu0 %vm97_vm0, %v480_v4  ;;  %465 = vmatmul.mubr.msk.bf16.vlgmr.msra.gmra.mrb[0].mxu1 %vm97_vm0, %v481_v5  ;;  %v418_v5 = vunpack.c.h.bf16 %v437_v43 }
   0xb   :  { %460 = vmatprep.mubr.msk.bf16.mxu0 %vm97_vm0, %v482_v6  ;;  %468 = vmatprep.mubr.msk.bf16.mxu1 %vm97_vm0, %v483_v7  ;;  %v434_v6 = vunpack.c.h.bf16 %v441_v44 }
  0x12   :  { %461 = vmatmul.mubr.msk.bf16.gmra.mrb[4].mxu0 %vm97_vm0, %v484_v8  ;;  %469 = vmatmul.mubr.msk.bf16.gmra.mrb[4].mxu1 %vm97_vm0, %v485_v9 }
  0xdd   :  { %v458_v17 = vpop.f32.mrb[0].mxu0  ;;  %v466_v18 = vpop.f32.mrb[0].mxu1 }
  0xde   :  { %v165_v22 = vadd.f32 %v458_v17, %v564_v14  ;;  %v197_v23 = vadd.f32 %v466_v18, %v564_v14  ;;  %v156_v24 = vpop.f32.mrb[1].mxu0  ;;  %v188_v25 = vpop.f32.mrb[1].mxu1 }
  0xdf   :  { %v157_v28 = vadd.f32 %v564_v14, %v156_v24  ;;  %v189_v29 = vadd.f32 %v564_v14, %v188_v25  ;;  %v459_v30 = vpop.f32.mrb[2].mxu0  ;;  %v467_v31 = vpop.f32.mrb[2].mxu1 }
  0xe0   :  { %v253_v33 = vadd.f32 %v409_v15, %v165_v22  ;;  %v261_v34 = vadd.f32 %v425_v16, %v197_v23  ;;  %v168_v35 = vadd.f32 %v459_v30, %v564_v14  ;;  %v200_v36 = vadd.f32 %v467_v31, %v564_v14  ;;  %v159_v37 = vpop.f32.mrb[3].mxu0  ;;  %v191_v38 = vpop.f32.mrb[3].mxu1 }
  0xe1   :  { %v251_v39 = vadd.f32 %v405_v19, %v157_v28  ;;  %v259_v40 = vadd.f32 %v421_v20, %v189_v29  ;;  %v160_v41 = vadd.f32 %v564_v14, %v159_v37  ;;  %v192_v42 = vadd.f32 %v564_v14, %v191_v38 }
  0xe2   :  { %v389_v45 = vpack.c.bf16 %v253_v33, %v253_v33  ;;  %v397_v46 = vpack.c.bf16 %v261_v34, %v261_v34  ;;  %v254_v47 = vadd.f32 %v410_v21, %v168_v35  ;;  %v262_v48 = vadd.f32 %v426_v26, %v200_v36 }
  0xe3   :  { %v387_v51 = vpack.c.bf16 %v251_v39, %v251_v39  ;;  %v395_v52 = vpack.c.bf16 %v259_v40, %v259_v40  ;;  %v252_v53 = vadd.f32 %v406_v27, %v160_v41  ;;  %v260_v54 = vadd.f32 %v422_v32, %v192_v42 }
  0xe4   :  { %334 = vst.msk [vmem:[%s662_s4 + $0x8] sm:$0xf] %vm331_vm1, %v389_v45  ;;  %342 = vst.msk [vmem:[%s662_s4 + $0x28] sm:$0xf] %vm331_vm1, %v397_v46  ;;  %v390_v55 = vpack.c.bf16 %v254_v47, %v254_v47  ;;  %v398_v56 = vpack.c.bf16 %v262_v48, %v262_v48 }
  0xe5   :  { %332 = vst.msk [vmem:[%s662_s4] sm:$0xf] %vm331_vm1, %v387_v51  ;;  %340 = vst.msk [vmem:[%s662_s4 + $0x20] sm:$0xf] %vm331_vm1, %v395_v52  ;;  %v388_v59 = vpack.c.bf16 %v252_v53, %v252_v53  ;;  %v396_v60 = vpack.c.bf16 %v260_v54, %v260_v54  ;;  %v462_v61 = vpop.f32.mrb[4].mxu0  ;;  %v470_v62 = vpop.f32.mrb[4].mxu1 }
  0xe6   :  { %335 = vst.msk [vmem:[%s662_s4 + $0xc] sm:$0xf] %vm331_vm1, %v390_v55  ;;  %343 = vst.msk [vmem:[%s662_s4 + $0x2c] sm:$0xf] %vm331_vm1, %v398_v56  ;;  %v181_v1 = vadd.f32 %v462_v61, %v564_v14  ;;  %v213_v2 = vadd.f32 %v470_v62, %v564_v14  ;;  %v172_v3 = vpop.f32.mrb[5].mxu0  ;;  %v204_v4 = vpop.f32.mrb[5].mxu1 }
  0xe7   :  { %333 = vst.msk [vmem:[%s662_s4 + $0x4] sm:$0xf] %vm331_vm1, %v388_v59  ;;  %341 = vst.msk [vmem:[%s662_s4 + $0x24] sm:$0xf] %vm331_vm1, %v396_v60  ;;  %v173_v7 = vadd.f32 %v564_v14, %v172_v3  ;;  %v205_v8 = vadd.f32 %v564_v14, %v204_v4  ;;  %v463_v9 = vpop.f32.mrb[6].mxu0  ;;  %v471_v10 = vpop.f32.mrb[6].mxu1 }
  0xe8   :  { %v257_v13 = vadd.f32 %v417_v57, %v181_v1  ;;  %v265_v15 = vadd.f32 %v433_v58, %v213_v2  ;;  %v184_v16 = vadd.f32 %v463_v9, %v564_v14  ;;  %v216_v17 = vadd.f32 %v471_v10, %v564_v14  ;;  %v175_v18 = vpop.f32.mrb[7].mxu0  ;;  %v207_v19 = vpop.f32.mrb[7].mxu1 }
  0xe9   :  { %v255_v20 = vadd.f32 %v413_v63, %v173_v7  ;;  %v263_v21 = vadd.f32 %v429_v0, %v205_v8  ;;  %v176_v22 = vadd.f32 %v564_v14, %v175_v18  ;;  %v208_v23 = vadd.f32 %v564_v14, %v207_v19 }
  0xea   :  { %v393_v24 = vpack.c.bf16 %v257_v13, %v257_v13  ;;  %v401_v25 = vpack.c.bf16 %v265_v15, %v265_v15  ;;  %v258_v26 = vadd.f32 %v418_v5, %v184_v16  ;;  %v266_v27 = vadd.f32 %v434_v6, %v216_v17 }
  0xeb   :  { %v391_v28 = vpack.c.bf16 %v255_v20, %v255_v20  ;;  %v399_v29 = vpack.c.bf16 %v263_v21, %v263_v21  ;;  %v256_v30 = vadd.f32 %v414_v11, %v176_v22  ;;  %v264_v31 = vadd.f32 %v430_v12, %v208_v23 }
  0xec   :  { %338 = vst.msk [vmem:[%s662_s4 + $0x18] sm:$0xf] %vm331_vm1, %v393_v24  ;;  %346 = vst.msk [vmem:[%s662_s4 + $0x38] sm:$0xf] %vm331_vm1, %v401_v25  ;;  %v394_v32 = vpack.c.bf16 %v258_v26, %v258_v26  ;;  %v402_v14 = vpack.c.bf16 %v266_v27, %v266_v27 }
  0xed   :  { %336 = vst.msk [vmem:[%s662_s4 + $0x10] sm:$0xf] %vm331_vm1, %v391_v28  ;;  %344 = vst.msk [vmem:[%s662_s4 + $0x30] sm:$0xf] %vm331_vm1, %v399_v29  ;;  %v392_v33 = vpack.c.bf16 %v256_v30, %v256_v30  ;;  %v400_v34 = vpack.c.bf16 %v264_v31, %v264_v31 }
  0xee   :  { %339 = vst.msk [vmem:[%s662_s4 + $0x1c] sm:$0xf] %vm331_vm1, %v394_v32  ;;  %347 = vst.msk [vmem:[%s662_s4 + $0x3c] sm:$0xf] %vm331_vm1, %v402_v14 }
  0xef   :  { %337 = vst.msk [vmem:[%s662_s4 + $0x14] sm:$0xf] %vm331_vm1, %v392_v33  ;;  %345 = vst.msk [vmem:[%s662_s4 + $0x34] sm:$0xf] %vm331_vm1, %v400_v34 }

// kernel: encoder_forward.24
= control target key start
LH: loop header
LB: loop body
LE: loop exit
PB: predicated region body
PF: predicated region fallthrough
CT: control target
= control target key end

     0   :  { %v819_v0 = vmov 0   ;;  %vm192_vm0 = vcmask 154624   ;;  %vm217_vm1 = vcmask 1040384   ;;  %vm218_vm2 = vcmask 1041408   ;;  %s1240_s1 = inlined_call_operand.vmem [shape: bf16[147,32], index: 1, kind: input, shape index: {}]   ;;  %s1241_s0 = inlined_call_operand.vmem [shape: bf16[128,147], index: 0, kind: input, shape index: {}]   ;;  %s1242_s2 = inlined_call_operand.vmem [shape: f32[1,32], index: 2, kind: input, shape index: {}]   ;;  %s1243_s3 = inlined_call_operand.vmem [shape: f32[1,32], index: 3, kind: input, shape index: {}]   ;;  %s1244_s4 = inlined_call_operand.vmem [shape: f32[1,32], index: 4, kind: input, shape index: {}]   ;;  %s1245_s5 = inlined_call_operand.vmem [shape: bf16[128,32], index: 5, kind: output, shape index: {}]  }
   0x1   :  { %224 = vmatprep.subr.bf16.mxu0 %v819_v0  ;;  %731 = vmatprep.subr.bf16.mxu1 %v819_v0  ;;  %v753_v1 = vld [vmem:[%s1240_s1] sm:$0xff]   ;;  %v754_v2 = vld [vmem:[%s1240_s1 + $0x8] sm:$0xff]   ;;  %v755_v3 = vld [vmem:[%s1240_s1 + $0x10] sm:$0xff]   ;;  %v820_v11 = vmov 65535   ;;  %vm321_vm3 = vcmask 261120   ;;  %vm641_vm4 = vcmask 257024  }
   0x2   :  { %225 = vmatpush1.bf16.msra.mxu0 %v753_v1  ;;  %741 = vmatpush1.bf16.msra.mxu1 %v753_v1  ;;  %v756_v4 = vld [vmem:[%s1240_s1 + $0x18] sm:$0xff]   ;;  %v765_v5 = vld [vmem:[%s1241_s0 + $0x4] ss:$8 sps:$4 sm:$0xff]   ;;  %v759_v9 = vld [vmem:[%s1240_s1 + $0x30] sm:$0xff]   ;;  %v219_v12 = vsel %vm217_vm1, 4294967295, %v820_v11 }
   0x3   :  { %226 = vmatprep.subr.bf16.mxu0 %v819_v0  ;;  %732 = vmatprep.subr.bf16.mxu1 %v819_v0  ;;  %v768_v6 = vld [vmem:[%s1241_s0 + $0x44] ss:$8 sps:$4 sm:$0xff]   ;;  %v760_v10 = vld [vmem:[%s1240_s1 + $0x38] sm:$0xff]   ;;  %v762_v14 = vld [vmem:[%s1240_s1 + $0x48] ss:$0 sps:$4 sm:$0x33]  }
   0x4   :  { %689 = vmatprep.mubr.msk.bf16.mxu0 %vm192_vm0, %v765_v5  ;;  %v757_v7 = vld [vmem:[%s1240_s1 + $0x20] sm:$0xff]   ;;  %693 = vmatprep.mubr.msk.bf16.mxu1 %vm192_vm0, %v768_v6  ;;  %v758_v8 = vld [vmem:[%s1240_s1 + $0x28] sm:$0xff]   ;;  %v220_v15 = vsel %vm218_vm2, %v219_v12, 0  ;;  %v769_v19 = vld [vmem:[%s1241_s0 + $0x14] ss:$8 sps:$4 sm:$0xff]  }
   0x5   :  { %v761_v13 = vld [vmem:[%s1240_s1 + $0x40] sm:$0xff]   ;;  %v222_v16 = vand.u32 %v762_v14, %v220_v15  ;;  %v772_v20 = vld [vmem:[%s1241_s0 + $0x54] ss:$8 sps:$4 sm:$0xff]   ;;  %v771_v21 = vld [vmem:[%s1241_s0 + $0x10] ss:$8 sps:$4 sm:$0xff]  }
   0x6   :  { %227 = vmatpush1.bf16.msra.mxu0 %v754_v2  ;;  %742 = vmatpush1.bf16.msra.mxu1 %v754_v2  ;;  %v763_v17 = vld [vmem:[%s1241_s0] ss:$8 sps:$4 sm:$0xff]   ;;  %v774_v22 = vld [vmem:[%s1241_s0 + $0x50] ss:$8 sps:$4 sm:$0xff]   ;;  %v775_v23 = vld [vmem:[%s1241_s0 + $0x24] ss:$8 sps:$4 sm:$0xff]  }
   0x7   :  { %228 = vmatprep.subr.bf16.mxu0 %v819_v0  ;;  %733 = vmatprep.subr.bf16.mxu1 %v819_v0  ;;  %v766_v18 = vld [vmem:[%s1241_s0 + $0x40] ss:$8 sps:$4 sm:$0xff]   ;;  %v778_v24 = vld [vmem:[%s1241_s0 + $0x64] ss:$8 sps:$4 sm:$0xff]   ;;  %v781_v27 = vld [vmem:[%s1241_s0 + $0x34] ss:$8 sps:$4 sm:$0xff]  }
   0x8   :  { %v777_v25 = vld [vmem:[%s1241_s0 + $0x20] ss:$8 sps:$4 sm:$0xff]   ;;  %v784_v28 = vld [vmem:[%s1241_s0 + $0x74] ss:$8 sps:$4 sm:$0xff]   ;;  %v783_v29 = vld [vmem:[%s1241_s0 + $0x30] ss:$8 sps:$4 sm:$0xff]  }
   0x9   :  { %v780_v26 = vld [vmem:[%s1241_s0 + $0x60] ss:$8 sps:$4 sm:$0xff]   ;;  %v786_v30 = vld [vmem:[%s1241_s0 + $0x70] ss:$8 sps:$4 sm:$0xff]  }
   0xa   :  { %229 = vmatpush1.bf16.msra.mxu0 %v755_v3  ;;  %743 = vmatpush1.bf16.msra.mxu1 %v755_v3  ;;  %v940_v31 = vld [vmem:[%s1242_s2] ss:$0 sm:$0xff] }
   0xb   :  { %230 = vmatprep.subr.bf16.mxu0 %v819_v0  ;;  %734 = vmatprep.subr.bf16.mxu1 %v819_v0 }
   0xe   :  { %231 = vmatpush1.bf16.msra.mxu0 %v756_v4  ;;  %744 = vmatpush1.bf16.msra.mxu1 %v756_v4 }
   0xf   :  { %232 = vmatprep.subr.bf16.mxu0 %v819_v0  ;;  %735 = vmatprep.subr.bf16.mxu1 %v819_v0 }
  0x12   :  { %233 = vmatpush1.bf16.msra.mxu0 %v757_v7  ;;  %745 = vmatpush1.bf16.msra.mxu1 %v757_v7 }
  0x13   :  { %234 = vmatprep.subr.bf16.mxu0 %v819_v0  ;;  %736 = vmatprep.subr.bf16.mxu1 %v819_v0 }
  0x16   :  { %235 = vmatpush1.bf16.msra.mxu0 %v758_v8  ;;  %746 = vmatpush1.bf16.msra.mxu1 %v758_v8 }
  0x17   :  { %236 = vmatprep.subr.bf16.mxu0 %v819_v0  ;;  %737 = vmatprep.subr.bf16.mxu1 %v819_v0 }
  0x1a   :  { %237 = vmatpush1.bf16.msra.mxu0 %v759_v9  ;;  %747 = vmatpush1.bf16.msra.mxu1 %v759_v9 }
  0x1b   :  { %238 = vmatprep.subr.bf16.mxu0 %v819_v0  ;;  %738 = vmatprep.subr.bf16.mxu1 %v819_v0 }
  0x1e   :  { %239 = vmatpush1.bf16.msra.mxu0 %v760_v10  ;;  %748 = vmatpush1.bf16.msra.mxu1 %v760_v10 }
  0x1f   :  { %240 = vmatprep.subr.bf16.mxu0 %v819_v0  ;;  %739 = vmatprep.subr.bf16.mxu1 %v819_v0 }
  0x22   :  { %241 = vmatpush1.bf16.msra.mxu0 %v761_v13  ;;  %749 = vmatpush1.bf16.msra.mxu1 %v761_v13 }
  0x23   :  { %242 = vmatprep.subr.bf16.mxu0 %v819_v0  ;;  %740 = vmatprep.subr.bf16.mxu1 %v819_v0 }
  0x26   :  { %243 = vmatpush1.bf16.msra.mxu0 %v222_v16  ;;  %750 = vmatpush1.bf16.msra.mxu1 %v222_v16 }
  0x29   :  { %257 = vmatmul.mubr.bf16.vlgmr.msra.gmra.mrb[0].mxu0 %v763_v17  ;;  %289 = vmatmul.mubr.bf16.vlgmr.msra.gmra.mrb[0].mxu1 %v766_v18 }
  0x2a   :  { %690 = vmatprep.mubr.msk.bf16.mxu0 %vm192_vm0, %v769_v19  ;;  %694 = vmatprep.mubr.msk.bf16.mxu1 %vm192_vm0, %v772_v20 }
  0x31   :  { %265 = vmatmul.mubr.bf16.gmra.mrb[4].mxu0 %v771_v21  ;;  %297 = vmatmul.mubr.bf16.gmra.mrb[4].mxu1 %v774_v22 }
  0x32   :  { %691 = vmatprep.mubr.msk.bf16.mxu0 %vm192_vm0, %v775_v23  ;;  %695 = vmatprep.mubr.msk.bf16.mxu1 %vm192_vm0, %v778_v24 }
  0x39   :  { %273 = vmatmul.mubr.bf16.gmra.mrb[8].mxu0 %v777_v25  ;;  %305 = vmatmul.mubr.bf16.gmra.mrb[8].mxu1 %v780_v26 }
  0x3a   :  { %692 = vmatprep.mubr.msk.bf16.mxu0 %vm192_vm0, %v781_v27  ;;  %696 = vmatprep.mubr.msk.bf16.mxu1 %vm192_vm0, %v784_v28 }
  0x41   :  { %281 = vmatmul.mubr.bf16.gmra.mrb[12].mxu0 %v783_v29  ;;  %313 = vmatmul.mubr.bf16.gmra.mrb[12].mxu1 %v786_v30 }
  0xfc   :  { %v258_v32 = vpop.f32.mrb[0].mxu0  ;;  %v290_v33 = vpop.f32.mrb[0].mxu1 }
  0xfd   :  { %v943_v34 = vadd.f32 %v940_v31, %v258_v32  ;;  %v946_v35 = vadd.f32 %v940_v31, %v290_v33  ;;  %v260_v36 = vpop.f32.mrb[1].mxu0  ;;  %v292_v37 = vpop.f32.mrb[1].mxu1 }
  0xfe   :  { %v261_v38 = vpop.f32.mrb[2].mxu0  ;;  %v293_v39 = vpop.f32.mrb[2].mxu1 }
  0xff   :  { %v949_v40 = vadd.f32 %v940_v31, %v293_v39  ;;  %v263_v41 = vpop.f32.mrb[3].mxu0  ;;  %v295_v42 = vpop.f32.mrb[3].mxu1  ;;  %v322_v43 = vsel %vm321_vm3, %v943_v34, 0.0  ;;  %v346_v45 = vsel %vm321_vm3, %v946_v35, 0.0  ;;  %v958_v46 = vadd.f32 %v940_v31, %v261_v38 }
 0x100   :  { %323 = vadd.xlane.f32.xlu0 %v322_v43 }
 0x101   :  { %v349_v44 = vsel %vm321_vm3, %v949_v40, 0.0  ;;  %v325_v58 = vsel %vm321_vm3, %v958_v46, 0.0 }
 0x102   :  { %350 = vadd.xlane.f32.xlu1 %v349_v44 }
 0x104   :  { %v266_v47 = vpop.f32.mrb[4].mxu0  ;;  %347 = vadd.xlane.f32.xlu0 %v346_v45  ;;  %v298_v48 = vpop.f32.mrb[4].mxu1 }
 0x105   :  { %v961_v49 = vadd.f32 %v940_v31, %v266_v47  ;;  %v268_v50 = vpop.f32.mrb[5].mxu0  ;;  %v964_v51 = vadd.f32 %v940_v31, %v298_v48  ;;  %v300_v52 = vpop.f32.mrb[5].mxu1 }
 0x106   :  { %v269_v53 = vpop.f32.mrb[6].mxu0  ;;  %v301_v54 = vpop.f32.mrb[6].mxu1 }
 0x107   :  { %v967_v55 = vadd.f32 %v940_v31, %v269_v53  ;;  %v271_v56 = vpop.f32.mrb[7].mxu0  ;;  %v328_v57 = vsel %vm321_vm3, %v961_v49, 0.0  ;;  %v303_v59 = vpop.f32.mrb[7].mxu1  ;;  %v974_v60 = vadd.f32 %v940_v31, %v301_v54  ;;  %v352_v62 = vsel %vm321_vm3, %v964_v51, 0.0 }
 0x108   :  { %329 = vadd.xlane.f32.xlu1 %v328_v57  ;;  %326 = vadd.xlane.f32.xlu0 %v325_v58 }
 0x109   :  { %v331_v61 = vsel %vm321_vm3, %v967_v55, 0.0  ;;  %v355_v4 = vsel %vm321_vm3, %v974_v60, 0.0 }
 0x10c   :  { %v274_v63 = vpop.f32.mrb[8].mxu0  ;;  %332 = vadd.xlane.f32.xlu1 %v331_v61  ;;  %353 = vadd.xlane.f32.xlu0 %v352_v62  ;;  %v306_v0 = vpop.f32.mrb[8].mxu1 }
 0x10d   :  { %v981_v1 = vadd.f32 %v940_v31, %v274_v63  ;;  %v276_v2 = vpop.f32.mrb[9].mxu0  ;;  %v984_v3 = vadd.f32 %v940_v31, %v306_v0  ;;  %v308_v5 = vpop.f32.mrb[9].mxu1 }
 0x10e   :  { %v277_v6 = vpop.f32.mrb[10].mxu0  ;;  %v309_v7 = vpop.f32.mrb[10].mxu1 }
 0x10f   :  { %v989_v8 = vadd.f32 %v940_v31, %v277_v6  ;;  %v334_v9 = vsel %vm321_vm3, %v981_v1, 0.0  ;;  %v279_v10 = vpop.f32.mrb[11].mxu0  ;;  %v311_v11 = vpop.f32.mrb[11].mxu1  ;;  %v994_v12 = vadd.f32 %v940_v31, %v309_v7  ;;  %v358_v14 = vsel %vm321_vm3, %v984_v3, 0.0 }
 0x110   :  { %356 = vadd.xlane.f32.xlu1 %v355_v4  ;;  %335 = vadd.xlane.f32.xlu0 %v334_v9 }
 0x111   :  { %v337_v13 = vsel %vm321_vm3, %v989_v8, 0.0  ;;  %v361_v20 = vsel %vm321_vm3, %v994_v12, 0.0 }
 0x114   :  { %v282_v15 = vpop.f32.mrb[12].mxu0  ;;  %338 = vadd.xlane.f32.xlu1 %v337_v13  ;;  %359 = vadd.xlane.f32.xlu0 %v358_v14  ;;  %v314_v16 = vpop.f32.mrb[12].mxu1 }
 0x115   :  { %v1001_v17 = vadd.f32 %v940_v31, %v282_v15  ;;  %v284_v18 = vpop.f32.mrb[13].mxu0  ;;  %v1004_v19 = vadd.f32 %v940_v31, %v314_v16  ;;  %v316_v21 = vpop.f32.mrb[13].mxu1 }
 0x116   :  { %v285_v22 = vpop.f32.mrb[14].mxu0  ;;  %v317_v23 = vpop.f32.mrb[14].mxu1 }
 0x117   :  { %v1009_v24 = vadd.f32 %v940_v31, %v285_v22  ;;  %v340_v25 = vsel %vm321_vm3, %v1001_v17, 0.0  ;;  %v287_v26 = vpop.f32.mrb[15].mxu0  ;;  %v319_v27 = vpop.f32.mrb[15].mxu1  ;;  %v1014_v28 = vadd.f32 %v940_v31, %v317_v23  ;;  %v364_v30 = vsel %vm321_vm3, %v1004_v19, 0.0 }
 0x118   :  { %362 = vadd.xlane.f32.xlu1 %v361_v20  ;;  %341 = vadd.xlane.f32.xlu0 %v340_v25 }
 0x119   :  { %v343_v29 = vsel %vm321_vm3, %v1009_v24, 0.0  ;;  %v367_v32 = vsel %vm321_vm3, %v1014_v28, 0.0 }
 0x11c   :  { %344 = vadd.xlane.f32.xlu1 %v343_v29  ;;  %365 = vadd.xlane.f32.xlu0 %v364_v30 }
 0x120   :  { %368 = vadd.xlane.f32.xlu1 %v367_v32 }
 0x18d   :  { %v324_v33 = vpop.xlane.xlu0 %323 }
 0x18e   :  { %v371_v36 = vmul.f32 0.03125, %v324_v33 }
 0x18f   :  { %v351_v38 = vpop.xlane.xlu1 %350 }
 0x190   :  { %v1023_v37 = vsub.f32 %v943_v34, %v371_v36  ;;  %v380_v42 = vmul.f32 0.03125, %v351_v38 }
 0x191   :  { %v348_v31 = vpop.xlane.xlu0 %347 }
 0x192   :  { %v379_v39 = vmul.f32 0.03125, %v348_v31  ;;  %v403_v41 = vmul.f32 %v1023_v37, %v1023_v37  ;;  %v1034_v52 = vsub.f32 %v949_v40, %v380_v42 }
 0x194   :  { %v1028_v43 = vsub.f32 %v946_v35, %v379_v39  ;;  %v419_v44 = vsel %vm321_vm3, %v403_v41, 0.0 }
 0x195   :  { %v330_v45 = vpop.xlane.xlu1 %329  ;;  %420 = vadd.xlane.f32.xlu0 %v419_v44  ;;  %v327_v47 = vpop.xlane.xlu0 %326 }
 0x196   :  { %v373_v48 = vmul.f32 0.03125, %v330_v45  ;;  %v372_v50 = vmul.f32 0.03125, %v327_v47  ;;  %v411_v34 = vmul.f32 %v1028_v43, %v1028_v43 }
 0x198   :  { %v1037_v53 = vsub.f32 %v961_v49, %v373_v48  ;;  %v1040_v54 = vsub.f32 %v958_v46, %v372_v50  ;;  %v443_v35 = vsel %vm321_vm3, %v411_v34, 0.0  ;;  %v412_v49 = vmul.f32 %v1034_v52, %v1034_v52 }
 0x199   :  { %v333_v56 = vpop.xlane.xlu1 %332  ;;  %444 = vadd.xlane.f32.xlu0 %v443_v35  ;;  %v354_v57 = vpop.xlane.xlu0 %353 }
 0x19a   :  { %v374_v58 = vmul.f32 0.03125, %v333_v56  ;;  %v381_v59 = vmul.f32 0.03125, %v354_v57  ;;  %v405_v61 = vmul.f32 %v1037_v53, %v1037_v53  ;;  %v404_v40 = vmul.f32 %v1040_v54, %v1040_v54 }
 0x19b   :  { %v446_v10 = vsel %vm321_vm3, %v412_v49, 0.0 }
 0x19c   :  { %v1050_v62 = vsub.f32 %v967_v55, %v374_v58  ;;  %v1053_v46 = vsub.f32 %v964_v51, %v381_v59  ;;  %v425_v63 = vsel %vm321_vm3, %v405_v61, 0.0  ;;  %v422_v0 = vsel %vm321_vm3, %v404_v40, 0.0 }
 0x19d   :  { %v357_v2 = vpop.xlane.xlu1 %356  ;;  %426 = vadd.xlane.f32.xlu0 %v425_v63  ;;  %423 = vadd.xlane.f32.xlu1 %v422_v0  ;;  %v336_v4 = vpop.xlane.xlu0 %335 }
 0x19e   :  { %v382_v5 = vmul.f32 0.03125, %v357_v2  ;;  %v375_v6 = vmul.f32 0.03125, %v336_v4  ;;  %v413_v7 = vmul.f32 %v1053_v46, %v1053_v46  ;;  %v406_v55 = vmul.f32 %v1050_v62, %v1050_v62 }
 0x1a0   :  { %v1062_v9 = vsub.f32 %v974_v60, %v382_v5  ;;  %v1065_v51 = vsub.f32 %v981_v1, %v375_v6  ;;  %v449_v11 = vsel %vm321_vm3, %v413_v7, 0.0  ;;  %v428_v20 = vsel %vm321_vm3, %v406_v55, 0.0 }
 0x1a1   :  { %v339_v13 = vpop.xlane.xlu1 %338  ;;  %447 = vadd.xlane.f32.xlu1 %v446_v10  ;;  %450 = vadd.xlane.f32.xlu0 %v449_v11  ;;  %v360_v14 = vpop.xlane.xlu0 %359 }
 0x1a2   :  { %v376_v15 = vmul.f32 0.03125, %v339_v13  ;;  %v383_v16 = vmul.f32 0.03125, %v360_v14  ;;  %v407_v18 = vmul.f32 %v1065_v51, %v1065_v51  ;;  %v414_v22 = vmul.f32 %v1062_v9, %v1062_v9 }
 0x1a4   :  { %v1073_v60 = vsub.f32 %v989_v8, %v376_v15  ;;  %v1076_v1 = vsub.f32 %v984_v3, %v383_v16  ;;  %v431_v21 = vsel %vm321_vm3, %v407_v18, 0.0  ;;  %v452_v32 = vsel %vm321_vm3, %v414_v22, 0.0  ;;  %v1121_v15 = vld [vmem:[%s1243_s3] ss:$0 sm:$0xff] }
 0x1a5   :  { %v363_v23 = vpop.xlane.xlu1 %362  ;;  %429 = vadd.xlane.f32.xlu1 %v428_v20  ;;  %432 = vadd.xlane.f32.xlu0 %v431_v21  ;;  %v342_v25 = vpop.xlane.xlu0 %341 }
 0x1a6   :  { %v384_v26 = vmul.f32 0.03125, %v363_v23  ;;  %v377_v27 = vmul.f32 0.03125, %v342_v25  ;;  %v415_v29 = vmul.f32 %v1076_v1, %v1076_v1  ;;  %v408_v8 = vmul.f32 %v1073_v60, %v1073_v60  ;;  %v1127_v23 = vld [vmem:[%s1244_s4] ss:$0 sm:$0xff] }
 0x1a8   :  { %v1086_v3 = vsub.f32 %v994_v12, %v384_v26  ;;  %v1089_v30 = vsub.f32 %v1001_v17, %v377_v27  ;;  %v455_v33 = vsel %vm321_vm3, %v415_v29, 0.0  ;;  %v434_v42 = vsel %vm321_vm3, %v408_v8, 0.0 }
 0x1a9   :  { %v345_v36 = vpop.xlane.xlu1 %344  ;;  %453 = vadd.xlane.f32.xlu1 %v452_v32  ;;  %456 = vadd.xlane.f32.xlu0 %v455_v33  ;;  %v366_v38 = vpop.xlane.xlu0 %365 }
 0x1aa   :  { %v378_v31 = vmul.f32 0.03125, %v345_v36  ;;  %v385_v39 = vmul.f32 0.03125, %v366_v38  ;;  %v409_v41 = vmul.f32 %v1089_v30, %v1089_v30  ;;  %v416_v45 = vmul.f32 %v1086_v3, %v1086_v3 }
 0x1ac   :  { %v1097_v12 = vsub.f32 %v1009_v24, %v378_v31  ;;  %v1100_v17 = vsub.f32 %v1004_v19, %v385_v39  ;;  %v437_v44 = vsel %vm321_vm3, %v409_v41, 0.0  ;;  %v458_v24 = vsel %vm321_vm3, %v416_v45, 0.0 }
 0x1ad   :  { %v369_v47 = vpop.xlane.xlu1 %368  ;;  %435 = vadd.xlane.f32.xlu1 %v434_v42  ;;  %438 = vadd.xlane.f32.xlu0 %v437_v44 }
 0x1ae   :  { %v386_v48 = vmul.f32 0.03125, %v369_v47  ;;  %v417_v50 = vmul.f32 %v1100_v17, %v1100_v17  ;;  %v410_v35 = vmul.f32 %v1097_v12, %v1097_v12 }
 0x1b0   :  { %v1108_v34 = vsub.f32 %v1014_v28, %v386_v48  ;;  %v461_v19 = vsel %vm321_vm3, %v417_v50, 0.0  ;;  %v440_v56 = vsel %vm321_vm3, %v410_v35, 0.0 }
 0x1b1   :  { %459 = vadd.xlane.f32.xlu1 %v458_v24  ;;  %462 = vadd.xlane.f32.xlu0 %v461_v19 }
 0x1b2   :  { %v418_v57 = vmul.f32 %v1108_v34, %v1108_v34 }
 0x1b4   :  { %v464_v58 = vsel %vm321_vm3, %v418_v57, 0.0 }
 0x1b5   :  { %441 = vadd.xlane.f32.xlu1 %v440_v56 }
 0x1b9   :  { %465 = vadd.xlane.f32.xlu1 %v464_v58 }
 0x222   :  { %v421_v28 = vpop.xlane.xlu0 %420 }
 0x223   :  { %v467_v59 = vmul.f32 0.03125, %v421_v28 }
 0x225   :  { %v483_v61 = vadd.f32 1e-06, %v467_v59 }
 0x226   :  { %v445_v40 = vpop.xlane.xlu0 %444 }
 0x227   :  { %787 = vrsqrt.f32 %v483_v61  ;;  %v475_v49 = vmul.f32 0.03125, %v445_v40 }
 0x229   :  { %v491_v63 = vadd.f32 1e-06, %v475_v49 }
 0x22a   :  { %v424_v0 = vpop.xlane.xlu1 %423  ;;  %v427_v2 = vpop.xlane.xlu0 %426 }
 0x22b   :  { %789 = vrsqrt.f32 %v491_v63  ;;  %v468_v4 = vmul.f32 0.03125, %v424_v0  ;;  %v469_v5 = vmul.f32 0.03125, %v427_v2 }
 0x22d   :  { %v484_v6 = vadd.f32 1e-06, %v468_v4  ;;  %v485_v7 = vadd.f32 1e-06, %v469_v5 }
 0x22e   :  { %v448_v55 = vpop.xlane.xlu1 %447  ;;  %v451_v10 = vpop.xlane.xlu0 %450 }
 0x22f   :  { %791 = vrsqrt.f32 %v484_v6  ;;  %v476_v11 = vmul.f32 0.03125, %v448_v55  ;;  %v477_v13 = vmul.f32 0.03125, %v451_v10 }
 0x230   :  { %793 = vrsqrt.f32 %v485_v7 }
 0x231   :  { %v788_v14 = vpop.eup %787  ;;  %v492_v16 = vadd.f32 1e-06, %v476_v11  ;;  %v493_v18 = vadd.f32 1e-06, %v477_v13 }
 0x232   :  { %v515_v20 = vmul.f32 %v788_v14, %v1023_v37  ;;  %v430_v21 = vpop.xlane.xlu1 %429  ;;  %v433_v22 = vpop.xlane.xlu0 %432 }
 0x233   :  { %795 = vrsqrt.f32 %v492_v16  ;;  %v470_v25 = vmul.f32 0.03125, %v430_v21  ;;  %v471_v26 = vmul.f32 0.03125, %v433_v22 }
 0x234   :  { %v538_v27 = vmul.f32 %v1121_v15, %v515_v20  ;;  %797 = vrsqrt.f32 %v493_v18 }
 0x235   :  { %v790_v29 = vpop.eup %789  ;;  %v486_v8 = vadd.f32 1e-06, %v470_v25  ;;  %v487_v32 = vadd.f32 1e-06, %v471_v26 }
 0x236   :  { %v561_v33 = vadd.f32 %v1127_v23, %v538_v27  ;;  %v523_v37 = vmul.f32 %v790_v29, %v1028_v43  ;;  %v454_v36 = vpop.xlane.xlu1 %453  ;;  %v457_v38 = vpop.xlane.xlu0 %456 }
 0x237   :  { %799 = vrsqrt.f32 %v486_v8  ;;  %v478_v31 = vmul.f32 0.03125, %v454_v36  ;;  %v479_v39 = vmul.f32 0.03125, %v457_v38 }
 0x238   :  { %v715_v41 = vpack.c.bf16 %v561_v33, %v561_v33  ;;  %v546_v42 = vmul.f32 %v1121_v15, %v523_v37  ;;  %801 = vrsqrt.f32 %v487_v32 }
 0x239   :  { %v792_v44 = vpop.eup %791  ;;  %v494_v45 = vadd.f32 1e-06, %v478_v31  ;;  %v495_v47 = vadd.f32 1e-06, %v479_v39 }
 0x23a   :  { %v794_v48 = vpop.eup %793  ;;  %642 = vst.msk [vmem:[%s1245_s5] sm:$0xf] %vm641_vm4, %v715_v41  ;;  %v569_v43 = vadd.f32 %v1127_v23, %v546_v42  ;;  %v516_v50 = vmul.f32 %v792_v44, %v1040_v54  ;;  %v436_v24 = vpop.xlane.xlu1 %435 }
 0x23b   :  { %v439_v19 = vpop.xlane.xlu0 %438  ;;  %v517_v35 = vmul.f32 %v794_v48, %v1037_v53  ;;  %803 = vrsqrt.f32 %v494_v45  ;;  %v472_v56 = vmul.f32 0.03125, %v436_v24 }
 0x23c   :  { %v473_v57 = vmul.f32 0.03125, %v439_v19  ;;  %v723_v58 = vpack.c.bf16 %v569_v43, %v569_v43  ;;  %v539_v28 = vmul.f32 %v1121_v15, %v516_v50  ;;  %805 = vrsqrt.f32 %v495_v47 }
 0x23d   :  { %v796_v59 = vpop.eup %795  ;;  %v540_v61 = vmul.f32 %v1121_v15, %v517_v35  ;;  %v488_v40 = vadd.f32 1e-06, %v472_v56 }
 0x23e   :  { %v489_v49 = vadd.f32 1e-06, %v473_v57  ;;  %v798_v63 = vpop.eup %797  ;;  %650 = vst.msk [vmem:[%s1245_s5 + $0x20] sm:$0xf] %vm641_vm4, %v723_v58  ;;  %v562_v53 = vadd.f32 %v1127_v23, %v539_v28  ;;  %v524_v54 = vmul.f32 %v796_v59, %v1034_v52  ;;  %v460_v0 = vpop.xlane.xlu1 %459 }
 0x23f   :  { %v463_v2 = vpop.xlane.xlu0 %462  ;;  %v563_v4 = vadd.f32 %v1127_v23, %v540_v61  ;;  %v525_v5 = vmul.f32 %v798_v63, %v1053_v46  ;;  %807 = vrsqrt.f32 %v488_v40  ;;  %v480_v6 = vmul.f32 0.03125, %v460_v0 }
 0x240   :  { %v716_v7 = vpack.c.bf16 %v562_v53, %v562_v53  ;;  %v547_v55 = vmul.f32 %v1121_v15, %v524_v54  ;;  %809 = vrsqrt.f32 %v489_v49  ;;  %v481_v10 = vmul.f32 0.03125, %v463_v2 }
 0x241   :  { %v800_v11 = vpop.eup %799  ;;  %v717_v13 = vpack.c.bf16 %v563_v4, %v563_v4  ;;  %v548_v14 = vmul.f32 %v1121_v15, %v525_v5  ;;  %v496_v16 = vadd.f32 1e-06, %v480_v6 }
 0x242   :  { %v802_v18 = vpop.eup %801  ;;  %643 = vst.msk [vmem:[%s1245_s5 + $0x4] sm:$0xf] %vm641_vm4, %v716_v7  ;;  %v570_v52 = vadd.f32 %v1127_v23, %v547_v55  ;;  %v518_v46 = vmul.f32 %v800_v11, %v1050_v62  ;;  %v497_v20 = vadd.f32 1e-06, %v481_v10  ;;  %v442_v21 = vpop.xlane.xlu1 %441 }
 0x243   :  { %644 = vst.msk [vmem:[%s1245_s5 + $0x8] sm:$0xf] %vm641_vm4, %v717_v13  ;;  %v571_v22 = vadd.f32 %v1127_v23, %v548_v14  ;;  %v519_v25 = vmul.f32 %v802_v18, %v1065_v51  ;;  %811 = vrsqrt.f32 %v496_v16  ;;  %v474_v26 = vmul.f32 0.03125, %v442_v21 }
 0x244   :  { %v724_v27 = vpack.c.bf16 %v570_v52, %v570_v52  ;;  %v541_v29 = vmul.f32 %v1121_v15, %v518_v46  ;;  %813 = vrsqrt.f32 %v497_v20 }
 0x245   :  { %v804_v8 = vpop.eup %803  ;;  %v725_v32 = vpack.c.bf16 %v571_v22, %v571_v22  ;;  %v542_v62 = vmul.f32 %v1121_v15, %v519_v25  ;;  %v490_v33 = vadd.f32 1e-06, %v474_v26 }
 0x246   :  { %v806_v37 = vpop.eup %805  ;;  %651 = vst.msk [vmem:[%s1245_s5 + $0x24] sm:$0xf] %vm641_vm4, %v724_v27  ;;  %v564_v36 = vadd.f32 %v1127_v23, %v541_v29  ;;  %v526_v51 = vmul.f32 %v804_v8, %v1062_v9  ;;  %v466_v38 = vpop.xlane.xlu1 %465 }
 0x247   :  { %652 = vst.msk [vmem:[%s1245_s5 + $0x28] sm:$0xf] %vm641_vm4, %v725_v32  ;;  %v565_v31 = vadd.f32 %v1127_v23, %v542_v62  ;;  %v527_v39 = vmul.f32 %v806_v37, %v1076_v1  ;;  %815 = vrsqrt.f32 %v490_v33  ;;  %v482_v41 = vmul.f32 0.03125, %v466_v38 }
 0x248   :  { %v718_v42 = vpack.c.bf16 %v564_v36, %v564_v36  ;;  %v549_v44 = vmul.f32 %v1121_v15, %v526_v51 }
 0x249   :  { %v808_v45 = vpop.eup %807  ;;  %v719_v47 = vpack.c.bf16 %v565_v31, %v565_v31  ;;  %v550_v48 = vmul.f32 %v1121_v15, %v527_v39  ;;  %v498_v9 = vadd.f32 1e-06, %v482_v41 }
 0x24a   :  { %v810_v43 = vpop.eup %809  ;;  %645 = vst.msk [vmem:[%s1245_s5 + $0xc] sm:$0xf] %vm641_vm4, %v718_v42  ;;  %v572_v50 = vadd.f32 %v1127_v23, %v549_v44  ;;  %v520_v1 = vmul.f32 %v808_v45, %v1073_v60 }
 0x24b   :  { %646 = vst.msk [vmem:[%s1245_s5 + $0x10] sm:$0xf] %vm641_vm4, %v719_v47  ;;  %v573_v24 = vadd.f32 %v1127_v23, %v550_v48  ;;  %v521_v19 = vmul.f32 %v810_v43, %v1089_v30  ;;  %817 = vrsqrt.f32 %v498_v9 }
 0x24c   :  { %v726_v35 = vpack.c.bf16 %v572_v50, %v572_v50  ;;  %v543_v56 = vmul.f32 %v1121_v15, %v520_v1 }
 0x24d   :  { %v812_v57 = vpop.eup %811  ;;  %v727_v58 = vpack.c.bf16 %v573_v24, %v573_v24  ;;  %v544_v28 = vmul.f32 %v1121_v15, %v521_v19 }
 0x24e   :  { %v814_v59 = vpop.eup %813  ;;  %653 = vst.msk [vmem:[%s1245_s5 + $0x2c] sm:$0xf] %vm641_vm4, %v726_v35  ;;  %v566_v60 = vadd.f32 %v1127_v23, %v543_v56  ;;  %v528_v61 = vmul.f32 %v812_v57, %v1086_v3 }
 0x24f   :  { %654 = vst.msk [vmem:[%s1245_s5 + $0x30] sm:$0xf] %vm641_vm4, %v727_v58  ;;  %v567_v30 = vadd.f32 %v1127_v23, %v544_v28  ;;  %v529_v40 = vmul.f32 %v814_v59, %v1100_v17 }
 0x250   :  { %v720_v49 = vpack.c.bf16 %v566_v60, %v566_v60  ;;  %v551_v63 = vmul.f32 %v1121_v15, %v528_v61 }
 0x251   :  { %v816_v53 = vpop.eup %815  ;;  %v721_v54 = vpack.c.bf16 %v567_v30, %v567_v30  ;;  %v552_v0 = vmul.f32 %v1121_v15, %v529_v40 }
 0x252   :  { %647 = vst.msk [vmem:[%s1245_s5 + $0x14] sm:$0xf] %vm641_vm4, %v720_v49  ;;  %v574_v3 = vadd.f32 %v1127_v23, %v551_v63  ;;  %v522_v2 = vmul.f32 %v816_v53, %v1097_v12 }
 0x253   :  { %648 = vst.msk [vmem:[%s1245_s5 + $0x18] sm:$0xf] %vm641_vm4, %v721_v54  ;;  %v575_v17 = vadd.f32 %v1127_v23, %v552_v0 }
 0x254   :  { %v728_v4 = vpack.c.bf16 %v574_v3, %v574_v3  ;;  %v545_v5 = vmul.f32 %v1121_v15, %v522_v2 }
 0x255   :  { %v818_v6 = vpop.eup %817  ;;  %v729_v7 = vpack.c.bf16 %v575_v17, %v575_v17 }
 0x256   :  { %655 = vst.msk [vmem:[%s1245_s5 + $0x34] sm:$0xf] %vm641_vm4, %v728_v4  ;;  %v568_v55 = vadd.f32 %v1127_v23, %v545_v5  ;;  %v530_v12 = vmul.f32 %v818_v6, %v1108_v34 }
 0x257   :  { %656 = vst.msk [vmem:[%s1245_s5 + $0x38] sm:$0xf] %vm641_vm4, %v729_v7 }
 0x258   :  { %v722_v10 = vpack.c.bf16 %v568_v55, %v568_v55  ;;  %v553_v11 = vmul.f32 %v1121_v15, %v530_v12 }
 0x25a   :  { %649 = vst.msk [vmem:[%s1245_s5 + $0x1c] sm:$0xf] %vm641_vm4, %v722_v10  ;;  %v576_v13 = vadd.f32 %v1127_v23, %v553_v11 }
 0x25c   :  { %v730_v14 = vpack.c.bf16 %v576_v13, %v576_v13 }
 0x25e   :  { %657 = vst.msk [vmem:[%s1245_s5 + $0x3c] sm:$0xf] %vm641_vm4, %v730_v14 }

// kernel: encoder_forward.25
= control target key start
LH: loop header
LB: loop body
LE: loop exit
PB: predicated region body
PF: predicated region fallthrough
CT: control target
= control target key end

     0   :  { %vm53_vm0 = vcmask 261120   ;;  %vm669_vm1 = vcmask 257024   ;;  %s1346_s0 = inlined_call_operand.vmem [shape: bf16[128,32], index: 0, kind: input, shape index: {}]   ;;  %s1347_s3 = inlined_call_operand.vmem [shape: bf16[32,32], index: 3, kind: input, shape index: {}]   ;;  %s1348_s1 = inlined_call_operand.vmem [shape: f32[1,32], index: 1, kind: input, shape index: {}]   ;;  %s1349_s2 = inlined_call_operand.vmem [shape: f32[1,32], index: 2, kind: input, shape index: {}]   ;;  %s1350_s4 = inlined_call_operand.vmem [shape: f32[1,32], index: 4, kind: input, shape index: {}]   ;;  %s1351_s5 = inlined_call_operand.vmem [shape: bf16[128,32], index: 5, kind: output, shape index: {}]  }
   0x1   :  { %v907_v0 = vld [vmem:[%s1346_s0] sm:$0xff]   ;;  %v921_v6 = vld [vmem:[%s1346_s0 + $0x8] sm:$0xff]   ;;  %v949_v18 = vld [vmem:[%s1346_s0 + $0x10] sm:$0xff]  }
   0x2   :  { %v912_v1 = vld [vmem:[%s1346_s0 + $0x20] sm:$0xff]   ;;  %v737_v2 = vunpack.c.l.bf16 %v907_v0  ;;  %v738_v4 = vunpack.c.h.bf16 %v907_v0  ;;  %v741_v11 = vunpack.c.l.bf16 %v921_v6  ;;  %v742_v12 = vunpack.c.h.bf16 %v921_v6  ;;  %v936_v13 = vld [vmem:[%s1346_s0 + $0x28] sm:$0xff]   ;;  %v962_v23 = vld [vmem:[%s1346_s0 + $0x30] sm:$0xff]  }
   0x3   :  { %v753_v3 = vunpack.c.l.bf16 %v912_v1  ;;  %v754_v5 = vunpack.c.h.bf16 %v912_v1  ;;  %v757_v16 = vunpack.c.l.bf16 %v936_v13  ;;  %v758_v17 = vunpack.c.h.bf16 %v936_v13  ;;  %v975_v28 = vld [vmem:[%s1346_s0 + $0x18] sm:$0xff]  }
   0x4   :  { %v54_v7 = vsel %vm53_vm0, %v737_v2, 0.0  ;;  %v57_v9 = vsel %vm53_vm0, %v738_v4, 0.0  ;;  %v60_v14 = vsel %vm53_vm0, %v741_v11, 0.0  ;;  %v63_v15 = vsel %vm53_vm0, %v742_v12, 0.0  ;;  %v988_v33 = vld [vmem:[%s1346_s0 + $0x38] sm:$0xff]  }
   0x5   :  { %v78_v8 = vsel %vm53_vm0, %v753_v3, 0.0  ;;  %55 = vadd.xlane.f32.xlu0 %v54_v7  ;;  %v81_v10 = vsel %vm53_vm0, %v754_v5, 0.0  ;;  %v84_v19 = vsel %vm53_vm0, %v757_v16, 0.0  ;;  %v87_v20 = vsel %vm53_vm0, %v758_v17, 0.0 }
   0x6   :  { %79 = vadd.xlane.f32.xlu1 %v78_v8  ;;  %v745_v21 = vunpack.c.l.bf16 %v949_v18  ;;  %v746_v22 = vunpack.c.h.bf16 %v949_v18  ;;  %v761_v26 = vunpack.c.l.bf16 %v962_v23  ;;  %v762_v27 = vunpack.c.h.bf16 %v962_v23 }
   0x7   :  { %v749_v31 = vunpack.c.l.bf16 %v975_v28  ;;  %v750_v32 = vunpack.c.h.bf16 %v975_v28  ;;  %v765_v36 = vunpack.c.l.bf16 %v988_v33  ;;  %v766_v37 = vunpack.c.h.bf16 %v988_v33 }
   0x8   :  { %v66_v24 = vsel %vm53_vm0, %v745_v21, 0.0  ;;  %v69_v25 = vsel %vm53_vm0, %v746_v22, 0.0  ;;  %v90_v29 = vsel %vm53_vm0, %v761_v26, 0.0  ;;  %v93_v30 = vsel %vm53_vm0, %v762_v27, 0.0 }
   0x9   :  { %58 = vadd.xlane.f32.xlu0 %v57_v9  ;;  %v72_v34 = vsel %vm53_vm0, %v749_v31, 0.0  ;;  %v75_v35 = vsel %vm53_vm0, %v750_v32, 0.0  ;;  %v96_v38 = vsel %vm53_vm0, %v765_v36, 0.0  ;;  %v99_v39 = vsel %vm53_vm0, %v766_v37, 0.0 }
   0xa   :  { %82 = vadd.xlane.f32.xlu1 %v81_v10 }
   0xd   :  { %61 = vadd.xlane.f32.xlu0 %v60_v14 }
   0xe   :  { %64 = vadd.xlane.f32.xlu1 %v63_v15 }
  0x11   :  { %85 = vadd.xlane.f32.xlu0 %v84_v19 }
  0x12   :  { %88 = vadd.xlane.f32.xlu1 %v87_v20 }
  0x15   :  { %67 = vadd.xlane.f32.xlu0 %v66_v24 }
  0x16   :  { %70 = vadd.xlane.f32.xlu1 %v69_v25 }
  0x19   :  { %91 = vadd.xlane.f32.xlu0 %v90_v29 }
  0x1a   :  { %94 = vadd.xlane.f32.xlu1 %v93_v30 }
  0x1d   :  { %73 = vadd.xlane.f32.xlu0 %v72_v34 }
  0x1e   :  { %76 = vadd.xlane.f32.xlu1 %v75_v35 }
  0x21   :  { %97 = vadd.xlane.f32.xlu0 %v96_v38 }
  0x22   :  { %100 = vadd.xlane.f32.xlu1 %v99_v39 }
  0x92   :  { %v56_v40 = vpop.xlane.xlu0 %55 }
  0x93   :  { %v80_v41 = vpop.xlane.xlu1 %79  ;;  %v103_v42 = vmul.f32 0.03125, %v56_v40 }
  0x94   :  { %v111_v43 = vmul.f32 0.03125, %v80_v41 }
  0x95   :  { %v1004_v44 = vsub.f32 %v737_v2, %v103_v42 }
  0x96   :  { %v1006_v45 = vsub.f32 %v753_v3, %v111_v43  ;;  %v59_v46 = vpop.xlane.xlu0 %58 }
  0x97   :  { %v83_v47 = vpop.xlane.xlu1 %82  ;;  %v104_v48 = vmul.f32 0.03125, %v59_v46  ;;  %v135_v50 = vmul.f32 %v1004_v44, %v1004_v44 }
  0x98   :  { %v112_v49 = vmul.f32 0.03125, %v83_v47  ;;  %v143_v51 = vmul.f32 %v1006_v45, %v1006_v45 }
  0x99   :  { %v1014_v52 = vsub.f32 %v738_v4, %v104_v48  ;;  %v151_v54 = vsel %vm53_vm0, %v135_v50, 0.0 }
  0x9a   :  { %v1018_v53 = vsub.f32 %v754_v5, %v112_v49  ;;  %152 = vadd.xlane.f32.xlu0 %v151_v54  ;;  %v62_v55 = vpop.xlane.xlu0 %61  ;;  %v175_v57 = vsel %vm53_vm0, %v143_v51, 0.0 }
  0x9b   :  { %v65_v56 = vpop.xlane.xlu1 %64  ;;  %v105_v58 = vmul.f32 0.03125, %v62_v55  ;;  %v136_v60 = vmul.f32 %v1014_v52, %v1014_v52 }
  0x9c   :  { %v106_v59 = vmul.f32 0.03125, %v65_v56  ;;  %v144_v61 = vmul.f32 %v1018_v53, %v1018_v53 }
  0x9d   :  { %v1028_v62 = vsub.f32 %v741_v11, %v105_v58  ;;  %v154_v0 = vsel %vm53_vm0, %v136_v60, 0.0 }
  0x9e   :  { %v1032_v63 = vsub.f32 %v742_v12, %v106_v59  ;;  %176 = vadd.xlane.f32.xlu0 %v175_v57  ;;  %155 = vadd.xlane.f32.xlu1 %v154_v0  ;;  %v86_v1 = vpop.xlane.xlu0 %85  ;;  %v178_v3 = vsel %vm53_vm0, %v144_v61, 0.0 }
  0x9f   :  { %v89_v2 = vpop.xlane.xlu1 %88  ;;  %v113_v4 = vmul.f32 0.03125, %v86_v1  ;;  %v137_v7 = vmul.f32 %v1028_v62, %v1028_v62 }
  0xa0   :  { %v114_v5 = vmul.f32 0.03125, %v89_v2  ;;  %v138_v8 = vmul.f32 %v1032_v63, %v1032_v63 }
  0xa1   :  { %v1042_v6 = vsub.f32 %v757_v16, %v113_v4  ;;  %v157_v10 = vsel %vm53_vm0, %v137_v7, 0.0 }
  0xa2   :  { %v1046_v9 = vsub.f32 %v758_v17, %v114_v5  ;;  %179 = vadd.xlane.f32.xlu1 %v178_v3  ;;  %158 = vadd.xlane.f32.xlu0 %v157_v10  ;;  %v68_v11 = vpop.xlane.xlu0 %67  ;;  %v160_v14 = vsel %vm53_vm0, %v138_v8, 0.0 }
  0xa3   :  { %v71_v12 = vpop.xlane.xlu1 %70  ;;  %v107_v15 = vmul.f32 0.03125, %v68_v11  ;;  %v145_v20 = vmul.f32 %v1042_v6, %v1042_v6 }
  0xa4   :  { %v108_v19 = vmul.f32 0.03125, %v71_v12  ;;  %v146_v16 = vmul.f32 %v1046_v9, %v1046_v9 }
  0xa5   :  { %v1056_v13 = vsub.f32 %v745_v21, %v107_v15  ;;  %v181_v24 = vsel %vm53_vm0, %v145_v20, 0.0 }
  0xa6   :  { %v1060_v17 = vsub.f32 %v746_v22, %v108_v19  ;;  %161 = vadd.xlane.f32.xlu1 %v160_v14  ;;  %182 = vadd.xlane.f32.xlu0 %v181_v24  ;;  %v92_v25 = vpop.xlane.xlu0 %91  ;;  %v184_v30 = vsel %vm53_vm0, %v146_v16, 0.0 }
  0xa7   :  { %v95_v29 = vpop.xlane.xlu1 %94  ;;  %v115_v34 = vmul.f32 0.03125, %v92_v25  ;;  %v139_v38 = vmul.f32 %v1056_v13, %v1056_v13 }
  0xa8   :  { %v116_v35 = vmul.f32 0.03125, %v95_v29  ;;  %v140_v21 = vmul.f32 %v1060_v17, %v1060_v17 }
  0xa9   :  { %v1070_v18 = vsub.f32 %v761_v26, %v115_v34  ;;  %v163_v39 = vsel %vm53_vm0, %v139_v38, 0.0 }
  0xaa   :  { %v1074_v22 = vsub.f32 %v762_v27, %v116_v35  ;;  %185 = vadd.xlane.f32.xlu1 %v184_v30  ;;  %164 = vadd.xlane.f32.xlu0 %v163_v39  ;;  %v74_v40 = vpop.xlane.xlu0 %73  ;;  %v166_v42 = vsel %vm53_vm0, %v140_v21, 0.0 }
  0xab   :  { %v77_v41 = vpop.xlane.xlu1 %76  ;;  %v109_v43 = vmul.f32 0.03125, %v74_v40  ;;  %v147_v47 = vmul.f32 %v1070_v18, %v1070_v18 }
  0xac   :  { %v110_v46 = vmul.f32 0.03125, %v77_v41  ;;  %v148_v26 = vmul.f32 %v1074_v22, %v1074_v22 }
  0xad   :  { %v1084_v23 = vsub.f32 %v749_v31, %v109_v43  ;;  %v187_v48 = vsel %vm53_vm0, %v147_v47, 0.0 }
  0xae   :  { %v1088_v27 = vsub.f32 %v750_v32, %v110_v46  ;;  %167 = vadd.xlane.f32.xlu1 %v166_v42  ;;  %188 = vadd.xlane.f32.xlu0 %v187_v48  ;;  %v98_v49 = vpop.xlane.xlu0 %97  ;;  %v190_v51 = vsel %vm53_vm0, %v148_v26, 0.0  ;;  %v1122_v42 = vld [vmem:[%s1348_s1] ss:$0 sm:$0xff] }
  0xaf   :  { %v101_v50 = vpop.xlane.xlu1 %100  ;;  %v117_v54 = vmul.f32 0.03125, %v98_v49  ;;  %v141_v56 = vmul.f32 %v1084_v23, %v1084_v23 }
  0xb0   :  { %v118_v55 = vmul.f32 0.03125, %v101_v50  ;;  %v142_v31 = vmul.f32 %v1088_v27, %v1088_v27 }
  0xb1   :  { %v1098_v28 = vsub.f32 %v765_v36, %v117_v54  ;;  %v169_v57 = vsel %vm53_vm0, %v141_v56, 0.0  ;;  %v808_v36 = vld [vmem:[%s1347_s3] sm:$0xff]  }
  0xb2   :  { %v1102_v32 = vsub.f32 %v766_v37, %v118_v55  ;;  %191 = vadd.xlane.f32.xlu1 %v190_v51  ;;  %170 = vadd.xlane.f32.xlu0 %v169_v57  ;;  %v172_v58 = vsel %vm53_vm0, %v142_v31, 0.0  ;;  %v809_v37 = vld [vmem:[%s1347_s3 + $0x8] sm:$0xff]   ;;  %v1129_v55 = vld [vmem:[%s1349_s2] ss:$0 sm:$0xff] }
  0xb3   :  { %v149_v59 = vmul.f32 %v1098_v28, %v1098_v28  ;;  %784 = vmatprep.subr.bf16.mxu0 %v808_v36  ;;  %804 = vmatprep.subr.bf16.mxu1 %v808_v36 }
  0xb4   :  { %v150_v60 = vmul.f32 %v1102_v32, %v1102_v32  ;;  %785 = vmatpush3.bf16.msra.mxu0 %v808_v36  ;;  %806 = vmatpush3.bf16.msra.mxu1 %v808_v36 }
  0xb5   :  { %v193_v61 = vsel %vm53_vm0, %v149_v59, 0.0  ;;  %786 = vmatprep.subr.bf16.mxu0 %v809_v37  ;;  %805 = vmatprep.subr.bf16.mxu1 %v809_v37 }
  0xb6   :  { %173 = vadd.xlane.f32.xlu1 %v172_v58  ;;  %194 = vadd.xlane.f32.xlu0 %v193_v61  ;;  %v196_v33 = vsel %vm53_vm0, %v150_v60, 0.0 }
  0xb8   :  { %787 = vmatpush3.bf16.msra.mxu0 %v809_v37  ;;  %807 = vmatpush3.bf16.msra.mxu1 %v809_v37 }
  0xba   :  { %197 = vadd.xlane.f32.xlu1 %v196_v33 }
 0x127   :  { %v153_v0 = vpop.xlane.xlu0 %152 }
 0x128   :  { %v199_v1 = vmul.f32 0.03125, %v153_v0 }
 0x12a   :  { %v215_v2 = vadd.f32 1e-06, %v199_v1 }
 0x12b   :  { %v156_v3 = vpop.xlane.xlu1 %155  ;;  %v177_v4 = vpop.xlane.xlu0 %176 }
 0x12c   :  { %810 = vrsqrt.f32 %v215_v2  ;;  %v200_v5 = vmul.f32 0.03125, %v156_v3  ;;  %v207_v7 = vmul.f32 0.03125, %v177_v4 }
 0x12e   :  { %v216_v8 = vadd.f32 1e-06, %v200_v5  ;;  %v223_v10 = vadd.f32 1e-06, %v207_v7 }
 0x12f   :  { %v180_v11 = vpop.xlane.xlu1 %179  ;;  %v159_v12 = vpop.xlane.xlu0 %158 }
 0x130   :  { %812 = vrsqrt.f32 %v216_v8  ;;  %v208_v14 = vmul.f32 0.03125, %v180_v11  ;;  %v201_v15 = vmul.f32 0.03125, %v159_v12 }
 0x131   :  { %814 = vrsqrt.f32 %v223_v10 }
 0x132   :  { %v224_v19 = vadd.f32 1e-06, %v208_v14  ;;  %v217_v20 = vadd.f32 1e-06, %v201_v15 }
 0x133   :  { %v162_v16 = vpop.xlane.xlu1 %161  ;;  %v183_v24 = vpop.xlane.xlu0 %182 }
 0x134   :  { %816 = vrsqrt.f32 %v224_v19  ;;  %v202_v25 = vmul.f32 0.03125, %v162_v16  ;;  %v209_v29 = vmul.f32 0.03125, %v183_v24 }
 0x135   :  { %818 = vrsqrt.f32 %v217_v20 }
 0x136   :  { %v811_v30 = vpop.eup %810  ;;  %v218_v34 = vadd.f32 1e-06, %v202_v25  ;;  %v225_v35 = vadd.f32 1e-06, %v209_v29 }
 0x137   :  { %v186_v38 = vpop.xlane.xlu1 %185  ;;  %v165_v21 = vpop.xlane.xlu0 %164  ;;  %v247_v39 = vmul.f32 %v811_v30, %v1004_v44 }
 0x138   :  { %820 = vrsqrt.f32 %v218_v34  ;;  %v210_v40 = vmul.f32 0.03125, %v186_v38  ;;  %v203_v41 = vmul.f32 0.03125, %v165_v21 }
 0x139   :  { %822 = vrsqrt.f32 %v225_v35  ;;  %v270_v51 = vmul.f32 %v1122_v42, %v247_v39 }
 0x13a   :  { %v813_v43 = vpop.eup %812  ;;  %v226_v46 = vadd.f32 1e-06, %v210_v40  ;;  %v219_v47 = vadd.f32 1e-06, %v203_v41 }
 0x13b   :  { %v815_v26 = vpop.eup %814  ;;  %v168_v48 = vpop.xlane.xlu1 %167  ;;  %v248_v50 = vmul.f32 %v813_v43, %v1014_v52  ;;  %v293_v33 = vadd.f32 %v1129_v55, %v270_v51 }
 0x13c   :  { %v189_v49 = vpop.xlane.xlu0 %188  ;;  %824 = vrsqrt.f32 %v226_v46  ;;  %v204_v44 = vmul.f32 0.03125, %v168_v48  ;;  %v255_v56 = vmul.f32 %v815_v26, %v1006_v45 }
 0x13d   :  { %v211_v54 = vmul.f32 0.03125, %v189_v49  ;;  %826 = vrsqrt.f32 %v219_v47  ;;  %v271_v31 = vmul.f32 %v1122_v42, %v248_v50 }
 0x13e   :  { %v817_v57 = vpop.eup %816  ;;  %v220_v58 = vadd.f32 1e-06, %v204_v44  ;;  %v278_v0 = vmul.f32 %v1122_v42, %v255_v56 }
 0x13f   :  { %v227_v59 = vadd.f32 1e-06, %v211_v54  ;;  %v819_v60 = vpop.eup %818  ;;  %v192_v52 = vpop.xlane.xlu1 %191  ;;  %v294_v36 = vadd.f32 %v1129_v55, %v271_v31  ;;  %v256_v37 = vmul.f32 %v817_v57, %v1018_v53 }
 0x140   :  { %v171_v61 = vpop.xlane.xlu0 %170  ;;  %v249_v1 = vmul.f32 %v819_v60, %v1028_v62  ;;  %828 = vrsqrt.f32 %v220_v58  ;;  %v212_v45 = vmul.f32 0.03125, %v192_v52  ;;  %v301_v14 = vadd.f32 %v1129_v55, %v278_v0 }
 0x141   :  { %v205_v2 = vmul.f32 0.03125, %v171_v61  ;;  %830 = vrsqrt.f32 %v227_v59  ;;  %v309_v3 = vpack.c.bf16 %v294_v36, %v293_v33  ;;  %v279_v4 = vmul.f32 %v1122_v42, %v256_v37 }
 0x142   :  { %v821_v5 = vpop.eup %820  ;;  %v228_v7 = vadd.f32 1e-06, %v212_v45  ;;  %v272_v15 = vmul.f32 %v1122_v42, %v249_v1 }
 0x143   :  { %v221_v8 = vadd.f32 1e-06, %v205_v2  ;;  %v823_v10 = vpop.eup %822  ;;  %v250_v11 = vmul.f32 %v821_v5, %v1032_v63  ;;  %v174_v12 = vpop.xlane.xlu1 %173  ;;  %788 = vmatprep.mubr.msk.bf16.mxu0 %vm53_vm0, %v309_v3  ;;  %v302_v62 = vadd.f32 %v1129_v55, %v279_v4 }
 0x144   :  { %v195_v53 = vpop.xlane.xlu0 %194  ;;  %v257_v19 = vmul.f32 %v823_v10, %v1042_v6  ;;  %832 = vrsqrt.f32 %v228_v7  ;;  %v206_v20 = vmul.f32 0.03125, %v174_v12  ;;  %v295_v21 = vadd.f32 %v1129_v55, %v272_v15 }
 0x145   :  { %v213_v16 = vmul.f32 0.03125, %v195_v53  ;;  %834 = vrsqrt.f32 %v221_v8  ;;  %v313_v24 = vpack.c.bf16 %v302_v62, %v301_v14  ;;  %v273_v25 = vmul.f32 %v1122_v42, %v250_v11 }
 0x146   :  { %v825_v63 = vpop.eup %824  ;;  %v222_v29 = vadd.f32 1e-06, %v206_v20  ;;  %v280_v39 = vmul.f32 %v1122_v42, %v257_v19 }
 0x147   :  { %v229_v30 = vadd.f32 1e-06, %v213_v16  ;;  %v827_v34 = vpop.eup %826  ;;  %v258_v35 = vmul.f32 %v825_v63, %v1046_v9  ;;  %v198_v38 = vpop.xlane.xlu1 %197  ;;  %796 = vmatprep.mubr.msk.bf16.mxu1 %vm53_vm0, %v313_v24  ;;  %v296_v6 = vadd.f32 %v1129_v55, %v273_v25 }
 0x148   :  { %v251_v40 = vmul.f32 %v827_v34, %v1056_v13  ;;  %836 = vrsqrt.f32 %v222_v29  ;;  %v214_v41 = vmul.f32 0.03125, %v198_v38  ;;  %v303_v49 = vadd.f32 %v1129_v55, %v280_v39 }
 0x149   :  { %838 = vrsqrt.f32 %v229_v30  ;;  %v310_v43 = vpack.c.bf16 %v296_v6, %v295_v21  ;;  %v281_v46 = vmul.f32 %v1122_v42, %v258_v35 }
 0x14a   :  { %v829_v47 = vpop.eup %828  ;;  %v230_v26 = vadd.f32 1e-06, %v214_v41  ;;  %v274_v51 = vmul.f32 %v1122_v42, %v251_v40 }
 0x14b   :  { %v831_v9 = vpop.eup %830  ;;  %v252_v48 = vmul.f32 %v829_v47, %v1060_v17  ;;  %789 = vmatmul.mubr.msk.bf16.vlgmr.msra.gmra.mrb[0].mxu0 %vm53_vm0, %v310_v43  ;;  %v304_v50 = vadd.f32 %v1129_v55, %v281_v46 }
 0x14c   :  { %v259_v13 = vmul.f32 %v831_v9, %v1070_v18  ;;  %840 = vrsqrt.f32 %v230_v26  ;;  %v297_v17 = vadd.f32 %v1129_v55, %v274_v51 }
 0x14d   :  { %v314_v44 = vpack.c.bf16 %v304_v50, %v303_v49  ;;  %v275_v54 = vmul.f32 %v1122_v42, %v252_v48 }
 0x14e   :  { %v833_v56 = vpop.eup %832  ;;  %v282_v59 = vmul.f32 %v1122_v42, %v259_v13 }
 0x14f   :  { %v835_v31 = vpop.eup %834  ;;  %v260_v57 = vmul.f32 %v833_v56, %v1074_v22  ;;  %797 = vmatmul.mubr.msk.bf16.vlgmr.msra.gmra.mrb[0].mxu1 %vm53_vm0, %v314_v44  ;;  %v298_v58 = vadd.f32 %v1129_v55, %v275_v54 }
 0x150   :  { %v253_v60 = vmul.f32 %v835_v31, %v1084_v23  ;;  %v305_v22 = vadd.f32 %v1129_v55, %v282_v59 }
 0x151   :  { %v311_v52 = vpack.c.bf16 %v298_v58, %v297_v17  ;;  %v283_v18 = vmul.f32 %v1122_v42, %v260_v57 }
 0x152   :  { %v837_v61 = vpop.eup %836  ;;  %v276_v0 = vmul.f32 %v1122_v42, %v253_v60 }
 0x153   :  { %v839_v33 = vpop.eup %838  ;;  %v254_v36 = vmul.f32 %v837_v61, %v1088_v27  ;;  %792 = vmatprep.mubr.msk.bf16.mxu0 %vm53_vm0, %v311_v52  ;;  %v306_v37 = vadd.f32 %v1129_v55, %v283_v18 }
 0x154   :  { %v261_v1 = vmul.f32 %v839_v33, %v1098_v28  ;;  %v299_v27 = vadd.f32 %v1129_v55, %v276_v0 }
 0x155   :  { %v315_v45 = vpack.c.bf16 %v306_v37, %v305_v22  ;;  %v277_v23 = vmul.f32 %v1122_v42, %v254_v36 }
 0x156   :  { %v841_v2 = vpop.eup %840  ;;  %v284_v5 = vmul.f32 %v1122_v42, %v261_v1 }
 0x157   :  { %v262_v3 = vmul.f32 %v841_v2, %v1102_v32  ;;  %800 = vmatprep.mubr.msk.bf16.mxu1 %vm53_vm0, %v315_v45  ;;  %v300_v4 = vadd.f32 %v1129_v55, %v277_v23  ;;  %v1187_v32 = vld [vmem:[%s1350_s4] ss:$0 sm:$0xff] }
 0x158   :  { %v307_v28 = vadd.f32 %v1129_v55, %v284_v5 }
 0x159   :  { %v312_v7 = vpack.c.bf16 %v300_v4, %v299_v27  ;;  %v285_v8 = vmul.f32 %v1122_v42, %v262_v3 }
 0x15b   :  { %793 = vmatmul.mubr.msk.bf16.gmra.mrb[4].mxu0 %vm53_vm0, %v312_v7  ;;  %v308_v10 = vadd.f32 %v1129_v55, %v285_v8 }
 0x15d   :  { %v316_v11 = vpack.c.bf16 %v308_v10, %v307_v28 }
 0x15f   :  { %801 = vmatmul.mubr.msk.bf16.gmra.mrb[4].mxu1 %vm53_vm0, %v316_v11 }
 0x21e   :  { %v790_v12 = vpop.f32.mrb[0].mxu0 }
 0x21f   :  { %v407_v53 = vadd.f32 %v790_v12, %v1187_v32  ;;  %v398_v14 = vpop.f32.mrb[1].mxu0 }
 0x220   :  { %v399_v42 = vadd.f32 %v1187_v32, %v398_v14  ;;  %v791_v62 = vpop.f32.mrb[2].mxu0 }
 0x221   :  { %v479_v15 = vmul.f32 0.044715, %v407_v53  ;;  %v410_v19 = vadd.f32 %v791_v62, %v1187_v32  ;;  %v401_v20 = vpop.f32.mrb[3].mxu0  ;;  %v463_v45 = vmul.f32 0.5, %v407_v53 }
 0x222   :  { %v477_v55 = vmul.f32 0.044715, %v399_v42  ;;  %v402_v16 = vadd.f32 %v1187_v32, %v401_v20  ;;  %v798_v24 = vpop.f32.mrb[0].mxu1  ;;  %v461_v27 = vmul.f32 0.5, %v399_v42 }
 0x223   :  { %v495_v25 = vmul.f32 %v479_v15, %v407_v53  ;;  %v480_v63 = vmul.f32 0.044715, %v410_v19  ;;  %v439_v29 = vadd.f32 %v798_v24, %v1187_v32  ;;  %v430_v30 = vpop.f32.mrb[1].mxu1  ;;  %v464_v8 = vmul.f32 0.5, %v410_v19 }
 0x224   :  { %v493_v34 = vmul.f32 %v477_v55, %v399_v42  ;;  %v478_v35 = vmul.f32 0.044715, %v402_v16  ;;  %v1195_v38 = vadd.f32 %v1187_v32, %v430_v30  ;;  %v799_v21 = vpop.f32.mrb[2].mxu1 }
 0x225   :  { %v511_v6 = vmul.f32 %v495_v25, %v407_v53  ;;  %v496_v39 = vmul.f32 %v480_v63, %v410_v19  ;;  %v487_v40 = vmul.f32 0.044715, %v439_v29  ;;  %v433_v41 = vpop.f32.mrb[3].mxu1  ;;  %v1199_v49 = vadd.f32 %v799_v21, %v1187_v32 }
 0x226   :  { %v509_v43 = vmul.f32 %v493_v34, %v399_v42  ;;  %v494_v46 = vmul.f32 %v478_v35, %v402_v16  ;;  %v485_v47 = vmul.f32 0.044715, %v1195_v38  ;;  %v1203_v31 = vadd.f32 %v1187_v32, %v433_v41 }
 0x227   :  { %v527_v26 = vadd.f32 %v511_v6, %v407_v53  ;;  %v512_v9 = vmul.f32 %v496_v39, %v410_v19  ;;  %v503_v48 = vmul.f32 %v487_v40, %v439_v29  ;;  %v488_v59 = vmul.f32 0.044715, %v1199_v49 }
 0x228   :  { %v525_v50 = vadd.f32 %v509_v43, %v399_v42  ;;  %v510_v51 = vmul.f32 %v494_v46, %v402_v16  ;;  %v501_v13 = vmul.f32 %v485_v47, %v1195_v38  ;;  %v486_v22 = vmul.f32 0.044715, %v1203_v31 }
 0x229   :  { %v543_v44 = vmul.f32 0.7978846, %v527_v26  ;;  %v528_v54 = vadd.f32 %v512_v9, %v410_v19  ;;  %v519_v56 = vmul.f32 %v503_v48, %v439_v29  ;;  %v504_v33 = vmul.f32 %v488_v59, %v1199_v49 }
 0x22a   :  { %v541_v57 = vmul.f32 0.7978846, %v525_v50  ;;  %v526_v17 = vadd.f32 %v510_v51, %v402_v16  ;;  %v517_v58 = vmul.f32 %v501_v13, %v1195_v38  ;;  %v502_v23 = vmul.f32 %v486_v22, %v1203_v31 }
 0x22b   :  { %842 = vtanh.f32 %v543_v44  ;;  %v544_v60 = vmul.f32 0.7978846, %v528_v54  ;;  %v535_v52 = vadd.f32 %v519_v56, %v439_v29  ;;  %v520_v0 = vmul.f32 %v504_v33, %v1199_v49 }
 0x22c   :  { %844 = vtanh.f32 %v541_v57  ;;  %v542_v18 = vmul.f32 0.7978846, %v526_v17  ;;  %v533_v61 = vadd.f32 %v517_v58, %v1195_v38  ;;  %v518_v28 = vmul.f32 %v502_v23, %v1203_v31 }
 0x22d   :  { %846 = vtanh.f32 %v544_v60  ;;  %v551_v36 = vmul.f32 0.7978846, %v535_v52  ;;  %v536_v4 = vadd.f32 %v520_v0, %v1199_v49  ;;  %v462_v53 = vmul.f32 0.5, %v402_v16 }
 0x22e   :  { %848 = vtanh.f32 %v542_v18  ;;  %v549_v37 = vmul.f32 0.7978846, %v533_v61  ;;  %v794_v1 = vpop.f32.mrb[4].mxu0  ;;  %v471_v20 = vmul.f32 0.5, %v439_v29  ;;  %v534_v55 = vadd.f32 %v518_v28, %v1203_v31 }
 0x22f   :  { %850 = vtanh.f32 %v551_v36  ;;  %v1213_v2 = vadd.f32 %v794_v1, %v1187_v32  ;;  %v414_v3 = vpop.f32.mrb[5].mxu0  ;;  %v552_v14 = vmul.f32 0.7978846, %v536_v4  ;;  %v469_v63 = vmul.f32 0.5, %v1195_v38 }
 0x230   :  { %852 = vtanh.f32 %v549_v37  ;;  %v1217_v5 = vadd.f32 %v1187_v32, %v414_v3  ;;  %v795_v7 = vpop.f32.mrb[6].mxu0  ;;  %v550_v21 = vmul.f32 0.7978846, %v534_v55  ;;  %v472_v28 = vmul.f32 0.5, %v1199_v49 }
 0x231   :  { %v483_v10 = vmul.f32 0.044715, %v1213_v2  ;;  %v1222_v11 = vadd.f32 %v795_v7, %v1187_v32  ;;  %v417_v12 = vpop.f32.mrb[7].mxu0  ;;  %854 = vtanh.f32 %v552_v14 }
 0x232   :  { %v481_v42 = vmul.f32 0.044715, %v1217_v5  ;;  %v1226_v62 = vadd.f32 %v1187_v32, %v417_v12  ;;  %v802_v15 = vpop.f32.mrb[4].mxu1  ;;  %856 = vtanh.f32 %v550_v21 }
 0x233   :  { %v499_v19 = vmul.f32 %v483_v10, %v1213_v2  ;;  %v484_v24 = vmul.f32 0.044715, %v1222_v11  ;;  %v446_v25 = vpop.f32.mrb[5].mxu1  ;;  %v1237_v39 = vadd.f32 %v802_v15, %v1187_v32 }
 0x234   :  { %v497_v16 = vmul.f32 %v481_v42, %v1217_v5  ;;  %v482_v30 = vmul.f32 0.044715, %v1226_v62  ;;  %v803_v34 = vpop.f32.mrb[6].mxu1  ;;  %v1242_v47 = vadd.f32 %v1187_v32, %v446_v25  ;;  %v470_v25 = vmul.f32 0.5, %v1203_v31 }
 0x235   :  { %v843_v35 = vpop.eup %842  ;;  %v515_v6 = vmul.f32 %v499_v19, %v1213_v2  ;;  %v500_v29 = vmul.f32 %v484_v24, %v1222_v11  ;;  %v449_v40 = vpop.f32.mrb[7].mxu1  ;;  %v491_v10 = vmul.f32 0.044715, %v1237_v39  ;;  %v1275_v15 = vadd.f32 %v803_v34, %v1187_v32 }
 0x236   :  { %v845_v41 = vpop.eup %844  ;;  %v575_v43 = vadd.f32 1.0, %v843_v35  ;;  %v513_v38 = vmul.f32 %v497_v16, %v1217_v5  ;;  %v498_v46 = vmul.f32 %v482_v30, %v1226_v62  ;;  %v489_v42 = vmul.f32 0.044715, %v1242_v47 }
 0x237   :  { %v847_v26 = vpop.eup %846  ;;  %v573_v9 = vadd.f32 1.0, %v845_v41  ;;  %v531_v48 = vadd.f32 %v515_v6, %v1213_v2  ;;  %v516_v50 = vmul.f32 %v500_v29, %v1222_v11  ;;  %v507_v49 = vmul.f32 %v491_v10, %v1237_v39 }
 0x238   :  { %v849_v51 = vpop.eup %848  ;;  %v591_v13 = vmul.f32 %v575_v43, %v463_v45  ;;  %v576_v44 = vadd.f32 1.0, %v847_v26  ;;  %v529_v54 = vadd.f32 %v513_v38, %v1217_v5  ;;  %v514_v56 = vmul.f32 %v498_v46, %v1226_v62 }
 0x239   :  { %v851_v57 = vpop.eup %850  ;;  %v589_v17 = vmul.f32 %v573_v9, %v461_v27  ;;  %v574_v58 = vadd.f32 1.0, %v849_v51  ;;  %v547_v59 = vmul.f32 0.7978846, %v531_v48  ;;  %v532_v60 = vadd.f32 %v516_v50, %v1222_v11 }
 0x23a   :  { %v853_v52 = vpop.eup %852  ;;  %v721_v18 = vpack.c.bf16 %v591_v13, %v591_v13  ;;  %v592_v61 = vmul.f32 %v576_v44, %v464_v8  ;;  %v583_v33 = vadd.f32 1.0, %v851_v57  ;;  %v545_v36 = vmul.f32 0.7978846, %v529_v54 }
 0x23b   :  { %v719_v22 = vpack.c.bf16 %v589_v17, %v589_v17  ;;  %v590_v37 = vmul.f32 %v574_v58, %v462_v53  ;;  %v581_v0 = vadd.f32 1.0, %v853_v52  ;;  %858 = vtanh.f32 %v547_v59  ;;  %v855_v7 = vpop.eup %854 }
 0x23c   :  { %672 = vst.msk [vmem:[%s1351_s5 + $0x8] sm:$0xf] %vm669_vm1, %v721_v18  ;;  %v722_v1 = vpack.c.bf16 %v592_v61, %v592_v61  ;;  %v599_v45 = vmul.f32 %v583_v33, %v471_v20  ;;  %860 = vtanh.f32 %v545_v36  ;;  %v548_v23 = vmul.f32 0.7978846, %v532_v60  ;;  %v857_v55 = vpop.eup %856 }
 0x23d   :  { %670 = vst.msk [vmem:[%s1351_s5] sm:$0xf] %vm669_vm1, %v719_v22  ;;  %v720_v3 = vpack.c.bf16 %v590_v37, %v590_v37  ;;  %v597_v27 = vmul.f32 %v581_v0, %v469_v63  ;;  %v530_v4 = vadd.f32 %v514_v56, %v1226_v62  ;;  %v584_v53 = vadd.f32 1.0, %v855_v7 }
 0x23e   :  { %673 = vst.msk [vmem:[%s1351_s5 + $0xc] sm:$0xf] %vm669_vm1, %v722_v1  ;;  %v729_v8 = vpack.c.bf16 %v599_v45, %v599_v45  ;;  %862 = vtanh.f32 %v548_v23  ;;  %v1278_v20 = vadd.f32 %v1187_v32, %v449_v40  ;;  %v505_v24 = vmul.f32 %v489_v42, %v1242_v47 }
 0x23f   :  { %671 = vst.msk [vmem:[%s1351_s5 + $0x4] sm:$0xf] %vm669_vm1, %v720_v3  ;;  %v727_v12 = vpack.c.bf16 %v597_v27, %v597_v27  ;;  %v546_v14 = vmul.f32 0.7978846, %v530_v4  ;;  %v600_v19 = vmul.f32 %v584_v53, %v472_v28  ;;  %v582_v63 = vadd.f32 1.0, %v857_v55 }
 0x240   :  { %680 = vst.msk [vmem:[%s1351_s5 + $0x28] sm:$0xf] %vm669_vm1, %v729_v8  ;;  %v523_v16 = vmul.f32 %v507_v49, %v1237_v39  ;;  %v492_v30 = vmul.f32 0.044715, %v1275_v15  ;;  %v521_v32 = vmul.f32 %v505_v24, %v1242_v47  ;;  %v490_v35 = vmul.f32 0.044715, %v1278_v20 }
 0x241   :  { %678 = vst.msk [vmem:[%s1351_s5 + $0x20] sm:$0xf] %vm669_vm1, %v727_v12  ;;  %864 = vtanh.f32 %v546_v14  ;;  %v730_v34 = vpack.c.bf16 %v600_v19, %v600_v19  ;;  %v598_v21 = vmul.f32 %v582_v63, %v470_v25  ;;  %v467_v31 = vmul.f32 0.5, %v1213_v2 }
 0x242   :  { %v539_v6 = vadd.f32 %v523_v16, %v1237_v39  ;;  %v508_v29 = vmul.f32 %v492_v30, %v1275_v15  ;;  %v537_v41 = vadd.f32 %v521_v32, %v1242_v47  ;;  %v506_v43 = vmul.f32 %v490_v35, %v1278_v20 }
 0x243   :  { %681 = vst.msk [vmem:[%s1351_s5 + $0x2c] sm:$0xf] %vm669_vm1, %v730_v34  ;;  %v728_v46 = vpack.c.bf16 %v598_v21, %v598_v21  ;;  %v465_v50 = vmul.f32 0.5, %v1217_v5  ;;  %v468_v56 = vmul.f32 0.5, %v1222_v11  ;;  %v466_v11 = vmul.f32 0.5, %v1226_v62 }
 0x244   :  { %v555_v9 = vmul.f32 0.7978846, %v539_v6  ;;  %v524_v48 = vmul.f32 %v508_v29, %v1275_v15  ;;  %v553_v13 = vmul.f32 0.7978846, %v537_v41  ;;  %v522_v44 = vmul.f32 %v506_v43, %v1278_v20 }
 0x245   :  { %v859_v40 = vpop.eup %858  ;;  %679 = vst.msk [vmem:[%s1351_s5 + $0x24] sm:$0xf] %vm669_vm1, %v728_v46  ;;  %v475_v45 = vmul.f32 0.5, %v1237_v39  ;;  %v473_v3 = vmul.f32 0.5, %v1242_v47  ;;  %v476_v12 = vmul.f32 0.5, %v1275_v15  ;;  %v474_v42 = vmul.f32 0.5, %v1278_v20 }
 0x246   :  { %v861_v38 = vpop.eup %860  ;;  %v579_v26 = vadd.f32 1.0, %v859_v40  ;;  %866 = vtanh.f32 %v555_v9  ;;  %v540_v57 = vadd.f32 %v524_v48, %v1275_v15  ;;  %v538_v5 = vadd.f32 %v522_v44, %v1278_v20 }
 0x247   :  { %v577_v51 = vadd.f32 1.0, %v861_v38  ;;  %868 = vtanh.f32 %v553_v13 }
 0x248   :  { %v863_v54 = vpop.eup %862  ;;  %v595_v2 = vmul.f32 %v579_v26, %v467_v31  ;;  %v556_v60 = vmul.f32 0.7978846, %v540_v57  ;;  %v554_v33 = vmul.f32 0.7978846, %v538_v5 }
 0x249   :  { %v593_v17 = vmul.f32 %v577_v51, %v465_v50  ;;  %v580_v58 = vadd.f32 1.0, %v863_v54 }
 0x24a   :  { %v725_v59 = vpack.c.bf16 %v595_v2, %v595_v2  ;;  %870 = vtanh.f32 %v556_v60 }
 0x24b   :  { %v865_v52 = vpop.eup %864  ;;  %v723_v18 = vpack.c.bf16 %v593_v17, %v593_v17  ;;  %v596_v61 = vmul.f32 %v580_v58, %v468_v56  ;;  %872 = vtanh.f32 %v554_v33 }
 0x24c   :  { %676 = vst.msk [vmem:[%s1351_s5 + $0x18] sm:$0xf] %vm669_vm1, %v725_v59  ;;  %v578_v36 = vadd.f32 1.0, %v865_v52 }
 0x24d   :  { %674 = vst.msk [vmem:[%s1351_s5 + $0x10] sm:$0xf] %vm669_vm1, %v723_v18  ;;  %v726_v22 = vpack.c.bf16 %v596_v61, %v596_v61 }
 0x24e   :  { %v594_v37 = vmul.f32 %v578_v36, %v466_v11 }
 0x24f   :  { %677 = vst.msk [vmem:[%s1351_s5 + $0x1c] sm:$0xf] %vm669_vm1, %v726_v22 }
 0x250   :  { %v724_v0 = vpack.c.bf16 %v594_v37, %v594_v37  ;;  %v867_v1 = vpop.eup %866 }
 0x251   :  { %v869_v62 = vpop.eup %868  ;;  %v587_v23 = vadd.f32 1.0, %v867_v1 }
 0x252   :  { %675 = vst.msk [vmem:[%s1351_s5 + $0x14] sm:$0xf] %vm669_vm1, %v724_v0  ;;  %v585_v27 = vadd.f32 1.0, %v869_v62 }
 0x253   :  { %v603_v4 = vmul.f32 %v587_v23, %v475_v45 }
 0x254   :  { %v871_v7 = vpop.eup %870  ;;  %v601_v8 = vmul.f32 %v585_v27, %v473_v3 }
 0x255   :  { %v873_v28 = vpop.eup %872  ;;  %v733_v10 = vpack.c.bf16 %v603_v4, %v603_v4  ;;  %v588_v53 = vadd.f32 1.0, %v871_v7 }
 0x256   :  { %v731_v14 = vpack.c.bf16 %v601_v8, %v601_v8  ;;  %v586_v49 = vadd.f32 1.0, %v873_v28 }
 0x257   :  { %684 = vst.msk [vmem:[%s1351_s5 + $0x38] sm:$0xf] %vm669_vm1, %v733_v10  ;;  %v604_v39 = vmul.f32 %v588_v53, %v476_v12 }
 0x258   :  { %682 = vst.msk [vmem:[%s1351_s5 + $0x30] sm:$0xf] %vm669_vm1, %v731_v14  ;;  %v602_v47 = vmul.f32 %v586_v49, %v474_v42 }
 0x259   :  { %v734_v55 = vpack.c.bf16 %v604_v39, %v604_v39 }
 0x25a   :  { %v732_v19 = vpack.c.bf16 %v602_v47, %v602_v47 }
 0x25b   :  { %685 = vst.msk [vmem:[%s1351_s5 + $0x3c] sm:$0xf] %vm669_vm1, %v734_v55 }
 0x25c   :  { %683 = vst.msk [vmem:[%s1351_s5 + $0x34] sm:$0xf] %vm669_vm1, %v732_v19 }

// kernel: encoder_forward.32
= control target key start
LH: loop header
LB: loop body
LE: loop exit
PB: predicated region body
PF: predicated region fallthrough
CT: control target
= control target key end

     0   :  { %vm71_vm0 = vcmask 523264   ;;  %vm155_vm1 = vcmask 519168   ;;  %s278_s1 = inlined_call_operand.vmem [shape: bf16[64,64], index: 1, kind: input, shape index: {}]   ;;  %s279_s0 = inlined_call_operand.vmem [shape: bf16[32,64], index: 0, kind: input, shape index: {}]   ;;  %s280_s3 = inlined_call_operand.vmem [shape: bf16[32,64], index: 3, kind: input, shape index: {}]   ;;  %s281_s2 = inlined_call_operand.vmem [shape: f32[1,64], index: 2, kind: input, shape index: {}]   ;;  %s282_s4 = inlined_call_operand.vmem [shape: bf16[32,64], index: 4, kind: output, shape index: {}]  }
   0x1   :  { %v208_v0 = vld [vmem:[%s278_s1] sm:$0xff]   ;;  %v209_v1 = vld [vmem:[%s278_s1 + $0x8] sm:$0xff]   ;;  %v210_v2 = vld [vmem:[%s278_s1 + $0x10] sm:$0xff]  }
   0x2   :  { %196 = vmatprep.subr.bf16.mxu0 %v208_v0  ;;  %v212_v3 = vld [vmem:[%s279_s0] sm:$0xff]   ;;  %v211_v4 = vld [vmem:[%s278_s1 + $0x18] sm:$0xff]   ;;  %v213_v5 = vld [vmem:[%s279_s0 + $0x8] sm:$0xff]  }
   0x3   :  { %197 = vmatpush3.bf16.msra.mxu0 %v208_v0  ;;  %204 = vmatprep.mubr.msk.bf16.mxu0 %vm71_vm0, %v212_v3  ;;  %v189_v6 = vld [vmem:[%s280_s3 + $0x8] sm:$0xff]   ;;  %v182_v7 = vld [vmem:[%s280_s3] sm:$0xff]  }
   0x4   :  { %198 = vmatprep.subr.bf16.mxu0 %v209_v1  ;;  %v164_v8 = vld [vmem:[%s281_s2] ss:$0 sm:$0xff]  ;;  %v187_v9 = vunpack.c.l.bf16 %v189_v6  ;;  %v183_v11 = vunpack.c.l.bf16 %v182_v7  ;;  %v188_v14 = vunpack.c.h.bf16 %v189_v6  ;;  %v184_v17 = vunpack.c.h.bf16 %v182_v7 }
   0x7   :  { %199 = vmatpush3.bf16.msra.mxu0 %v209_v1 }
   0x8   :  { %200 = vmatprep.subr.bf16.mxu0 %v210_v2 }
   0xb   :  { %201 = vmatpush3.bf16.msra.mxu0 %v210_v2 }
   0xc   :  { %202 = vmatprep.subr.bf16.mxu0 %v211_v4 }
   0xf   :  { %203 = vmatpush3.bf16.msra.mxu0 %v211_v4 }
  0x12   :  { %205 = vmatmul.mubr.msk.bf16.vlgmr.msra.gmra.mrb[0].mxu0 %vm71_vm0, %v213_v5 }
  0xe5   :  { %v206_v10 = vpop.f32.mrb[0].mxu0 }
  0xe6   :  { %v121_v12 = vadd.f32 %v206_v10, %v164_v8  ;;  %v112_v13 = vpop.f32.mrb[1].mxu0 }
  0xe7   :  { %v113_v15 = vadd.f32 %v164_v8, %v112_v13  ;;  %v207_v16 = vpop.f32.mrb[2].mxu0 }
  0xe8   :  { %v137_v18 = vadd.f32 %v187_v9, %v121_v12  ;;  %v124_v19 = vadd.f32 %v207_v16, %v164_v8  ;;  %v115_v20 = vpop.f32.mrb[3].mxu0 }
  0xe9   :  { %v135_v21 = vadd.f32 %v183_v11, %v113_v15  ;;  %v116_v22 = vadd.f32 %v164_v8, %v115_v20 }
  0xea   :  { %v179_v23 = vpack.c.bf16 %v137_v18, %v137_v18  ;;  %v138_v24 = vadd.f32 %v188_v14, %v124_v19 }
  0xeb   :  { %v177_v25 = vpack.c.bf16 %v135_v21, %v135_v21  ;;  %v136_v26 = vadd.f32 %v184_v17, %v116_v22 }
  0xec   :  { %158 = vst.msk [vmem:[%s282_s4 + $0x8] sm:$0xf] %vm155_vm1, %v179_v23  ;;  %v180_v27 = vpack.c.bf16 %v138_v24, %v138_v24 }
  0xed   :  { %156 = vst.msk [vmem:[%s282_s4] sm:$0xf] %vm155_vm1, %v177_v25  ;;  %v178_v28 = vpack.c.bf16 %v136_v26, %v136_v26 }
  0xee   :  { %159 = vst.msk [vmem:[%s282_s4 + $0xc] sm:$0xf] %vm155_vm1, %v180_v27 }
  0xef   :  { %157 = vst.msk [vmem:[%s282_s4 + $0x4] sm:$0xf] %vm155_vm1, %v178_v28 }

// kernel: encoder_forward.30
= control target key start
LH: loop header
LB: loop body
LE: loop exit
PB: predicated region body
PF: predicated region fallthrough
CT: control target
= control target key end

     0   :  { %vm210_vm0 = vcmask 261120   ;;  %vm315_vm1 = vcmask 523264   ;;  %vm407_vm2 = vcmask 519168   ;;  %s662_s1 = inlined_call_operand.vmem [shape: bf16[288,64], index: 1, kind: input, shape index: {}]   ;;  %s663_s0 = inlined_call_operand.vmem [shape: bf16[32,288], index: 0, kind: input, shape index: {}]   ;;  %s664_s2 = inlined_call_operand.vmem [shape: f32[1,64], index: 2, kind: input, shape index: {}]   ;;  %s665_s3 = inlined_call_operand.vmem [shape: f32[1,64], index: 3, kind: input, shape index: {}]   ;;  %s666_s4 = inlined_call_operand.vmem [shape: f32[1,64], index: 4, kind: input, shape index: {}]   ;;  %s667_s5 = inlined_call_operand.vmem [shape: bf16[32,64], index: 5, kind: output, shape index: {}]  }
   0x1   :  { %v493_v0 = vld [vmem:[%s662_s1 + $0x40] sm:$0xff]   ;;  %v495_v2 = vld [vmem:[%s662_s1 + $0x48] sm:$0xff]   ;;  %v497_v4 = vld [vmem:[%s662_s1 + $0x50] sm:$0xff]  }
   0x2   :  { %v494_v1 = vld [vmem:[%s662_s1] sm:$0xff]   ;;  %453 = vmatprep.subr.bf16.mxu0 %v493_v0  ;;  %v496_v3 = vld [vmem:[%s662_s1 + $0x8] sm:$0xff]   ;;  %v498_v5 = vld [vmem:[%s662_s1 + $0x10] sm:$0xff]  }
   0x3   :  { %454 = vmatpush3.bf16.msra.mxu0 %v494_v1  ;;  %v499_v6 = vld [vmem:[%s662_s1 + $0x58] sm:$0xff]   ;;  %v501_v8 = vld [vmem:[%s662_s1 + $0x60] sm:$0xff]   ;;  %v503_v11 = vld [vmem:[%s662_s1 + $0x68] sm:$0xff]  }
   0x4   :  { %455 = vmatprep.subr.bf16.mxu0 %v495_v2  ;;  %v500_v7 = vld [vmem:[%s662_s1 + $0x18] sm:$0xff]   ;;  %v502_v9 = vld [vmem:[%s662_s1 + $0x20] sm:$0xff]   ;;  %v504_v12 = vld [vmem:[%s662_s1 + $0x28] sm:$0xff]  }
   0x5   :  { %v508_v10 = vld [vmem:[%s662_s1 + $0x80] sm:$0xff]   ;;  %v505_v13 = vld [vmem:[%s662_s1 + $0x70] sm:$0xff]   ;;  %v513_v15 = vld [vmem:[%s662_s1 + $0x88] sm:$0xff]  }
   0x6   :  { %485 = vmatprep.subr.bf16.mxu1 %v508_v10  ;;  %v512_v14 = vld [vmem:[%s663_s0 + $0x4] ss:$12 sps:$4 sm:$0xff]   ;;  %v514_v16 = vld [vmem:[%s663_s0 + $0x8] ss:$12 sps:$4 sm:$0xff]   ;;  %v515_v17 = vld [vmem:[%s663_s0 + $0x20] ss:$12 sps:$4 sm:$0xff]  }
   0x7   :  { %456 = vmatpush3.bf16.msra.mxu0 %v496_v3  ;;  %486 = vmatpush3.bf16.msra.mxu1 %v508_v10  ;;  %v506_v18 = vld [vmem:[%s662_s1 + $0x30] sm:$0xff]   ;;  %v507_v19 = vld [vmem:[%s662_s1 + $0x78] sm:$0xff]   ;;  %v510_v21 = vld [vmem:[%s663_s0] ss:$12 sps:$4 sm:$0xff]  }
   0x8   :  { %457 = vmatprep.subr.bf16.mxu0 %v497_v4  ;;  %249 = vmatprep.mubr.bf16.mxu0 %v512_v14  ;;  %v509_v20 = vld [vmem:[%s662_s1 + $0x38] sm:$0xff]   ;;  %v416_v30 = vld [vmem:[%s664_s2] ss:$0 sm:$0xff] }
   0x9   :  { %487 = vmatprep.subr.bf16.mxu1 %v513_v15  ;;  %489 = vmatprep.mubr.msk.bf16.mxu1 %vm210_vm0, %v514_v16  ;;  %v516_v22 = vld [vmem:[%s663_s0 + $0x1c] ss:$12 sps:$4 sm:$0xff]   ;;  %v518_v23 = vld [vmem:[%s663_s0 + $0x18] ss:$12 sps:$4 sm:$0xff]  }
   0xb   :  { %458 = vmatpush3.bf16.msra.mxu0 %v498_v5  ;;  %488 = vmatpush3.bf16.msra.mxu1 %v513_v15 }
   0xc   :  { %459 = vmatprep.subr.bf16.mxu0 %v499_v6 }
   0xe   :  { %490 = vmatmul.mubr.msk.bf16.vlgmr.msra.gmra.mrb[0].mxu1 %vm210_vm0, %v515_v17 }
   0xf   :  { %460 = vmatpush3.bf16.msra.mxu0 %v500_v7 }
  0x10   :  { %461 = vmatprep.subr.bf16.mxu0 %v501_v8 }
  0x13   :  { %462 = vmatpush3.bf16.msra.mxu0 %v502_v9 }
  0x14   :  { %463 = vmatprep.subr.bf16.mxu0 %v503_v11 }
  0x17   :  { %464 = vmatpush3.bf16.msra.mxu0 %v504_v12 }
  0x18   :  { %465 = vmatprep.subr.bf16.mxu0 %v505_v13 }
  0x1b   :  { %466 = vmatpush3.bf16.msra.mxu0 %v506_v18 }
  0x1c   :  { %467 = vmatprep.subr.bf16.mxu0 %v507_v19 }
  0x1f   :  { %468 = vmatpush3.bf16.msra.mxu0 %v509_v20 }
  0x22   :  { %250 = vmatmul.mubr.bf16.vlgmr.msra.gmra.mrb[0].mxu0 %v510_v21  ;;  %v443_v21 = vld [vmem:[%s665_s3] ss:$0 sm:$0xff] }
  0x23   :  { %257 = vmatprep.mubr.bf16.mxu0 %v516_v22 }
  0x2a   :  { %258 = vmatmul.mubr.bf16.gmra.mrb[4].mxu0 %v518_v23 }
  0xe1   :  { %v491_v24 = vpop.f32.mrb[0].mxu1 }
  0xe2   :  { %v300_v25 = vpop.f32.mrb[1].mxu1 }
  0xe3   :  { %v492_v26 = vpop.f32.mrb[2].mxu1 }
  0xe4   :  { %v303_v27 = vpop.f32.mrb[3].mxu1 }
  0xf5   :  { %v469_v28 = vpop.f32.mrb[0].mxu0 }
  0xf6   :  { %v470_v29 = vpop.f32.mrb[1].mxu0 }
  0xf7   :  { %v471_v31 = vadd.f32 %v470_v29, %v469_v28  ;;  %v472_v32 = vpop.f32.mrb[2].mxu0 }
  0xf8   :  { %v473_v33 = vpop.f32.mrb[3].mxu0 }
  0xf9   :  { %v474_v34 = vadd.f32 %v473_v33, %v472_v32  ;;  %v252_v35 = vadd.f32 %v471_v31, %v416_v30 }
  0xfb   :  { %v301_v36 = vadd.f32 %v300_v25, %v252_v35  ;;  %v255_v37 = vadd.f32 %v474_v34, %v416_v30 }
  0xfd   :  { %v304_v38 = vadd.f32 %v303_v27, %v255_v37  ;;  %v475_v39 = vpop.f32.mrb[4].mxu0  ;;  %v316_v40 = vsel %vm315_vm1, %v301_v36, 0.0 }
  0xfe   :  { %v476_v41 = vpop.f32.mrb[5].mxu0  ;;  %317 = vadd.xlane.f32.xlu0 %v316_v40 }
  0xff   :  { %v477_v42 = vadd.f32 %v476_v41, %v475_v39  ;;  %v478_v43 = vpop.f32.mrb[6].mxu0  ;;  %v319_v47 = vsel %vm315_vm1, %v304_v38, 0.0 }
 0x100   :  { %v479_v44 = vpop.f32.mrb[7].mxu0 }
 0x101   :  { %v260_v45 = vadd.f32 %v477_v42, %v416_v30  ;;  %v480_v46 = vadd.f32 %v479_v44, %v478_v43 }
 0x102   :  { %320 = vadd.xlane.f32.xlu0 %v319_v47 }
 0x103   :  { %v263_v48 = vadd.f32 %v480_v46, %v416_v30  ;;  %v309_v49 = vadd.f32 %v491_v24, %v260_v45  ;;  %v444_v24 = vld [vmem:[%s666_s4] ss:$0 sm:$0xff] }
 0x105   :  { %v322_v50 = vsel %vm315_vm1, %v309_v49, 0.0  ;;  %v312_v51 = vadd.f32 %v492_v26, %v263_v48 }
 0x106   :  { %323 = vadd.xlane.f32.xlu1 %v322_v50 }
 0x107   :  { %v325_v52 = vsel %vm315_vm1, %v312_v51, 0.0 }
 0x10a   :  { %326 = vadd.xlane.f32.xlu1 %v325_v52 }
 0x18b   :  { %v318_v53 = vpop.xlane.xlu0 %317 }
 0x18c   :  { %v329_v54 = vmul.f32 0.015625, %v318_v53 }
 0x18e   :  { %v333_v55 = vsub.f32 %v301_v36, %v329_v54 }
 0x18f   :  { %v321_v56 = vpop.xlane.xlu0 %320 }
 0x190   :  { %v330_v57 = vmul.f32 0.015625, %v321_v56  ;;  %v337_v58 = vmul.f32 %v333_v55, %v333_v55 }
 0x192   :  { %v334_v59 = vsub.f32 %v304_v38, %v330_v57  ;;  %v341_v60 = vsel %vm315_vm1, %v337_v58, 0.0 }
 0x193   :  { %v324_v61 = vpop.xlane.xlu1 %323  ;;  %342 = vadd.xlane.f32.xlu0 %v341_v60 }
 0x194   :  { %v331_v62 = vmul.f32 0.015625, %v324_v61  ;;  %v338_v63 = vmul.f32 %v334_v59, %v334_v59 }
 0x196   :  { %v335_v0 = vsub.f32 %v309_v49, %v331_v62  ;;  %v344_v1 = vsel %vm315_vm1, %v338_v63, 0.0 }
 0x197   :  { %v327_v2 = vpop.xlane.xlu1 %326  ;;  %345 = vadd.xlane.f32.xlu1 %v344_v1 }
 0x198   :  { %v332_v3 = vmul.f32 0.015625, %v327_v2  ;;  %v339_v4 = vmul.f32 %v335_v0, %v335_v0 }
 0x19a   :  { %v336_v5 = vsub.f32 %v312_v51, %v332_v3  ;;  %v347_v6 = vsel %vm315_vm1, %v339_v4, 0.0 }
 0x19b   :  { %348 = vadd.xlane.f32.xlu0 %v347_v6 }
 0x19c   :  { %v340_v7 = vmul.f32 %v336_v5, %v336_v5 }
 0x19e   :  { %v350_v8 = vsel %vm315_vm1, %v340_v7, 0.0 }
 0x19f   :  { %351 = vadd.xlane.f32.xlu1 %v350_v8 }
 0x220   :  { %v343_v9 = vpop.xlane.xlu0 %342 }
 0x221   :  { %v353_v10 = vmul.f32 0.015625, %v343_v9 }
 0x223   :  { %v357_v11 = vadd.f32 1e-06, %v353_v10 }
 0x224   :  { %v346_v12 = vpop.xlane.xlu1 %345 }
 0x225   :  { %519 = vrsqrt.f32 %v357_v11  ;;  %v354_v13 = vmul.f32 0.015625, %v346_v12 }
 0x227   :  { %v358_v14 = vadd.f32 1e-06, %v354_v13 }
 0x228   :  { %v349_v15 = vpop.xlane.xlu0 %348 }
 0x229   :  { %521 = vrsqrt.f32 %v358_v14  ;;  %v355_v16 = vmul.f32 0.015625, %v349_v15 }
 0x22b   :  { %v359_v17 = vadd.f32 1e-06, %v355_v16 }
 0x22c   :  { %v352_v18 = vpop.xlane.xlu1 %351 }
 0x22d   :  { %523 = vrsqrt.f32 %v359_v17  ;;  %v356_v19 = vmul.f32 0.015625, %v352_v18 }
 0x22f   :  { %v520_v20 = vpop.eup %519  ;;  %v360_v22 = vadd.f32 1e-06, %v356_v19 }
 0x230   :  { %v365_v23 = vmul.f32 %v520_v20, %v333_v55 }
 0x231   :  { %525 = vrsqrt.f32 %v360_v22 }
 0x232   :  { %v376_v25 = vmul.f32 %v443_v21, %v365_v23 }
 0x233   :  { %v522_v26 = vpop.eup %521 }
 0x234   :  { %v387_v27 = vadd.f32 %v444_v24, %v376_v25  ;;  %v366_v28 = vmul.f32 %v522_v26, %v334_v59 }
 0x236   :  { %v449_v29 = vpack.c.bf16 %v387_v27, %v387_v27  ;;  %v377_v30 = vmul.f32 %v443_v21, %v366_v28 }
 0x237   :  { %v524_v31 = vpop.eup %523 }
 0x238   :  { %408 = vst.msk [vmem:[%s667_s5] sm:$0xf] %vm407_vm2, %v449_v29  ;;  %v388_v32 = vadd.f32 %v444_v24, %v377_v30  ;;  %v367_v33 = vmul.f32 %v524_v31, %v335_v0 }
 0x23a   :  { %v450_v34 = vpack.c.bf16 %v388_v32, %v388_v32  ;;  %v378_v35 = vmul.f32 %v443_v21, %v367_v33 }
 0x23b   :  { %v526_v36 = vpop.eup %525 }
 0x23c   :  { %409 = vst.msk [vmem:[%s667_s5 + $0x4] sm:$0xf] %vm407_vm2, %v450_v34  ;;  %v389_v37 = vadd.f32 %v444_v24, %v378_v35  ;;  %v368_v38 = vmul.f32 %v526_v36, %v336_v5 }
 0x23e   :  { %v451_v39 = vpack.c.bf16 %v389_v37, %v389_v37  ;;  %v379_v40 = vmul.f32 %v443_v21, %v368_v38 }
 0x240   :  { %410 = vst.msk [vmem:[%s667_s5 + $0x8] sm:$0xf] %vm407_vm2, %v451_v39  ;;  %v390_v41 = vadd.f32 %v444_v24, %v379_v40 }
 0x242   :  { %v452_v42 = vpack.c.bf16 %v390_v41, %v390_v41 }
 0x244   :  { %411 = vst.msk [vmem:[%s667_s5 + $0xc] sm:$0xf] %vm407_vm2, %v452_v42 }

// kernel: encoder_forward.31
= control target key start
LH: loop header
LB: loop body
LE: loop exit
PB: predicated region body
PF: predicated region fallthrough
CT: control target
= control target key end

     0   :  { %vm29_vm0 = vcmask 523264   ;;  %vm253_vm1 = vcmask 519168   ;;  %s405_s0 = inlined_call_operand.vmem [shape: bf16[32,64], index: 0, kind: input, shape index: {}]   ;;  %s406_s3 = inlined_call_operand.vmem [shape: bf16[64,64], index: 3, kind: input, shape index: {}]   ;;  %s407_s1 = inlined_call_operand.vmem [shape: f32[1,64], index: 1, kind: input, shape index: {}]   ;;  %s408_s2 = inlined_call_operand.vmem [shape: f32[1,64], index: 2, kind: input, shape index: {}]   ;;  %s409_s4 = inlined_call_operand.vmem [shape: f32[1,64], index: 4, kind: input, shape index: {}]   ;;  %s410_s5 = inlined_call_operand.vmem [shape: bf16[32,64], index: 5, kind: output, shape index: {}]  }
   0x1   :  { %v280_v0 = vld [vmem:[%s405_s0] sm:$0xff]   ;;  %v287_v1 = vld [vmem:[%s405_s0 + $0x8] sm:$0xff]   ;;  %v308_v32 = vld [vmem:[%s406_s3 + $0x10] sm:$0xff]  }
   0x2   :  { %v281_v2 = vunpack.c.l.bf16 %v280_v0  ;;  %v285_v3 = vunpack.c.l.bf16 %v287_v1  ;;  %v282_v4 = vunpack.c.h.bf16 %v280_v0  ;;  %v286_v5 = vunpack.c.h.bf16 %v287_v1  ;;  %v306_v30 = vld [vmem:[%s406_s3] sm:$0xff]   ;;  %v307_v31 = vld [vmem:[%s406_s3 + $0x8] sm:$0xff]   ;;  %v309_v33 = vld [vmem:[%s406_s3 + $0x18] sm:$0xff]  }
   0x3   :  { %294 = vmatprep.subr.bf16.mxu0 %v306_v30  ;;  %v262_v48 = vld [vmem:[%s407_s1] ss:$0 sm:$0xff] }
   0x4   :  { %v30_v6 = vsel %vm29_vm0, %v281_v2, 0.0  ;;  %v36_v7 = vsel %vm29_vm0, %v285_v3, 0.0  ;;  %v33_v8 = vsel %vm29_vm0, %v282_v4, 0.0  ;;  %v39_v9 = vsel %vm29_vm0, %v286_v5, 0.0  ;;  %295 = vmatpush3.bf16.msra.mxu0 %v306_v30  ;;  %v263_v54 = vld [vmem:[%s408_s2] ss:$0 sm:$0xff] }
   0x5   :  { %31 = vadd.xlane.f32.xlu0 %v30_v6  ;;  %37 = vadd.xlane.f32.xlu1 %v36_v7 }
   0x6   :  { %296 = vmatprep.subr.bf16.mxu0 %v307_v31 }
   0x8   :  { %297 = vmatpush3.bf16.msra.mxu0 %v307_v31 }
   0x9   :  { %34 = vadd.xlane.f32.xlu0 %v33_v8  ;;  %40 = vadd.xlane.f32.xlu1 %v39_v9 }
   0xa   :  { %298 = vmatprep.subr.bf16.mxu0 %v308_v32 }
   0xc   :  { %299 = vmatpush3.bf16.msra.mxu0 %v308_v32 }
   0xd   :  { %300 = vmatprep.subr.bf16.mxu0 %v309_v33 }
  0x10   :  { %301 = vmatpush3.bf16.msra.mxu0 %v309_v33 }
  0x92   :  { %v32_v10 = vpop.xlane.xlu0 %31  ;;  %v38_v11 = vpop.xlane.xlu1 %37 }
  0x93   :  { %v43_v12 = vmul.f32 0.015625, %v32_v10  ;;  %v45_v13 = vmul.f32 0.015625, %v38_v11 }
  0x95   :  { %v47_v14 = vsub.f32 %v281_v2, %v43_v12  ;;  %v49_v15 = vsub.f32 %v285_v3, %v45_v13  ;;  %v264_v2 = vld [vmem:[%s409_s4] ss:$0 sm:$0xff] }
  0x96   :  { %v35_v16 = vpop.xlane.xlu0 %34  ;;  %v41_v17 = vpop.xlane.xlu1 %40 }
  0x97   :  { %v44_v18 = vmul.f32 0.015625, %v35_v16  ;;  %v46_v19 = vmul.f32 0.015625, %v41_v17  ;;  %v51_v20 = vmul.f32 %v47_v14, %v47_v14  ;;  %v53_v21 = vmul.f32 %v49_v15, %v49_v15 }
  0x99   :  { %v48_v22 = vsub.f32 %v282_v4, %v44_v18  ;;  %v50_v23 = vsub.f32 %v286_v5, %v46_v19  ;;  %v55_v24 = vsel %vm29_vm0, %v51_v20, 0.0  ;;  %v61_v25 = vsel %vm29_vm0, %v53_v21, 0.0 }
  0x9a   :  { %56 = vadd.xlane.f32.xlu0 %v55_v24 }
  0x9b   :  { %v52_v26 = vmul.f32 %v48_v22, %v48_v22  ;;  %v54_v27 = vmul.f32 %v50_v23, %v50_v23 }
  0x9d   :  { %v58_v28 = vsel %vm29_vm0, %v52_v26, 0.0  ;;  %v64_v29 = vsel %vm29_vm0, %v54_v27, 0.0 }
  0x9e   :  { %62 = vadd.xlane.f32.xlu0 %v61_v25  ;;  %59 = vadd.xlane.f32.xlu1 %v58_v28 }
  0xa2   :  { %65 = vadd.xlane.f32.xlu1 %v64_v29 }
 0x127   :  { %v57_v34 = vpop.xlane.xlu0 %56 }
 0x128   :  { %v67_v35 = vmul.f32 0.015625, %v57_v34 }
 0x12a   :  { %v71_v36 = vadd.f32 1e-06, %v67_v35 }
 0x12b   :  { %v60_v37 = vpop.xlane.xlu1 %59  ;;  %v63_v38 = vpop.xlane.xlu0 %62 }
 0x12c   :  { %310 = vrsqrt.f32 %v71_v36  ;;  %v68_v39 = vmul.f32 0.015625, %v60_v37  ;;  %v69_v40 = vmul.f32 0.015625, %v63_v38 }
 0x12e   :  { %v72_v41 = vadd.f32 1e-06, %v68_v39  ;;  %v73_v42 = vadd.f32 1e-06, %v69_v40 }
 0x12f   :  { %v66_v43 = vpop.xlane.xlu1 %65 }
 0x130   :  { %312 = vrsqrt.f32 %v72_v41  ;;  %v70_v44 = vmul.f32 0.015625, %v66_v43 }
 0x131   :  { %314 = vrsqrt.f32 %v73_v42 }
 0x132   :  { %v74_v45 = vadd.f32 1e-06, %v70_v44 }
 0x134   :  { %316 = vrsqrt.f32 %v74_v45 }
 0x136   :  { %v311_v46 = vpop.eup %310 }
 0x137   :  { %v79_v47 = vmul.f32 %v311_v46, %v47_v14 }
 0x139   :  { %v90_v52 = vmul.f32 %v262_v48, %v79_v47 }
 0x13a   :  { %v313_v49 = vpop.eup %312 }
 0x13b   :  { %v315_v50 = vpop.eup %314  ;;  %v80_v51 = vmul.f32 %v313_v49, %v48_v22  ;;  %v101_v58 = vadd.f32 %v263_v54, %v90_v52 }
 0x13c   :  { %v81_v53 = vmul.f32 %v315_v50, %v49_v15 }
 0x13d   :  { %v91_v55 = vmul.f32 %v262_v48, %v80_v51 }
 0x13e   :  { %v317_v56 = vpop.eup %316  ;;  %v92_v60 = vmul.f32 %v262_v48, %v81_v53 }
 0x13f   :  { %v82_v57 = vmul.f32 %v317_v56, %v50_v23  ;;  %v102_v59 = vadd.f32 %v263_v54, %v91_v55 }
 0x140   :  { %v103_v63 = vadd.f32 %v263_v54, %v92_v60 }
 0x141   :  { %v105_v61 = vpack.c.bf16 %v102_v59, %v101_v58  ;;  %v93_v62 = vmul.f32 %v262_v48, %v82_v57 }
 0x143   :  { %302 = vmatprep.mubr.msk.bf16.mxu0 %vm29_vm0, %v105_v61  ;;  %v104_v0 = vadd.f32 %v263_v54, %v93_v62 }
 0x145   :  { %v106_v1 = vpack.c.bf16 %v104_v0, %v103_v63 }
 0x147   :  { %303 = vmatmul.mubr.msk.bf16.vlgmr.msra.gmra.mrb[0].mxu0 %vm29_vm0, %v106_v1 }
 0x21a   :  { %v304_v3 = vpop.f32.mrb[0].mxu0 }
 0x21b   :  { %v195_v4 = vadd.f32 %v304_v3, %v264_v2  ;;  %v186_v5 = vpop.f32.mrb[1].mxu0 }
 0x21c   :  { %v187_v6 = vadd.f32 %v264_v2, %v186_v5  ;;  %v305_v7 = vpop.f32.mrb[2].mxu0 }
 0x21d   :  { %v207_v8 = vmul.f32 0.044715, %v195_v4  ;;  %v198_v9 = vadd.f32 %v305_v7, %v264_v2  ;;  %v189_v10 = vpop.f32.mrb[3].mxu0  ;;  %v203_v33 = vmul.f32 0.5, %v195_v4 }
 0x21e   :  { %v205_v11 = vmul.f32 0.044715, %v187_v6  ;;  %v190_v12 = vadd.f32 %v264_v2, %v189_v10  ;;  %v201_v36 = vmul.f32 0.5, %v187_v6 }
 0x21f   :  { %v211_v13 = vmul.f32 %v207_v8, %v195_v4  ;;  %v208_v14 = vmul.f32 0.044715, %v198_v9  ;;  %v204_v40 = vmul.f32 0.5, %v198_v9 }
 0x220   :  { %v209_v15 = vmul.f32 %v205_v11, %v187_v6  ;;  %v206_v16 = vmul.f32 0.044715, %v190_v12  ;;  %v202_v43 = vmul.f32 0.5, %v190_v12 }
 0x221   :  { %v215_v17 = vmul.f32 %v211_v13, %v195_v4  ;;  %v212_v18 = vmul.f32 %v208_v14, %v198_v9 }
 0x222   :  { %v213_v19 = vmul.f32 %v209_v15, %v187_v6  ;;  %v210_v20 = vmul.f32 %v206_v16, %v190_v12 }
 0x223   :  { %v219_v21 = vadd.f32 %v215_v17, %v195_v4  ;;  %v216_v22 = vmul.f32 %v212_v18, %v198_v9 }
 0x224   :  { %v217_v23 = vadd.f32 %v213_v19, %v187_v6  ;;  %v214_v24 = vmul.f32 %v210_v20, %v190_v12 }
 0x225   :  { %v223_v25 = vmul.f32 0.7978846, %v219_v21  ;;  %v220_v26 = vadd.f32 %v216_v22, %v198_v9 }
 0x226   :  { %v221_v27 = vmul.f32 0.7978846, %v217_v23  ;;  %v218_v28 = vadd.f32 %v214_v24, %v190_v12 }
 0x227   :  { %318 = vtanh.f32 %v223_v25  ;;  %v224_v29 = vmul.f32 0.7978846, %v220_v26 }
 0x228   :  { %320 = vtanh.f32 %v221_v27  ;;  %v222_v30 = vmul.f32 0.7978846, %v218_v28 }
 0x229   :  { %322 = vtanh.f32 %v224_v29 }
 0x22a   :  { %324 = vtanh.f32 %v222_v30 }
 0x231   :  { %v319_v31 = vpop.eup %318 }
 0x232   :  { %v321_v32 = vpop.eup %320  ;;  %v231_v34 = vadd.f32 1.0, %v319_v31 }
 0x233   :  { %v323_v35 = vpop.eup %322  ;;  %v229_v37 = vadd.f32 1.0, %v321_v32 }
 0x234   :  { %v325_v38 = vpop.eup %324  ;;  %v235_v39 = vmul.f32 %v231_v34, %v203_v33  ;;  %v232_v41 = vadd.f32 1.0, %v323_v35 }
 0x235   :  { %v233_v42 = vmul.f32 %v229_v37, %v201_v36  ;;  %v230_v44 = vadd.f32 1.0, %v325_v38 }
 0x236   :  { %v277_v45 = vpack.c.bf16 %v235_v39, %v235_v39  ;;  %v236_v46 = vmul.f32 %v232_v41, %v204_v40 }
 0x237   :  { %v275_v47 = vpack.c.bf16 %v233_v42, %v233_v42  ;;  %v234_v48 = vmul.f32 %v230_v44, %v202_v43 }
 0x238   :  { %256 = vst.msk [vmem:[%s410_s5 + $0x8] sm:$0xf] %vm253_vm1, %v277_v45  ;;  %v278_v49 = vpack.c.bf16 %v236_v46, %v236_v46 }
 0x239   :  { %254 = vst.msk [vmem:[%s410_s5] sm:$0xf] %vm253_vm1, %v275_v47  ;;  %v276_v50 = vpack.c.bf16 %v234_v48, %v234_v48 }
 0x23a   :  { %257 = vst.msk [vmem:[%s410_s5 + $0xc] sm:$0xf] %vm253_vm1, %v278_v49 }
 0x23b   :  { %255 = vst.msk [vmem:[%s410_s5 + $0x4] sm:$0xf] %vm253_vm1, %v276_v50 }

// kernel: encoder_forward.35
= control target key start
LH: loop header
LB: loop body
LE: loop exit
PB: predicated region body
PF: predicated region fallthrough
CT: control target
= control target key end

     0   :  { %vm22_vm0 = vcmask 523264   ;;  %vm114_vm1 = vcmask 519168   ;;  %s206_s0 = inlined_call_operand.vmem [shape: bf16[32,64], index: 0, kind: input, shape index: {}]   ;;  %s207_s1 = inlined_call_operand.vmem [shape: f32[1,64], index: 1, kind: input, shape index: {}]   ;;  %s208_s2 = inlined_call_operand.vmem [shape: f32[1,64], index: 2, kind: input, shape index: {}]   ;;  %s209_s3 = inlined_call_operand.vmem [shape: bf16[32,64], index: 3, kind: output, shape index: {}]  }
   0x1   :  { %v134_v0 = vld [vmem:[%s206_s0] sm:$0xff]   ;;  %v141_v1 = vld [vmem:[%s206_s0 + $0x8] sm:$0xff]  }
   0x2   :  { %v135_v2 = vunpack.c.l.bf16 %v134_v0  ;;  %v139_v3 = vunpack.c.l.bf16 %v141_v1  ;;  %v136_v4 = vunpack.c.h.bf16 %v134_v0  ;;  %v140_v5 = vunpack.c.h.bf16 %v141_v1  ;;  %v123_v43 = vld [vmem:[%s207_s1] ss:$0 sm:$0xff] }
   0x3   :  { %v124_v45 = vld [vmem:[%s208_s2] ss:$0 sm:$0xff] }
   0x4   :  { %v23_v6 = vsel %vm22_vm0, %v135_v2, 0.0  ;;  %v29_v7 = vsel %vm22_vm0, %v139_v3, 0.0  ;;  %v26_v8 = vsel %vm22_vm0, %v136_v4, 0.0  ;;  %v32_v9 = vsel %vm22_vm0, %v140_v5, 0.0 }
   0x5   :  { %24 = vadd.xlane.f32.xlu0 %v23_v6  ;;  %30 = vadd.xlane.f32.xlu1 %v29_v7 }
   0x9   :  { %27 = vadd.xlane.f32.xlu0 %v26_v8  ;;  %33 = vadd.xlane.f32.xlu1 %v32_v9 }
  0x92   :  { %v25_v10 = vpop.xlane.xlu0 %24  ;;  %v31_v11 = vpop.xlane.xlu1 %30 }
  0x93   :  { %v36_v12 = vmul.f32 0.015625, %v25_v10  ;;  %v38_v13 = vmul.f32 0.015625, %v31_v11 }
  0x95   :  { %v40_v14 = vsub.f32 %v135_v2, %v36_v12  ;;  %v42_v15 = vsub.f32 %v139_v3, %v38_v13 }
  0x96   :  { %v28_v16 = vpop.xlane.xlu0 %27  ;;  %v34_v17 = vpop.xlane.xlu1 %33 }
  0x97   :  { %v37_v18 = vmul.f32 0.015625, %v28_v16  ;;  %v39_v19 = vmul.f32 0.015625, %v34_v17  ;;  %v44_v20 = vmul.f32 %v40_v14, %v40_v14  ;;  %v46_v21 = vmul.f32 %v42_v15, %v42_v15 }
  0x99   :  { %v41_v22 = vsub.f32 %v136_v4, %v37_v18  ;;  %v43_v23 = vsub.f32 %v140_v5, %v39_v19  ;;  %v48_v24 = vsel %vm22_vm0, %v44_v20, 0.0  ;;  %v54_v25 = vsel %vm22_vm0, %v46_v21, 0.0 }
  0x9a   :  { %49 = vadd.xlane.f32.xlu0 %v48_v24 }
  0x9b   :  { %v45_v26 = vmul.f32 %v41_v22, %v41_v22  ;;  %v47_v27 = vmul.f32 %v43_v23, %v43_v23 }
  0x9d   :  { %v51_v28 = vsel %vm22_vm0, %v45_v26, 0.0  ;;  %v57_v29 = vsel %vm22_vm0, %v47_v27, 0.0 }
  0x9e   :  { %55 = vadd.xlane.f32.xlu0 %v54_v25  ;;  %52 = vadd.xlane.f32.xlu1 %v51_v28 }
  0xa2   :  { %58 = vadd.xlane.f32.xlu1 %v57_v29 }
 0x127   :  { %v50_v30 = vpop.xlane.xlu0 %49 }
 0x128   :  { %v60_v31 = vmul.f32 0.015625, %v50_v30 }
 0x12a   :  { %v64_v32 = vadd.f32 1e-06, %v60_v31 }
 0x12b   :  { %v53_v33 = vpop.xlane.xlu1 %52  ;;  %v56_v34 = vpop.xlane.xlu0 %55 }
 0x12c   :  { %142 = vrsqrt.f32 %v64_v32  ;;  %v61_v35 = vmul.f32 0.015625, %v53_v33  ;;  %v62_v36 = vmul.f32 0.015625, %v56_v34 }
 0x12e   :  { %v65_v37 = vadd.f32 1e-06, %v61_v35  ;;  %v66_v38 = vadd.f32 1e-06, %v62_v36 }
 0x12f   :  { %v59_v39 = vpop.xlane.xlu1 %58 }
 0x130   :  { %144 = vrsqrt.f32 %v65_v37  ;;  %v63_v40 = vmul.f32 0.015625, %v59_v39 }
 0x131   :  { %146 = vrsqrt.f32 %v66_v38 }
 0x132   :  { %v67_v41 = vadd.f32 1e-06, %v63_v40 }
 0x134   :  { %148 = vrsqrt.f32 %v67_v41 }
 0x136   :  { %v143_v42 = vpop.eup %142 }
 0x137   :  { %v72_v44 = vmul.f32 %v143_v42, %v40_v14 }
 0x139   :  { %v83_v46 = vmul.f32 %v123_v43, %v72_v44 }
 0x13a   :  { %v145_v47 = vpop.eup %144 }
 0x13b   :  { %v147_v48 = vpop.eup %146  ;;  %v94_v49 = vadd.f32 %v124_v45, %v83_v46  ;;  %v73_v50 = vmul.f32 %v145_v47, %v41_v22 }
 0x13c   :  { %v74_v51 = vmul.f32 %v147_v48, %v42_v15 }
 0x13d   :  { %v129_v52 = vpack.c.bf16 %v94_v49, %v94_v49  ;;  %v84_v53 = vmul.f32 %v123_v43, %v73_v50 }
 0x13e   :  { %v149_v54 = vpop.eup %148  ;;  %v85_v55 = vmul.f32 %v123_v43, %v74_v51 }
 0x13f   :  { %115 = vst.msk [vmem:[%s209_s3] sm:$0xf] %vm114_vm1, %v129_v52  ;;  %v95_v56 = vadd.f32 %v124_v45, %v84_v53  ;;  %v75_v57 = vmul.f32 %v149_v54, %v43_v23 }
 0x140   :  { %v96_v58 = vadd.f32 %v124_v45, %v85_v55 }
 0x141   :  { %v130_v59 = vpack.c.bf16 %v95_v56, %v95_v56  ;;  %v86_v60 = vmul.f32 %v123_v43, %v75_v57 }
 0x142   :  { %v131_v61 = vpack.c.bf16 %v96_v58, %v96_v58 }
 0x143   :  { %116 = vst.msk [vmem:[%s209_s3 + $0x4] sm:$0xf] %vm114_vm1, %v130_v59  ;;  %v97_v62 = vadd.f32 %v124_v45, %v86_v60 }
 0x144   :  { %117 = vst.msk [vmem:[%s209_s3 + $0x8] sm:$0xf] %vm114_vm1, %v131_v61 }
 0x145   :  { %v132_v63 = vpack.c.bf16 %v97_v62, %v97_v62 }
 0x147   :  { %118 = vst.msk [vmem:[%s209_s3 + $0xc] sm:$0xf] %vm114_vm1, %v132_v63 }

// kernel: encoder_forward.38
= control target key start
LH: loop header
LB: loop body
LE: loop exit
PB: predicated region body
PF: predicated region fallthrough
CT: control target
= control target key end

     0   :  { %v187_v0 = vmov 0.0   ;;  %vm188_vm0 = vmmov 0   ;;  %s250_s1 = inlined_call_operand.vmem [shape: bf16[128,128], index: 1, kind: input, shape index: {}]   ;;  %s251_s0 = inlined_call_operand.vmem [shape: bf16[8,128], index: 0, kind: input, shape index: {}]   ;;  %s252_s3 = inlined_call_operand.vmem [shape: bf16[8,128], index: 3, kind: input, shape index: {}]   ;;  %s253_s2 = inlined_call_operand.vmem [shape: f32[1,128], index: 2, kind: input, shape index: {}]   ;;  %s254_s4 = inlined_call_operand.vmem [shape: bf16[8,128], index: 4, kind: output, shape index: {}]  }
   0x1   :  { %157 = vmatprep.subr.bf16.mxu0 %v187_v0  ;;  %v179_v1 = vld [vmem:[%s250_s1] sm:$0xff]   ;;  %173 = vmatprep.mubr.msk.bf16.mxu0 %vm188_vm0, %v187_v0  ;;  %v180_v2 = vld [vmem:[%s250_s1 + $0x8] sm:$0xff]   ;;  %v181_v3 = vld [vmem:[%s250_s1 + $0x10] sm:$0xff]  }
   0x2   :  { %158 = vmatpush3.bf16.msra.mxu0 %v179_v1  ;;  %v182_v4 = vld [vmem:[%s250_s1 + $0x18] sm:$0xff]   ;;  %v183_v5 = vld [vmem:[%s250_s1 + $0x20] sm:$0xff]   ;;  %v184_v6 = vld [vmem:[%s250_s1 + $0x28] sm:$0xff]  }
   0x3   :  { %159 = vmatprep.subr.bf16.mxu0 %v187_v0  ;;  %v185_v7 = vld [vmem:[%s250_s1 + $0x30] sm:$0xff]   ;;  %v186_v8 = vld [vmem:[%s250_s1 + $0x38] sm:$0xff]   ;;  %v18_v9 = vld [vmem:[%s251_s0] sm:$0xf] }
   0x4   :  { %v130_v10 = vld [vmem:[%s252_s3] sm:$0xf] }
   0x5   :  { %v139_v11 = vld [vmem:[%s253_s2] ss:$0 sm:$0xff]  ;;  %v131_v12 = vunpack.c.l.bf16 %v130_v10 }
   0x6   :  { %160 = vmatpush3.bf16.msra.mxu0 %v180_v2 }
   0x7   :  { %161 = vmatprep.subr.bf16.mxu0 %v187_v0 }
   0xa   :  { %162 = vmatpush3.bf16.msra.mxu0 %v181_v3 }
   0xb   :  { %163 = vmatprep.subr.bf16.mxu0 %v187_v0 }
   0xe   :  { %164 = vmatpush3.bf16.msra.mxu0 %v182_v4 }
   0xf   :  { %165 = vmatprep.subr.bf16.mxu0 %v187_v0 }
  0x12   :  { %166 = vmatpush3.bf16.msra.mxu0 %v183_v5 }
  0x13   :  { %167 = vmatprep.subr.bf16.mxu0 %v187_v0 }
  0x16   :  { %168 = vmatpush3.bf16.msra.mxu0 %v184_v6 }
  0x17   :  { %169 = vmatprep.subr.bf16.mxu0 %v187_v0 }
  0x1a   :  { %170 = vmatpush3.bf16.msra.mxu0 %v185_v7 }
  0x1b   :  { %171 = vmatprep.subr.bf16.mxu0 %v187_v0 }
  0x1e   :  { %172 = vmatpush3.bf16.msra.mxu0 %v186_v8 }
  0x21   :  { %174 = vmatmul.mubr.bf16.vlgmr.msra.gmra.mrb[0].mxu0 %v18_v9 }
  0xf4   :  { %v124_v13 = vpop.f32.mrb[0].mxu0 }
  0xf5   :  { %v125_v14 = vadd.f32 %v139_v11, %v124_v13  ;;  %v175_v15 = vpop.f32.mrb[1].mxu0 }
  0xf6   :  { %v127_v16 = vpop.f32.mrb[2].mxu0 }
  0xf7   :  { %v132_v17 = vadd.f32 %v131_v12, %v125_v14  ;;  %v176_v18 = vpop.f32.mrb[3].mxu0 }
  0xf9   :  { %v133_v19 = vpack.c.bf16 %v132_v17, %v132_v17 }
  0xfb   :  { %134 = vst [vmem:[%s254_s4] sm:$0xf] %v133_v19 }

// kernel: encoder_forward.37
= control target key start
LH: loop header
LB: loop body
LE: loop exit
PB: predicated region body
PF: predicated region fallthrough
CT: control target
= control target key end

     0   :  { %v232_v2 = vmov 0.0   ;;  %vm233_vm0 = vmmov 0   ;;  %s303_s0 = inlined_call_operand.vmem [shape: bf16[8,128], index: 0, kind: input, shape index: {}]   ;;  %s304_s3 = inlined_call_operand.vmem [shape: bf16[128,128], index: 3, kind: input, shape index: {}]   ;;  %s305_s1 = inlined_call_operand.vmem [shape: f32[1,128], index: 1, kind: input, shape index: {}]   ;;  %s306_s2 = inlined_call_operand.vmem [shape: f32[1,128], index: 2, kind: input, shape index: {}]   ;;  %s307_s4 = inlined_call_operand.vmem [shape: f32[1,128], index: 4, kind: input, shape index: {}]   ;;  %s308_s5 = inlined_call_operand.vmem [shape: bf16[8,128], index: 5, kind: output, shape index: {}]  }
   0x1   :  { %v21_v0 = vld [vmem:[%s303_s0] sm:$0xf]  ;;  %198 = vmatprep.subr.bf16.mxu0 %v232_v2  ;;  %v221_v4 = vld [vmem:[%s304_s3 + $0x8] sm:$0xff]   ;;  %v222_v9 = vld [vmem:[%s304_s3 + $0x10] sm:$0xff]   ;;  %214 = vmatprep.mubr.msk.bf16.mxu0 %vm233_vm0, %v232_v2 }
   0x2   :  { %v22_v1 = vunpack.c.l.bf16 %v21_v0  ;;  %v220_v3 = vld [vmem:[%s304_s3] sm:$0xff]   ;;  %v223_v10 = vld [vmem:[%s304_s3 + $0x18] sm:$0xff]   ;;  %v225_v12 = vld [vmem:[%s304_s3 + $0x28] sm:$0xff]  }
   0x3   :  { %199 = vmatpush3.bf16.msra.mxu0 %v220_v3  ;;  %v224_v11 = vld [vmem:[%s304_s3 + $0x20] sm:$0xff]   ;;  %v226_v13 = vld [vmem:[%s304_s3 + $0x30] sm:$0xff]   ;;  %v227_v14 = vld [vmem:[%s304_s3 + $0x38] sm:$0xff]  }
   0x4   :  { %23 = vadd.xlane.f32.xlu0 %v22_v1  ;;  %200 = vmatprep.subr.bf16.mxu0 %v232_v2  ;;  %v178_v19 = vld [vmem:[%s305_s1] ss:$0 sm:$0xff] }
   0x5   :  { %v179_v21 = vld [vmem:[%s306_s2] ss:$0 sm:$0xff] }
   0x6   :  { %v180_v25 = vld [vmem:[%s307_s4] ss:$0 sm:$0xff] }
   0x7   :  { %201 = vmatpush3.bf16.msra.mxu0 %v221_v4 }
   0x8   :  { %202 = vmatprep.subr.bf16.mxu0 %v232_v2 }
   0xb   :  { %203 = vmatpush3.bf16.msra.mxu0 %v222_v9 }
   0xc   :  { %204 = vmatprep.subr.bf16.mxu0 %v232_v2 }
   0xf   :  { %205 = vmatpush3.bf16.msra.mxu0 %v223_v10 }
  0x10   :  { %206 = vmatprep.subr.bf16.mxu0 %v232_v2 }
  0x13   :  { %207 = vmatpush3.bf16.msra.mxu0 %v224_v11 }
  0x14   :  { %208 = vmatprep.subr.bf16.mxu0 %v232_v2 }
  0x17   :  { %209 = vmatpush3.bf16.msra.mxu0 %v225_v12 }
  0x18   :  { %210 = vmatprep.subr.bf16.mxu0 %v232_v2 }
  0x1b   :  { %211 = vmatpush3.bf16.msra.mxu0 %v226_v13 }
  0x1c   :  { %212 = vmatprep.subr.bf16.mxu0 %v232_v2 }
  0x1f   :  { %213 = vmatpush3.bf16.msra.mxu0 %v227_v14 }
  0x91   :  { %v24_v5 = vpop.xlane.xlu0 %23 }
  0x92   :  { %v26_v6 = vmul.f32 0.0078125, %v24_v5 }
  0x94   :  { %v27_v7 = vsub.f32 %v22_v1, %v26_v6 }
  0x96   :  { %v28_v8 = vmul.f32 %v27_v7, %v27_v7 }
  0x98   :  { %29 = vadd.xlane.f32.xlu0 %v28_v8 }
 0x125   :  { %v30_v15 = vpop.xlane.xlu0 %29 }
 0x126   :  { %v31_v16 = vmul.f32 0.0078125, %v30_v15 }
 0x128   :  { %v32_v17 = vadd.f32 1e-06, %v31_v16 }
 0x12a   :  { %228 = vrsqrt.f32 %v32_v17 }
 0x134   :  { %v229_v18 = vpop.eup %228 }
 0x135   :  { %v34_v20 = vmul.f32 %v229_v18, %v27_v7 }
 0x137   :  { %v42_v22 = vmul.f32 %v178_v19, %v34_v20 }
 0x139   :  { %v50_v23 = vadd.f32 %v179_v21, %v42_v22 }
 0x13b   :  { %v51_v24 = vpack.c.bf16 %v50_v23, %v50_v23 }
 0x13d   :  { %215 = vmatmul.mubr.bf16.vlgmr.msra.gmra.mrb[0].mxu0 %v51_v24 }
 0x210   :  { %v157_v26 = vpop.f32.mrb[0].mxu0 }
 0x211   :  { %v158_v27 = vadd.f32 %v180_v25, %v157_v26  ;;  %v216_v28 = vpop.f32.mrb[1].mxu0 }
 0x212   :  { %v160_v29 = vpop.f32.mrb[2].mxu0 }
 0x213   :  { %v164_v30 = vmul.f32 0.044715, %v158_v27  ;;  %v217_v31 = vpop.f32.mrb[3].mxu0  ;;  %v163_v37 = vmul.f32 0.5, %v158_v27 }
 0x215   :  { %v165_v32 = vmul.f32 %v164_v30, %v158_v27 }
 0x217   :  { %v166_v33 = vmul.f32 %v165_v32, %v158_v27 }
 0x219   :  { %v167_v34 = vadd.f32 %v166_v33, %v158_v27 }
 0x21b   :  { %v168_v35 = vmul.f32 0.7978846, %v167_v34 }
 0x21d   :  { %230 = vtanh.f32 %v168_v35 }
 0x227   :  { %v231_v36 = vpop.eup %230 }
 0x228   :  { %v170_v38 = vadd.f32 1.0, %v231_v36 }
 0x22a   :  { %v171_v39 = vmul.f32 %v170_v38, %v163_v37 }
 0x22c   :  { %v172_v40 = vpack.c.bf16 %v171_v39, %v171_v39 }
 0x22e   :  { %173 = vst [vmem:[%s308_s5] sm:$0xf] %v172_v40 }

// kernel: split.1
= control target key start
LH: loop header
LB: loop body
LE: loop exit
PB: predicated region body
PF: predicated region fallthrough
CT: control target
= control target key end

     0   :  { %v28_v4 = vmov 0.0   ;;  %s51_s0 = inlined_call_operand.vmem [shape: bf16[2,2,2,128], index: 0, kind: input, shape index: {}]   ;;  %s52_s1 = inlined_call_operand.vmem [shape: bf16[1,2,2,128], index: 1, kind: output, shape index: {}]  }
   0x1   :  { %v24_v0 = vld [vmem:[%s51_s0 + $0x2] sm:$0x1]  ;;  %v25_v1 = vld [vmem:[%s51_s0 + $0x3] sm:$0x1] }
   0x2   :  { %v9_v2 = vunpack.c.l.bf16 %v24_v0  ;;  %v18_v3 = vunpack.c.l.bf16 %v25_v1 }
   0x4   :  { %v11_v5 = vpack.c.bf16 %v28_v4, %v9_v2  ;;  %v21_v6 = vpack.c.bf16 %v28_v4, %v18_v3 }
   0x6   :  { %12 = vst [vmem:[%s52_s1] sm:$0x1] %v11_v5  ;;  %26 = vst [vmem:[%s52_s1 + $0x1] sm:$0x1] %v21_v6 }

// kernel: encoder_forward.41
= control target key start
LH: loop header
LB: loop body
LE: loop exit
PB: predicated region body
PF: predicated region fallthrough
CT: control target
= control target key end

     0   :  { %s86_s0 = inlined_call_operand.vmem [shape: bf16[8,128], index: 0, kind: input, shape index: {}]   ;;  %s87_s1 = inlined_call_operand.vmem [shape: f32[1,128], index: 1, kind: input, shape index: {}]   ;;  %s88_s2 = inlined_call_operand.vmem [shape: f32[1,128], index: 2, kind: input, shape index: {}]   ;;  %s89_s3 = inlined_call_operand.vmem [shape: bf16[8,128], index: 3, kind: output, shape index: {}]  }
   0x1   :  { %v14_v0 = vld [vmem:[%s86_s0] sm:$0xf] }
   0x2   :  { %v15_v1 = vunpack.c.l.bf16 %v14_v0  ;;  %v50_v10 = vld [vmem:[%s87_s1] ss:$0 sm:$0xff] }
   0x3   :  { %v51_v12 = vld [vmem:[%s88_s2] ss:$0 sm:$0xff] }
   0x4   :  { %16 = vadd.xlane.f32.xlu0 %v15_v1 }
  0x91   :  { %v17_v2 = vpop.xlane.xlu0 %16 }
  0x92   :  { %v19_v3 = vmul.f32 0.0078125, %v17_v2 }
  0x94   :  { %v20_v4 = vsub.f32 %v15_v1, %v19_v3 }
  0x96   :  { %v21_v5 = vmul.f32 %v20_v4, %v20_v4 }
  0x98   :  { %22 = vadd.xlane.f32.xlu0 %v21_v5 }
 0x125   :  { %v23_v6 = vpop.xlane.xlu0 %22 }
 0x126   :  { %v24_v7 = vmul.f32 0.0078125, %v23_v6 }
 0x128   :  { %v25_v8 = vadd.f32 1e-06, %v24_v7 }
 0x12a   :  { %52 = vrsqrt.f32 %v25_v8 }
 0x134   :  { %v53_v9 = vpop.eup %52 }
 0x135   :  { %v27_v11 = vmul.f32 %v53_v9, %v20_v4 }
 0x137   :  { %v35_v13 = vmul.f32 %v50_v10, %v27_v11 }
 0x139   :  { %v43_v14 = vadd.f32 %v51_v12, %v35_v13 }
 0x13b   :  { %v44_v15 = vpack.c.bf16 %v43_v14, %v43_v14 }
 0x13d   :  { %45 = vst [vmem:[%s89_s3] sm:$0xf] %v44_v15 }

// kernel: encoder_forward.36
= control target key start
LH: loop header
LB: loop body
LE: loop exit
PB: predicated region body
PF: predicated region fallthrough
CT: control target
= control target key end

     0   :  { %v645_v35 = vmov 0.0   ;;  %vm646_vm0 = vmmov 0   ;;  %vm336_vm1 = vcmask 523264   ;;  %s806_s1 = inlined_call_operand.vmem [shape: bf16[576,128], index: 1, kind: input, shape index: {}]   ;;  %s807_s0 = inlined_call_operand.vmem [shape: bf16[8,576], index: 0, kind: input, shape index: {}]   ;;  %s808_s2 = inlined_call_operand.vmem [shape: f32[1,128], index: 2, kind: input, shape index: {}]   ;;  %s809_s3 = inlined_call_operand.vmem [shape: f32[1,128], index: 3, kind: input, shape index: {}]   ;;  %s810_s4 = inlined_call_operand.vmem [shape: f32[1,128], index: 4, kind: input, shape index: {}]   ;;  %s811_s5 = inlined_call_operand.vmem [shape: bf16[8,128], index: 5, kind: output, shape index: {}]  }
   0x1   :  { %v602_v0 = vld [vmem:[%s806_s1 + $0x40] sm:$0xff]   ;;  %v606_v4 = vld [vmem:[%s806_s1 + $0x48] sm:$0xff]   ;;  %v610_v8 = vld [vmem:[%s806_s1 + $0x50] sm:$0xff]  }
   0x2   :  { %v603_v1 = vld [vmem:[%s806_s1] sm:$0xff]   ;;  %539 = vmatprep.subr.bf16.mxu0 %v602_v0  ;;  %v607_v5 = vld [vmem:[%s806_s1 + $0x8] sm:$0xff]   ;;  %v611_v9 = vld [vmem:[%s806_s1 + $0x10] sm:$0xff]  }
   0x3   :  { %v604_v2 = vld [vmem:[%s806_s1 + $0xc0] sm:$0xff]   ;;  %540 = vmatpush3.bf16.msra.mxu0 %v603_v1  ;;  %v608_v6 = vld [vmem:[%s806_s1 + $0xc8] sm:$0xff]   ;;  %v612_v10 = vld [vmem:[%s806_s1 + $0xd0] sm:$0xff]  }
   0x4   :  { %v605_v3 = vld [vmem:[%s806_s1 + $0x80] sm:$0xff]   ;;  %561 = vmatprep.subr.bf16.mxu1 %v604_v2  ;;  %541 = vmatprep.subr.bf16.mxu0 %v606_v4  ;;  %v609_v7 = vld [vmem:[%s806_s1 + $0x88] sm:$0xff]   ;;  %v613_v11 = vld [vmem:[%s806_s1 + $0x90] sm:$0xff]  }
   0x5   :  { %562 = vmatpush3.bf16.msra.mxu1 %v605_v3  ;;  %v614_v12 = vld [vmem:[%s806_s1 + $0x58] sm:$0xff]   ;;  %v618_v16 = vld [vmem:[%s806_s1 + $0x60] sm:$0xff]   ;;  %v622_v20 = vld [vmem:[%s806_s1 + $0x68] sm:$0xff]  }
   0x6   :  { %563 = vmatprep.subr.bf16.mxu1 %v608_v6  ;;  %v615_v13 = vld [vmem:[%s806_s1 + $0x18] sm:$0xff]   ;;  %v619_v17 = vld [vmem:[%s806_s1 + $0x20] sm:$0xff]   ;;  %v623_v21 = vld [vmem:[%s806_s1 + $0x28] sm:$0xff]  }
   0x7   :  { %542 = vmatpush3.bf16.msra.mxu0 %v607_v5  ;;  %v616_v14 = vld [vmem:[%s806_s1 + $0xd8] sm:$0xff]   ;;  %v620_v18 = vld [vmem:[%s806_s1 + $0xe0] sm:$0xff]   ;;  %v624_v22 = vld [vmem:[%s806_s1 + $0xe8] sm:$0xff]  }
   0x8   :  { %543 = vmatprep.subr.bf16.mxu0 %v610_v8  ;;  %v617_v15 = vld [vmem:[%s806_s1 + $0x98] sm:$0xff]   ;;  %v621_v19 = vld [vmem:[%s806_s1 + $0xa0] sm:$0xff]   ;;  %v625_v23 = vld [vmem:[%s806_s1 + $0xa8] sm:$0xff]  }
   0x9   :  { %564 = vmatpush3.bf16.msra.mxu1 %v609_v7  ;;  %v626_v24 = vld [vmem:[%s806_s1 + $0x70] sm:$0xff]   ;;  %v630_v28 = vld [vmem:[%s806_s1 + $0x78] sm:$0xff]   ;;  %v21_v31 = vld [vmem:[%s807_s0] sm:$0xff] }
   0xa   :  { %565 = vmatprep.subr.bf16.mxu1 %v612_v10  ;;  %v627_v25 = vld [vmem:[%s806_s1 + $0x30] sm:$0xff]   ;;  %v631_v29 = vld [vmem:[%s806_s1 + $0x38] sm:$0xff]   ;;  %v495_v32 = vcombine.low %v21_v31, %v21_v31  ;;  %v496_v33 = vcombine.high %v21_v31, %v21_v31  ;;  %v22_v36 = vld [vmem:[%s807_s0 + $0x8] sm:$0xff] }
   0xb   :  { %544 = vmatpush3.bf16.msra.mxu0 %v611_v9  ;;  %v628_v26 = vld [vmem:[%s806_s1 + $0xf0] sm:$0xff]   ;;  %v632_v30 = vld [vmem:[%s806_s1 + $0xf8] sm:$0xff]   ;;  %v497_v37 = vcombine.low %v22_v36, %v22_v36  ;;  %v498_v38 = vcombine.high %v22_v36, %v22_v36  ;;  %v639_v39 = vld [vmem:[%s806_s1 + $0x100] sm:$0xff]  }
   0xc   :  { %545 = vmatprep.subr.bf16.mxu0 %v614_v12  ;;  %v629_v27 = vld [vmem:[%s806_s1 + $0xb0] sm:$0xff]   ;;  %v636_v34 = vld [vmem:[%s806_s1 + $0xb8] sm:$0xff]   ;;  %372 = vmatprep.mubr.bf16.mxu0 %v496_v33  ;;  %v640_v40 = vld [vmem:[%s806_s1 + $0x108] sm:$0xff]  }
   0xd   :  { %566 = vmatpush3.bf16.msra.mxu1 %v613_v11  ;;  %412 = vmatprep.mubr.bf16.mxu1 %v498_v38  ;;  %v641_v41 = vld [vmem:[%s806_s1 + $0x110] sm:$0xff]   ;;  %v642_v42 = vld [vmem:[%s806_s1 + $0x118] sm:$0xff]   ;;  %v494_v45 = vld [vmem:[%s808_s2] ss:$0 sm:$0xff] }
   0xe   :  { %567 = vmatprep.subr.bf16.mxu1 %v616_v14  ;;  %v635_v43 = vld [vmem:[%s807_s0 + $0x10] ss:$0 sps:$4 sm:$0xff]   ;;  %v537_v6 = vld [vmem:[%s809_s3] ss:$0 sm:$0xff] }
   0xf   :  { %546 = vmatpush3.bf16.msra.mxu0 %v615_v13  ;;  %v538_v8 = vld [vmem:[%s810_s4] ss:$0 sm:$0xff] }
  0x10   :  { %547 = vmatprep.subr.bf16.mxu0 %v618_v16 }
  0x11   :  { %568 = vmatpush3.bf16.msra.mxu1 %v617_v15 }
  0x12   :  { %569 = vmatprep.subr.bf16.mxu1 %v620_v18 }
  0x13   :  { %548 = vmatpush3.bf16.msra.mxu0 %v619_v17 }
  0x14   :  { %549 = vmatprep.subr.bf16.mxu0 %v622_v20 }
  0x15   :  { %570 = vmatpush3.bf16.msra.mxu1 %v621_v19 }
  0x16   :  { %571 = vmatprep.subr.bf16.mxu1 %v624_v22 }
  0x17   :  { %550 = vmatpush3.bf16.msra.mxu0 %v623_v21 }
  0x18   :  { %551 = vmatprep.subr.bf16.mxu0 %v626_v24 }
  0x19   :  { %572 = vmatpush3.bf16.msra.mxu1 %v625_v23 }
  0x1a   :  { %573 = vmatprep.subr.bf16.mxu1 %v628_v26 }
  0x1b   :  { %552 = vmatpush3.bf16.msra.mxu0 %v627_v25 }
  0x1c   :  { %553 = vmatprep.subr.bf16.mxu0 %v630_v28 }
  0x1d   :  { %574 = vmatpush3.bf16.msra.mxu1 %v629_v27 }
  0x1e   :  { %575 = vmatprep.subr.bf16.mxu1 %v632_v30 }
  0x1f   :  { %554 = vmatpush3.bf16.msra.mxu0 %v631_v29 }
  0x20   :  { %588 = vmatprep.subr.bf16.mxu0 %v645_v35 }
  0x21   :  { %576 = vmatpush3.bf16.msra.mxu1 %v636_v34 }
  0x22   :  { %373 = vmatmul.mubr.bf16.vlgmr.msra.gmra.mrb[0].mxu0 %v495_v32 }
  0x23   :  { %589 = vmatpush3.bf16.msra.mxu0 %v639_v39  ;;  %596 = vmatprep.mubr.msk.bf16.mxu0 %vm646_vm0, %v645_v35 }
  0x24   :  { %413 = vmatmul.mubr.bf16.vlgmr.msra.gmra.mrb[0].mxu1 %v497_v37  ;;  %590 = vmatprep.subr.bf16.mxu0 %v645_v35 }
  0x27   :  { %591 = vmatpush3.bf16.msra.mxu0 %v640_v40 }
  0x28   :  { %592 = vmatprep.subr.bf16.mxu0 %v645_v35 }
  0x2b   :  { %593 = vmatpush3.bf16.msra.mxu0 %v641_v41 }
  0x2c   :  { %594 = vmatprep.subr.bf16.mxu0 %v645_v35 }
  0x2f   :  { %595 = vmatpush3.bf16.msra.mxu0 %v642_v42 }
  0x32   :  { %597 = vmatmul.mubr.msk.bf16.vlgmr.msra.gmra.mrb[4].mxu0 %vm336_vm1, %v635_v43 }
  0xf5   :  { %v555_v44 = vpop.f32.mrb[0].mxu0 }
  0xf6   :  { %v556_v46 = vpop.f32.mrb[1].mxu0 }
  0xf7   :  { %v557_v47 = vadd.f32 %v556_v46, %v555_v44  ;;  %v558_v48 = vpop.f32.mrb[2].mxu0  ;;  %v577_v49 = vpop.f32.mrb[0].mxu1 }
  0xf8   :  { %v559_v50 = vpop.f32.mrb[3].mxu0  ;;  %v578_v51 = vpop.f32.mrb[1].mxu1 }
  0xf9   :  { %v375_v52 = vadd.f32 %v557_v47, %v494_v45  ;;  %v579_v53 = vadd.f32 %v578_v51, %v577_v49  ;;  %v580_v54 = vpop.f32.mrb[2].mxu1 }
  0xfa   :  { %v581_v55 = vpop.f32.mrb[3].mxu1 }
  0xfb   :  { %v415_v56 = vadd.f32 %v579_v53, %v375_v52 }
 0x105   :  { %v454_v57 = vpop.f32.mrb[4].mxu0 }
 0x106   :  { %v455_v58 = vadd.f32 %v454_v57, %v415_v56  ;;  %v598_v59 = vpop.f32.mrb[5].mxu0 }
 0x107   :  { %v457_v60 = vpop.f32.mrb[6].mxu0 }
 0x108   :  { %v599_v61 = vpop.f32.mrb[7].mxu0  ;;  %460 = vadd.xlane.f32.xlu0 %v455_v58 }
 0x195   :  { %v461_v62 = vpop.xlane.xlu0 %460 }
 0x196   :  { %v463_v63 = vmul.f32 0.0078125, %v461_v62 }
 0x198   :  { %v464_v0 = vsub.f32 %v455_v58, %v463_v63 }
 0x19a   :  { %v465_v1 = vmul.f32 %v464_v0, %v464_v0 }
 0x19c   :  { %466 = vadd.xlane.f32.xlu0 %v465_v1 }
 0x229   :  { %v467_v2 = vpop.xlane.xlu0 %466 }
 0x22a   :  { %v468_v3 = vmul.f32 0.0078125, %v467_v2 }
 0x22c   :  { %v469_v4 = vadd.f32 1e-06, %v468_v3 }
 0x22e   :  { %643 = vrsqrt.f32 %v469_v4 }
 0x238   :  { %v644_v5 = vpop.eup %643 }
 0x239   :  { %v471_v7 = vmul.f32 %v644_v5, %v464_v0 }
 0x23b   :  { %v479_v9 = vmul.f32 %v537_v6, %v471_v7 }
 0x23d   :  { %v487_v10 = vadd.f32 %v538_v8, %v479_v9 }
 0x23f   :  { %v488_v11 = vpack.c.bf16 %v487_v10, %v487_v10 }
 0x241   :  { %489 = vst [vmem:[%s811_s5] sm:$0xf] %v488_v11 }

// kernel: encoder_forward.47
= control target key start
LH: loop header
LB: loop body
LE: loop exit
PB: predicated region body
PF: predicated region fallthrough
CT: control target
= control target key end

     0   :  { %v20_v0 = vlaneseq  ;;  %v158_v2 = vmov 1983009808   ;;  %vm27_vm0 = vcmask 1041408   ;;  %v159_v13 = vmov 269488144   ;;  %s197_s0 = inlined_call_operand.vmem [shape: bf16[2,256], index: 0, kind: input, shape index: {}]   ;;  %s198_s1 = inlined_call_operand.vmem [shape: f32[1,256], index: 1, kind: input, shape index: {}]   ;;  %s199_s2 = inlined_call_operand.vmem [shape: f32[1,256], index: 2, kind: input, shape index: {}]   ;;  %s200_s3 = inlined_call_operand.vmem [shape: bf16[2,256], index: 3, kind: output, shape index: {}]  }
   0x1   :  { %v14_v1 = vld [vmem:[%s197_s0] sm:$0x3]  ;;  %v18_v3 = vunpack.c.l.s4 %v158_v2  ;;  %v37_v14 = vunpack.c.l.s4 %v159_v13  ;;  %v160_v44 = vmov 1966171168  }
   0x2   :  { %v21_v4 = vshrl.u32 %v20_v0, 7  ;;  %v15_v5 = vunpack.c.l.bf16 %v14_v1  ;;  %v75_v32 = vld [vmem:[%s198_s1] sm:$0x3]  ;;  %v132_v45 = vunpack.c.l.s4 %v160_v44 }
   0x3   :  { %v19_v6 = vunpack.c.0.s8 %v18_v3  ;;  %v38_v15 = vunpack.c.0.s8 %v37_v14  ;;  %v95_v33 = vld [vmem:[%s199_s2] sm:$0x3] }
   0x4   :  { %v79_v30 = vsub.s32 0, %v21_v4  ;;  %v83_v31 = vsub.s32 1, %v21_v4  ;;  %v133_v48 = vunpack.c.0.s8 %v132_v45 }
   0x5   :  { %v22_v7 = vsub.s32 %v19_v6, %v21_v4  ;;  %v41_v16 = vsub.s32 %v38_v15, %v21_v4 }
   0x6   :  { %v80_v34 = vrot.slane %v75_v32, %v79_v30  ;;  %v84_v35 = vrot.slane %v75_v32, %v83_v31  ;;  %v100_v36 = vrot.slane %v95_v33, %v79_v30  ;;  %v104_v37 = vrot.slane %v95_v33, %v83_v31 }
   0x7   :  { %v23_v8 = vrot.slane %v15_v5, %v22_v7  ;;  %v136_v51 = vsub.s32 %v133_v48, %v21_v4 }
   0x8   :  { %v85_v38 = vcombine.low %v80_v34, %v84_v35  ;;  %v105_v39 = vcombine.low %v100_v36, %v104_v37 }
   0x9   :  { %v24_v9 = vcombine.high %v23_v8, %v23_v8  ;;  %v28_v10 = vsel %vm27_vm0, %v23_v8, 0.0 }
   0xa   :  { %v92_v41 = vrot.slane %v85_v38, %v22_v7  ;;  %v112_v43 = vrot.slane %v105_v39, %v22_v7 }
   0xb   :  { %v29_v11 = vsel %vm27_vm0, %v24_v9, 0.0 }
   0xc   :  { %v30_v12 = vadd.f32 %v29_v11, %v28_v10 }
   0xe   :  { %31 = vadd.xlane.f32.xlu0 %v30_v12 }
  0x9b   :  { %v32_v17 = vpop.xlane.xlu0 %31 }
  0x9c   :  { %v34_v18 = vmul.f32 0.00390625, %v32_v17 }
  0x9e   :  { %v42_v19 = vrot.slane %v34_v18, %v41_v16 }
  0xa0   :  { %v44_v20 = vsub.f32 %v15_v5, %v42_v19 }
  0xa2   :  { %v45_v21 = vmul.f32 %v44_v20, %v44_v20 }
  0xa4   :  { %v53_v22 = vrot.slane %v45_v21, %v22_v7 }
  0xa6   :  { %v54_v23 = vcombine.high %v53_v22, %v53_v22  ;;  %v57_v24 = vsel %vm27_vm0, %v53_v22, 0.0 }
  0xa8   :  { %v58_v25 = vsel %vm27_vm0, %v54_v23, 0.0 }
  0xa9   :  { %v59_v26 = vadd.f32 %v58_v25, %v57_v24 }
  0xab   :  { %60 = vadd.xlane.f32.xlu0 %v59_v26 }
 0x138   :  { %v61_v27 = vpop.xlane.xlu0 %60 }
 0x139   :  { %v62_v28 = vmul.f32 0.00390625, %v61_v27 }
 0x13b   :  { %v63_v29 = vadd.f32 1e-06, %v62_v28 }
 0x13d   :  { %156 = vrsqrt.f32 %v63_v29 }
 0x147   :  { %v157_v40 = vpop.eup %156 }
 0x148   :  { %v72_v42 = vrot.slane %v157_v40, %v41_v16 }
 0x14a   :  { %v74_v46 = vmul.f32 %v72_v42, %v44_v20 }
 0x14c   :  { %v94_v47 = vmul.f32 %v92_v41, %v74_v46 }
 0x14e   :  { %v114_v49 = vadd.f32 %v112_v43, %v94_v47 }
 0x150   :  { %v122_v50 = vrot.slane %v114_v49, %v22_v7 }
 0x152   :  { %v123_v52 = vcombine.high %v122_v50, %v122_v50 }
 0x154   :  { %v151_v53 = vpack.c.bf16 %v123_v52, %v122_v50 }
 0x156   :  { %v137_v54 = vrot.slane %v151_v53, %v136_v51 }
 0x158   :  { %152 = vst.sshfl [vmem:[%s200_s3] sm:$0x5 pattern:$0x73625140] %v137_v54 }

// kernel: encoder_forward.44
= control target key start
LH: loop header
LB: loop body
LE: loop exit
PB: predicated region body
PF: predicated region fallthrough
CT: control target
= control target key end

     0   :  { %v52_v9 = vlaneseq  ;;  %v413_v10 = vmov 1966171168   ;;  %v414_v42 = vmov 1983009808   ;;  %s559_s1 = inlined_call_operand.vmem [shape: bf16[256,256], index: 1, kind: input, shape index: {}]   ;;  %s560_s0 = inlined_call_operand.vmem [shape: bf16[2,256], index: 0, kind: input, shape index: {}]   ;;  %s561_s3 = inlined_call_operand.vmem [shape: bf16[2,256], index: 3, kind: input, shape index: {}]   ;;  %s562_s2 = inlined_call_operand.vmem [shape: f32[1,256], index: 2, kind: input, shape index: {}]   ;;  %s563_s4 = inlined_call_operand.vmem [shape: bf16[2,256], index: 4, kind: output, shape index: {}]  }
   0x1   :  { %v365_v0 = vld [vmem:[%s559_s1 + $0x4] ss:$8 sps:$4 sm:$0xff]   ;;  %v367_v1 = vld [vmem:[%s559_s1] ss:$8 sps:$4 sm:$0xff]   ;;  %v368_v2 = vld [vmem:[%s559_s1 + $0x14] ss:$8 sps:$4 sm:$0xff]   ;;  %v72_v11 = vunpack.c.l.s4 %v413_v10  ;;  %v292_v43 = vunpack.c.l.s4 %v414_v42 }
   0x2   :  { %247 = vmatprep.subr.bf16.mxu0 %v365_v0  ;;  %v370_v3 = vld [vmem:[%s559_s1 + $0x10] ss:$8 sps:$4 sm:$0xff]   ;;  %v371_v4 = vld [vmem:[%s559_s1 + $0x24] ss:$8 sps:$4 sm:$0xff]   ;;  %v373_v5 = vld [vmem:[%s559_s1 + $0x20] ss:$8 sps:$4 sm:$0xff]  }
   0x3   :  { %248 = vmatpush1.bf16.msra.mxu0 %v367_v1  ;;  %v374_v6 = vld [vmem:[%s559_s1 + $0x34] ss:$8 sps:$4 sm:$0xff]   ;;  %v376_v7 = vld [vmem:[%s559_s1 + $0x30] ss:$8 sps:$4 sm:$0xff]   ;;  %v377_v8 = vld [vmem:[%s559_s1 + $0x44] ss:$8 sps:$4 sm:$0xff]   ;;  %v73_v15 = vunpack.c.0.s8 %v72_v11  ;;  %v293_v44 = vunpack.c.0.s8 %v292_v43 }
   0x4   :  { %249 = vmatprep.subr.bf16.mxu0 %v368_v2  ;;  %v379_v12 = vld [vmem:[%s559_s1 + $0x40] ss:$8 sps:$4 sm:$0xff]   ;;  %v380_v13 = vld [vmem:[%s559_s1 + $0x54] ss:$8 sps:$4 sm:$0xff]   ;;  %v473_v14 = vshrl.u32 %v52_v9, 7 }
   0x5   :  { %v382_v16 = vld [vmem:[%s559_s1 + $0x50] ss:$8 sps:$4 sm:$0xff]   ;;  %v383_v17 = vld [vmem:[%s559_s1 + $0x64] ss:$8 sps:$4 sm:$0xff]   ;;  %v385_v21 = vld [vmem:[%s559_s1 + $0x60] ss:$8 sps:$4 sm:$0xff]  }
   0x6   :  { %v482_v18 = vsub.s32 %v73_v15, %v473_v14  ;;  %v328_v19 = vld.sshfl [vmem:[%s560_s0] sm:$0x11 pattern:$0x75316420]  ;;  %v386_v22 = vld [vmem:[%s559_s1 + $0x74] ss:$8 sps:$4 sm:$0xff]   ;;  %v296_v47 = vsub.s32 %v293_v44, %v473_v14 }
   0x7   :  { %250 = vmatpush1.bf16.msra.mxu0 %v370_v3  ;;  %v70_v20 = vcombine.high %v328_v19, %v328_v19  ;;  %v388_v24 = vld [vmem:[%s559_s1 + $0x70] ss:$8 sps:$4 sm:$0xff]   ;;  %v389_v25 = vld [vmem:[%s559_s1 + $0x84] ss:$8 sps:$4 sm:$0xff]   ;;  %v391_v26 = vld [vmem:[%s559_s1 + $0x80] ss:$8 sps:$4 sm:$0xff]  }
   0x8   :  { %251 = vmatprep.subr.bf16.mxu0 %v371_v4  ;;  %v392_v27 = vld [vmem:[%s559_s1 + $0x94] ss:$8 sps:$4 sm:$0xff]   ;;  %v394_v28 = vld [vmem:[%s559_s1 + $0x90] ss:$8 sps:$4 sm:$0xff]   ;;  %v395_v29 = vld [vmem:[%s559_s1 + $0xa4] ss:$8 sps:$4 sm:$0xff]   ;;  %v77_v41 = vrot.slane %v328_v19, %v482_v18 }
   0x9   :  { %v84_v23 = vrot.slane %v70_v20, %v482_v18  ;;  %v397_v30 = vld [vmem:[%s559_s1 + $0xa0] ss:$8 sps:$4 sm:$0xff]   ;;  %v398_v31 = vld [vmem:[%s559_s1 + $0xb4] ss:$8 sps:$4 sm:$0xff]   ;;  %v400_v32 = vld [vmem:[%s559_s1 + $0xb0] ss:$8 sps:$4 sm:$0xff]  }
   0xa   :  { %v401_v33 = vld [vmem:[%s559_s1 + $0xc4] ss:$8 sps:$4 sm:$0xff]   ;;  %v403_v34 = vld [vmem:[%s559_s1 + $0xc0] ss:$8 sps:$4 sm:$0xff]   ;;  %v404_v35 = vld [vmem:[%s559_s1 + $0xd4] ss:$8 sps:$4 sm:$0xff]  }
   0xb   :  { %252 = vmatpush1.bf16.msra.mxu0 %v373_v5  ;;  %279 = vmatprep.mubr.bf16.mxu0 %v84_v23  ;;  %v406_v36 = vld [vmem:[%s559_s1 + $0xd0] ss:$8 sps:$4 sm:$0xff]   ;;  %v407_v37 = vld [vmem:[%s559_s1 + $0xe4] ss:$8 sps:$4 sm:$0xff]   ;;  %v409_v38 = vld [vmem:[%s559_s1 + $0xe0] ss:$8 sps:$4 sm:$0xff]  }
   0xc   :  { %253 = vmatprep.subr.bf16.mxu0 %v374_v6  ;;  %v410_v39 = vld [vmem:[%s559_s1 + $0xf4] ss:$8 sps:$4 sm:$0xff]   ;;  %v412_v40 = vld [vmem:[%s559_s1 + $0xf0] ss:$8 sps:$4 sm:$0xff]   ;;  %v288_v45 = vld [vmem:[%s561_s3] sm:$0x3] }
   0xd   :  { %v289_v46 = vunpack.c.l.bf16 %v288_v45  ;;  %v54_v48 = vsub.s32 0, %v473_v14  ;;  %v50_v49 = vld [vmem:[%s562_s2] sm:$0x3]  ;;  %v58_v50 = vsub.s32 1, %v473_v14 }
   0xf   :  { %254 = vmatpush1.bf16.msra.mxu0 %v376_v7  ;;  %v297_v51 = vrot.slane %v289_v46, %v296_v47  ;;  %v55_v52 = vrot.slane %v50_v49, %v54_v48  ;;  %v59_v53 = vrot.slane %v50_v49, %v58_v50 }
  0x10   :  { %255 = vmatprep.subr.bf16.mxu0 %v377_v8 }
  0x11   :  { %v298_v55 = vcombine.high %v297_v51, %v297_v51 }
  0x13   :  { %256 = vmatpush1.bf16.msra.mxu0 %v379_v12 }
  0x14   :  { %257 = vmatprep.subr.bf16.mxu0 %v380_v13 }
  0x17   :  { %258 = vmatpush1.bf16.msra.mxu0 %v382_v16 }
  0x18   :  { %259 = vmatprep.subr.bf16.mxu0 %v383_v17 }
  0x1b   :  { %260 = vmatpush1.bf16.msra.mxu0 %v385_v21 }
  0x1c   :  { %261 = vmatprep.subr.bf16.mxu0 %v386_v22 }
  0x1f   :  { %262 = vmatpush1.bf16.msra.mxu0 %v388_v24 }
  0x20   :  { %263 = vmatprep.subr.bf16.mxu0 %v389_v25 }
  0x23   :  { %264 = vmatpush1.bf16.msra.mxu0 %v391_v26 }
  0x24   :  { %265 = vmatprep.subr.bf16.mxu0 %v392_v27 }
  0x27   :  { %266 = vmatpush1.bf16.msra.mxu0 %v394_v28 }
  0x28   :  { %267 = vmatprep.subr.bf16.mxu0 %v395_v29 }
  0x2b   :  { %268 = vmatpush1.bf16.msra.mxu0 %v397_v30 }
  0x2c   :  { %269 = vmatprep.subr.bf16.mxu0 %v398_v31 }
  0x2f   :  { %270 = vmatpush1.bf16.msra.mxu0 %v400_v32 }
  0x30   :  { %271 = vmatprep.subr.bf16.mxu0 %v401_v33 }
  0x33   :  { %272 = vmatpush1.bf16.msra.mxu0 %v403_v34 }
  0x34   :  { %273 = vmatprep.subr.bf16.mxu0 %v404_v35 }
  0x37   :  { %274 = vmatpush1.bf16.msra.mxu0 %v406_v36 }
  0x38   :  { %275 = vmatprep.subr.bf16.mxu0 %v407_v37 }
  0x3b   :  { %276 = vmatpush1.bf16.msra.mxu0 %v409_v38 }
  0x3c   :  { %277 = vmatprep.subr.bf16.mxu0 %v410_v39 }
  0x3f   :  { %278 = vmatpush1.bf16.msra.mxu0 %v412_v40 }
  0x42   :  { %280 = vmatmul.mubr.bf16.vlgmr.msra.gmra.mrb[0].mxu0 %v77_v41 }
 0x115   :  { %v281_v54 = vpop.f32.mrb[0].mxu0 }
 0x116   :  { %v282_v56 = vadd.f32 %v281_v54, %v55_v52  ;;  %v283_v57 = vpop.f32.mrb[1].mxu0 }
 0x117   :  { %v284_v58 = vadd.f32 %v283_v57, %v59_v53  ;;  %v285_v59 = vpop.f32.mrb[2].mxu0 }
 0x118   :  { %v301_v60 = vadd.f32 %v297_v51, %v282_v56  ;;  %v286_v61 = vpop.f32.mrb[3].mxu0 }
 0x119   :  { %v302_v62 = vadd.f32 %v298_v55, %v284_v58 }
 0x11b   :  { %v361_v63 = vpack.c.bf16 %v302_v62, %v301_v60 }
 0x11d   :  { %v314_v0 = vrot.slane %v361_v63, %v482_v18 }
 0x11f   :  { %362 = vst.sshfl [vmem:[%s563_s4] sm:$0x5 pattern:$0x73625140] %v314_v0 }

// kernel: encoder_forward.43
= control target key start
LH: loop header
LB: loop body
LE: loop exit
PB: predicated region body
PF: predicated region fallthrough
CT: control target
= control target key end

     0   :  { %v26_v0 = vlaneseq  ;;  %v513_v2 = vmov 1983009808   ;;  %vm33_vm0 = vcmask 1041408   ;;  %v514_v31 = vmov 269488144   ;;  %s675_s0 = inlined_call_operand.vmem [shape: bf16[2,256], index: 0, kind: input, shape index: {}]   ;;  %s676_s3 = inlined_call_operand.vmem [shape: bf16[256,256], index: 3, kind: input, shape index: {}]   ;;  %s677_s1 = inlined_call_operand.vmem [shape: f32[1,256], index: 1, kind: input, shape index: {}]   ;;  %s678_s2 = inlined_call_operand.vmem [shape: f32[1,256], index: 2, kind: input, shape index: {}]   ;;  %s679_s4 = inlined_call_operand.vmem [shape: f32[1,256], index: 4, kind: input, shape index: {}]   ;;  %s680_s5 = inlined_call_operand.vmem [shape: bf16[2,256], index: 5, kind: output, shape index: {}]  }
   0x1   :  { %v20_v1 = vld [vmem:[%s675_s0] sm:$0x3]  ;;  %v24_v3 = vunpack.c.l.s4 %v513_v2  ;;  %v459_v13 = vld [vmem:[%s676_s3 + $0x4] ss:$8 sps:$4 sm:$0xff]   ;;  %v462_v15 = vld [vmem:[%s676_s3 + $0x14] ss:$8 sps:$4 sm:$0xff]   ;;  %v43_v32 = vunpack.c.l.s4 %v514_v31 }
   0x2   :  { %v549_v4 = vshrl.u32 %v26_v0, 7  ;;  %v21_v5 = vunpack.c.l.bf16 %v20_v1  ;;  %v461_v14 = vld [vmem:[%s676_s3] ss:$8 sps:$4 sm:$0xff]   ;;  %338 = vmatprep.subr.bf16.mxu0 %v459_v13  ;;  %v464_v16 = vld [vmem:[%s676_s3 + $0x10] ss:$8 sps:$4 sm:$0xff]  }
   0x3   :  { %v25_v6 = vunpack.c.0.s8 %v24_v3  ;;  %339 = vmatpush1.bf16.msra.mxu0 %v461_v14  ;;  %v465_v17 = vld [vmem:[%s676_s3 + $0x24] ss:$8 sps:$4 sm:$0xff]   ;;  %v467_v18 = vld [vmem:[%s676_s3 + $0x20] ss:$8 sps:$4 sm:$0xff]   ;;  %v468_v19 = vld [vmem:[%s676_s3 + $0x34] ss:$8 sps:$4 sm:$0xff]   ;;  %v44_v33 = vunpack.c.0.s8 %v43_v32 }
   0x4   :  { %340 = vmatprep.subr.bf16.mxu0 %v462_v15  ;;  %v470_v20 = vld [vmem:[%s676_s3 + $0x30] ss:$8 sps:$4 sm:$0xff]   ;;  %v471_v21 = vld [vmem:[%s676_s3 + $0x44] ss:$8 sps:$4 sm:$0xff]   ;;  %v473_v22 = vld [vmem:[%s676_s3 + $0x40] ss:$8 sps:$4 sm:$0xff]  }
   0x5   :  { %v552_v7 = vsub.s32 %v25_v6, %v549_v4  ;;  %v474_v23 = vld [vmem:[%s676_s3 + $0x54] ss:$8 sps:$4 sm:$0xff]   ;;  %v476_v24 = vld [vmem:[%s676_s3 + $0x50] ss:$8 sps:$4 sm:$0xff]   ;;  %v477_v25 = vld [vmem:[%s676_s3 + $0x64] ss:$8 sps:$4 sm:$0xff]   ;;  %v47_v34 = vsub.s32 %v44_v33, %v549_v4 }
   0x6   :  { %v479_v26 = vld [vmem:[%s676_s3 + $0x60] ss:$8 sps:$4 sm:$0xff]   ;;  %v480_v27 = vld [vmem:[%s676_s3 + $0x74] ss:$8 sps:$4 sm:$0xff]   ;;  %v482_v28 = vld [vmem:[%s676_s3 + $0x70] ss:$8 sps:$4 sm:$0xff]  }
   0x7   :  { %v29_v8 = vrot.slane %v21_v5, %v552_v7  ;;  %341 = vmatpush1.bf16.msra.mxu0 %v464_v16  ;;  %v483_v29 = vld [vmem:[%s676_s3 + $0x84] ss:$8 sps:$4 sm:$0xff]   ;;  %v485_v30 = vld [vmem:[%s676_s3 + $0x80] ss:$8 sps:$4 sm:$0xff]   ;;  %v486_v45 = vld [vmem:[%s676_s3 + $0x94] ss:$8 sps:$4 sm:$0xff]  }
   0x8   :  { %342 = vmatprep.subr.bf16.mxu0 %v465_v17  ;;  %v488_v46 = vld [vmem:[%s676_s3 + $0x90] ss:$8 sps:$4 sm:$0xff]   ;;  %v489_v47 = vld [vmem:[%s676_s3 + $0xa4] ss:$8 sps:$4 sm:$0xff]   ;;  %v491_v48 = vld [vmem:[%s676_s3 + $0xa0] ss:$8 sps:$4 sm:$0xff]  }
   0x9   :  { %v30_v9 = vcombine.high %v29_v8, %v29_v8  ;;  %v34_v10 = vsel %vm33_vm0, %v29_v8, 0.0  ;;  %v492_v49 = vld [vmem:[%s676_s3 + $0xb4] ss:$8 sps:$4 sm:$0xff]   ;;  %v494_v50 = vld [vmem:[%s676_s3 + $0xb0] ss:$8 sps:$4 sm:$0xff]   ;;  %v85_v62 = vsub.s32 0, %v549_v4 }
   0xa   :  { %v495_v51 = vld [vmem:[%s676_s3 + $0xc4] ss:$8 sps:$4 sm:$0xff]   ;;  %v497_v52 = vld [vmem:[%s676_s3 + $0xc0] ss:$8 sps:$4 sm:$0xff]   ;;  %v498_v53 = vld [vmem:[%s676_s3 + $0xd4] ss:$8 sps:$4 sm:$0xff]  }
   0xb   :  { %v35_v11 = vsel %vm33_vm0, %v30_v9, 0.0  ;;  %343 = vmatpush1.bf16.msra.mxu0 %v467_v18  ;;  %v500_v54 = vld [vmem:[%s676_s3 + $0xd0] ss:$8 sps:$4 sm:$0xff]   ;;  %v501_v55 = vld [vmem:[%s676_s3 + $0xe4] ss:$8 sps:$4 sm:$0xff]   ;;  %v89_v63 = vsub.s32 1, %v549_v4 }
   0xc   :  { %v36_v12 = vadd.f32 %v35_v11, %v34_v10  ;;  %344 = vmatprep.subr.bf16.mxu0 %v468_v19  ;;  %v503_v56 = vld [vmem:[%s676_s3 + $0xe0] ss:$8 sps:$4 sm:$0xff]   ;;  %v504_v57 = vld [vmem:[%s676_s3 + $0xf4] ss:$8 sps:$4 sm:$0xff]   ;;  %v506_v58 = vld [vmem:[%s676_s3 + $0xf0] ss:$8 sps:$4 sm:$0xff]  }
   0xd   :  { %v81_v0 = vld [vmem:[%s677_s1] sm:$0x3] }
   0xe   :  { %37 = vadd.xlane.f32.xlu0 %v36_v12  ;;  %v101_v1 = vld [vmem:[%s678_s2] sm:$0x3]  ;;  %v86_v2 = vrot.slane %v81_v0, %v85_v62  ;;  %v90_v3 = vrot.slane %v81_v0, %v89_v63 }
   0xf   :  { %345 = vmatpush1.bf16.msra.mxu0 %v470_v20  ;;  %v110_v6 = vrot.slane %v101_v1, %v89_v63 }
  0x10   :  { %346 = vmatprep.subr.bf16.mxu0 %v471_v21  ;;  %v91_v8 = vcombine.low %v86_v2, %v90_v3  ;;  %v166_v21 = vld [vmem:[%s679_s4] sm:$0x3] }
  0x12   :  { %v98_v12 = vrot.slane %v91_v8, %v552_v7 }
  0x13   :  { %347 = vmatpush1.bf16.msra.mxu0 %v473_v22  ;;  %v171_v22 = vrot.slane %v166_v21, %v85_v62 }
  0x14   :  { %348 = vmatprep.subr.bf16.mxu0 %v474_v23  ;;  %v175_v23 = vrot.slane %v166_v21, %v89_v63 }
  0x17   :  { %349 = vmatpush1.bf16.msra.mxu0 %v476_v24 }
  0x18   :  { %350 = vmatprep.subr.bf16.mxu0 %v477_v25 }
  0x1b   :  { %351 = vmatpush1.bf16.msra.mxu0 %v479_v26 }
  0x1c   :  { %352 = vmatprep.subr.bf16.mxu0 %v480_v27 }
  0x1f   :  { %353 = vmatpush1.bf16.msra.mxu0 %v482_v28 }
  0x20   :  { %354 = vmatprep.subr.bf16.mxu0 %v483_v29 }
  0x23   :  { %355 = vmatpush1.bf16.msra.mxu0 %v485_v30 }
  0x24   :  { %356 = vmatprep.subr.bf16.mxu0 %v486_v45 }
  0x27   :  { %357 = vmatpush1.bf16.msra.mxu0 %v488_v46 }
  0x28   :  { %358 = vmatprep.subr.bf16.mxu0 %v489_v47 }
  0x2b   :  { %359 = vmatpush1.bf16.msra.mxu0 %v491_v48 }
  0x2c   :  { %360 = vmatprep.subr.bf16.mxu0 %v492_v49 }
  0x2f   :  { %361 = vmatpush1.bf16.msra.mxu0 %v494_v50 }
  0x30   :  { %362 = vmatprep.subr.bf16.mxu0 %v495_v51 }
  0x33   :  { %363 = vmatpush1.bf16.msra.mxu0 %v497_v52 }
  0x34   :  { %364 = vmatprep.subr.bf16.mxu0 %v498_v53 }
  0x37   :  { %365 = vmatpush1.bf16.msra.mxu0 %v500_v54 }
  0x38   :  { %366 = vmatprep.subr.bf16.mxu0 %v501_v55 }
  0x3b   :  { %367 = vmatpush1.bf16.msra.mxu0 %v503_v56 }
  0x3c   :  { %368 = vmatprep.subr.bf16.mxu0 %v504_v57 }
  0x3f   :  { %369 = vmatpush1.bf16.msra.mxu0 %v506_v58 }
  0x9b   :  { %v38_v35 = vpop.xlane.xlu0 %37 }
  0x9c   :  { %v40_v36 = vmul.f32 0.00390625, %v38_v35 }
  0x9e   :  { %v48_v37 = vrot.slane %v40_v36, %v47_v34 }
  0xa0   :  { %v50_v38 = vsub.f32 %v21_v5, %v48_v37  ;;  %v106_v5 = vrot.slane %v101_v1, %v85_v62 }
  0xa2   :  { %v51_v39 = vmul.f32 %v50_v38, %v50_v38  ;;  %v111_v9 = vcombine.low %v106_v5, %v110_v6 }
  0xa4   :  { %v59_v40 = vrot.slane %v51_v39, %v552_v7  ;;  %v118_v14 = vrot.slane %v111_v9, %v552_v7  ;;  %v515_v39 = vmov 1966171168  }
  0xa6   :  { %v60_v41 = vcombine.high %v59_v40, %v59_v40  ;;  %v63_v42 = vsel %vm33_vm0, %v59_v40, 0.0  ;;  %v403_v40 = vunpack.c.l.s4 %v515_v39 }
  0xa8   :  { %v64_v43 = vsel %vm33_vm0, %v60_v41, 0.0 }
  0xa9   :  { %v65_v44 = vadd.f32 %v64_v43, %v63_v42  ;;  %v404_v42 = vunpack.c.0.s8 %v403_v40 }
  0xab   :  { %66 = vadd.xlane.f32.xlu0 %v65_v44  ;;  %v407_v50 = vsub.s32 %v404_v42, %v549_v4 }
 0x138   :  { %v67_v59 = vpop.xlane.xlu0 %66 }
 0x139   :  { %v68_v60 = vmul.f32 0.00390625, %v67_v59 }
 0x13b   :  { %v69_v61 = vadd.f32 1e-06, %v68_v60 }
 0x13d   :  { %507 = vrsqrt.f32 %v69_v61 }
 0x147   :  { %v508_v10 = vpop.eup %507 }
 0x148   :  { %v78_v11 = vrot.slane %v508_v10, %v47_v34 }
 0x14a   :  { %v80_v13 = vmul.f32 %v78_v11, %v50_v38 }
 0x14c   :  { %v100_v15 = vmul.f32 %v98_v12, %v80_v13 }
 0x14e   :  { %v120_v16 = vadd.f32 %v118_v14, %v100_v15 }
 0x150   :  { %v128_v17 = vrot.slane %v120_v16, %v552_v7 }
 0x152   :  { %v129_v18 = vcombine.high %v128_v17, %v128_v17  ;;  %v132_v20 = vpack.c.bf16 %v128_v17, %v128_v17 }
 0x154   :  { %v133_v19 = vpack.c.bf16 %v129_v18, %v129_v18 }
 0x156   :  { %370 = vmatprep.mubr.bf16.mxu0 %v133_v19 }
 0x157   :  { %371 = vmatmul.mubr.bf16.vlgmr.msra.gmra.mrb[0].mxu0 %v132_v20 }
 0x22a   :  { %v372_v24 = vpop.f32.mrb[0].mxu0 }
 0x22b   :  { %v373_v25 = vadd.f32 %v372_v24, %v171_v22  ;;  %v374_v26 = vpop.f32.mrb[1].mxu0 }
 0x22c   :  { %v375_v27 = vadd.f32 %v374_v26, %v175_v23  ;;  %v376_v28 = vpop.f32.mrb[2].mxu0 }
 0x22d   :  { %v381_v29 = vmul.f32 0.044715, %v373_v25  ;;  %v377_v30 = vpop.f32.mrb[3].mxu0  ;;  %v379_v44 = vmul.f32 0.5, %v373_v25 }
 0x22e   :  { %v382_v31 = vmul.f32 0.044715, %v375_v27  ;;  %v380_v46 = vmul.f32 0.5, %v375_v27 }
 0x22f   :  { %v383_v7 = vmul.f32 %v381_v29, %v373_v25 }
 0x230   :  { %v384_v32 = vmul.f32 %v382_v31, %v375_v27 }
 0x231   :  { %v385_v33 = vmul.f32 %v383_v7, %v373_v25 }
 0x232   :  { %v386_v34 = vmul.f32 %v384_v32, %v375_v27 }
 0x233   :  { %v387_v35 = vadd.f32 %v385_v33, %v373_v25 }
 0x234   :  { %v388_v36 = vadd.f32 %v386_v34, %v375_v27 }
 0x235   :  { %v389_v37 = vmul.f32 0.7978846, %v387_v35 }
 0x236   :  { %v390_v38 = vmul.f32 0.7978846, %v388_v36 }
 0x237   :  { %509 = vtanh.f32 %v389_v37 }
 0x238   :  { %511 = vtanh.f32 %v390_v38 }
 0x241   :  { %v510_v41 = vpop.eup %509 }
 0x242   :  { %v512_v43 = vpop.eup %511  ;;  %v393_v45 = vadd.f32 1.0, %v510_v41 }
 0x243   :  { %v394_v47 = vadd.f32 1.0, %v512_v43 }
 0x244   :  { %v395_v48 = vmul.f32 %v393_v45, %v379_v44 }
 0x245   :  { %v396_v49 = vmul.f32 %v394_v47, %v380_v46 }
 0x247   :  { %v454_v51 = vpack.c.bf16 %v396_v49, %v395_v48 }
 0x249   :  { %v408_v52 = vrot.slane %v454_v51, %v407_v50 }
 0x24b   :  { %455 = vst.sshfl [vmem:[%s680_s5] sm:$0x5 pattern:$0x73625140] %v408_v52 }

// kernel: encoder_forward.42
= control target key start
LH: loop header
LB: loop body
LE: loop exit
PB: predicated region body
PF: predicated region fallthrough
CT: control target
= control target key end

     0   :  { %v169_v36 = vlaneseq  ;;  %v1637_v37 = vmov 1966171168   ;;  %vm1178_vm0 = vcmask 1041408   ;;  %s2148_s1 = inlined_call_operand.vmem [shape: bf16[1152,256], index: 1, kind: input, shape index: {}]   ;;  %s2149_s0 = inlined_call_operand.vmem [shape: bf16[2,1152], index: 0, kind: input, shape index: {}]   ;;  %s2150_s2 = inlined_call_operand.vmem [shape: f32[1,256], index: 2, kind: input, shape index: {}]   ;;  %s2151_s3 = inlined_call_operand.vmem [shape: f32[1,256], index: 3, kind: input, shape index: {}]   ;;  %s2152_s4 = inlined_call_operand.vmem [shape: f32[1,256], index: 4, kind: input, shape index: {}]   ;;  %s2153_s5 = inlined_call_operand.vmem [shape: bf16[2,256], index: 5, kind: output, shape index: {}]  }
   0x1   :  { %v1418_v0 = vld [vmem:[%s2148_s1 + $0x4] ss:$8 sps:$4 sm:$0xff]   ;;  %v1422_v2 = vld [vmem:[%s2148_s1] ss:$8 sps:$4 sm:$0xff]   ;;  %v1424_v4 = vld [vmem:[%s2148_s1 + $0x14] ss:$8 sps:$4 sm:$0xff]   ;;  %v183_v38 = vunpack.c.l.s4 %v1637_v37 }
   0x2   :  { %v1420_v1 = vld [vmem:[%s2148_s1 + $0x204] ss:$8 sps:$4 sm:$0xff]   ;;  %973 = vmatprep.subr.bf16.mxu1 %v1418_v0  ;;  %v1423_v3 = vld [vmem:[%s2148_s1 + $0x200] ss:$8 sps:$4 sm:$0xff]   ;;  %v1426_v5 = vld [vmem:[%s2148_s1 + $0x214] ss:$8 sps:$4 sm:$0xff]  }
   0x3   :  { %1055 = vmatprep.subr.bf16.mxu0 %v1420_v1  ;;  %974 = vmatpush1.bf16.msra.mxu1 %v1422_v2  ;;  %v1428_v6 = vld [vmem:[%s2148_s1 + $0x10] ss:$8 sps:$4 sm:$0xff]   ;;  %v1430_v8 = vld [vmem:[%s2148_s1 + $0x24] ss:$8 sps:$4 sm:$0xff]   ;;  %v1434_v10 = vld [vmem:[%s2148_s1 + $0x20] ss:$8 sps:$4 sm:$0xff]   ;;  %v184_v43 = vunpack.c.0.s8 %v183_v38 }
   0x4   :  { %1056 = vmatpush1.bf16.msra.mxu0 %v1423_v3  ;;  %975 = vmatprep.subr.bf16.mxu1 %v1424_v4  ;;  %v1429_v7 = vld [vmem:[%s2148_s1 + $0x210] ss:$8 sps:$4 sm:$0xff]   ;;  %v1432_v9 = vld [vmem:[%s2148_s1 + $0x224] ss:$8 sps:$4 sm:$0xff]   ;;  %v1435_v11 = vld [vmem:[%s2148_s1 + $0x220] ss:$8 sps:$4 sm:$0xff]  }
   0x5   :  { %1057 = vmatprep.subr.bf16.mxu0 %v1426_v5  ;;  %v1436_v12 = vld [vmem:[%s2148_s1 + $0x34] ss:$8 sps:$4 sm:$0xff]   ;;  %v1440_v14 = vld [vmem:[%s2148_s1 + $0x30] ss:$8 sps:$4 sm:$0xff]   ;;  %v1442_v16 = vld [vmem:[%s2148_s1 + $0x44] ss:$8 sps:$4 sm:$0xff]  }
   0x6   :  { %v1438_v13 = vld [vmem:[%s2148_s1 + $0x234] ss:$8 sps:$4 sm:$0xff]   ;;  %v1441_v15 = vld [vmem:[%s2148_s1 + $0x230] ss:$8 sps:$4 sm:$0xff]   ;;  %v1444_v17 = vld [vmem:[%s2148_s1 + $0x244] ss:$8 sps:$4 sm:$0xff]  }
   0x7   :  { %976 = vmatpush1.bf16.msra.mxu1 %v1428_v6  ;;  %v1446_v18 = vld [vmem:[%s2148_s1 + $0x40] ss:$8 sps:$4 sm:$0xff]   ;;  %v1448_v20 = vld [vmem:[%s2148_s1 + $0x54] ss:$8 sps:$4 sm:$0xff]   ;;  %v1452_v22 = vld [vmem:[%s2148_s1 + $0x50] ss:$8 sps:$4 sm:$0xff]  }
   0x8   :  { %1058 = vmatpush1.bf16.msra.mxu0 %v1429_v7  ;;  %977 = vmatprep.subr.bf16.mxu1 %v1430_v8  ;;  %v1447_v19 = vld [vmem:[%s2148_s1 + $0x240] ss:$8 sps:$4 sm:$0xff]   ;;  %v1450_v21 = vld [vmem:[%s2148_s1 + $0x254] ss:$8 sps:$4 sm:$0xff]   ;;  %v1453_v23 = vld [vmem:[%s2148_s1 + $0x250] ss:$8 sps:$4 sm:$0xff]  }
   0x9   :  { %1059 = vmatprep.subr.bf16.mxu0 %v1432_v9  ;;  %v1454_v24 = vld [vmem:[%s2148_s1 + $0x64] ss:$8 sps:$4 sm:$0xff]   ;;  %v1458_v26 = vld [vmem:[%s2148_s1 + $0x60] ss:$8 sps:$4 sm:$0xff]   ;;  %v1460_v28 = vld [vmem:[%s2148_s1 + $0x74] ss:$8 sps:$4 sm:$0xff]  }
   0xa   :  { %v1456_v25 = vld [vmem:[%s2148_s1 + $0x264] ss:$8 sps:$4 sm:$0xff]   ;;  %v1459_v27 = vld [vmem:[%s2148_s1 + $0x260] ss:$8 sps:$4 sm:$0xff]   ;;  %v1462_v29 = vld [vmem:[%s2148_s1 + $0x274] ss:$8 sps:$4 sm:$0xff]  }
   0xb   :  { %978 = vmatpush1.bf16.msra.mxu1 %v1434_v10  ;;  %v1464_v30 = vld [vmem:[%s2148_s1 + $0x70] ss:$8 sps:$4 sm:$0xff]   ;;  %v1466_v32 = vld [vmem:[%s2148_s1 + $0x84] ss:$8 sps:$4 sm:$0xff]   ;;  %v1470_v34 = vld [vmem:[%s2148_s1 + $0x80] ss:$8 sps:$4 sm:$0xff]  }
   0xc   :  { %1060 = vmatpush1.bf16.msra.mxu0 %v1435_v11  ;;  %979 = vmatprep.subr.bf16.mxu1 %v1436_v12  ;;  %v1465_v31 = vld [vmem:[%s2148_s1 + $0x270] ss:$8 sps:$4 sm:$0xff]   ;;  %v1468_v33 = vld [vmem:[%s2148_s1 + $0x284] ss:$8 sps:$4 sm:$0xff]   ;;  %v1471_v35 = vld [vmem:[%s2148_s1 + $0x280] ss:$8 sps:$4 sm:$0xff]  }
   0xd   :  { %1061 = vmatprep.subr.bf16.mxu0 %v1438_v13  ;;  %v1472_v39 = vld [vmem:[%s2148_s1 + $0x94] ss:$8 sps:$4 sm:$0xff]   ;;  %v1476_v41 = vld [vmem:[%s2148_s1 + $0x90] ss:$8 sps:$4 sm:$0xff]   ;;  %v1786_v42 = vshrl.u32 %v169_v36, 7  ;;  %v21_v52 = vld [vmem:[%s2149_s0] sm:$0xff] }
   0xe   :  { %v1474_v40 = vld [vmem:[%s2148_s1 + $0x294] ss:$8 sps:$4 sm:$0xff]   ;;  %v1477_v44 = vld [vmem:[%s2148_s1 + $0x290] ss:$8 sps:$4 sm:$0xff]   ;;  %v1478_v45 = vld [vmem:[%s2148_s1 + $0xa4] ss:$8 sps:$4 sm:$0xff]   ;;  %v181_v55 = vcombine.high %v21_v52, %v21_v52 }
   0xf   :  { %980 = vmatpush1.bf16.msra.mxu1 %v1440_v14  ;;  %v1480_v46 = vld [vmem:[%s2148_s1 + $0x2a4] ss:$8 sps:$4 sm:$0xff]   ;;  %v1482_v47 = vld [vmem:[%s2148_s1 + $0xa0] ss:$8 sps:$4 sm:$0xff]   ;;  %v1804_v49 = vsub.s32 %v184_v43, %v1786_v42  ;;  %v1484_v50 = vld [vmem:[%s2148_s1 + $0xb4] ss:$8 sps:$4 sm:$0xff]  }
  0x10   :  { %1062 = vmatpush1.bf16.msra.mxu0 %v1441_v15  ;;  %981 = vmatprep.subr.bf16.mxu1 %v1442_v16  ;;  %v1483_v48 = vld [vmem:[%s2148_s1 + $0x2a0] ss:$8 sps:$4 sm:$0xff]   ;;  %v1486_v51 = vld [vmem:[%s2148_s1 + $0x2b4] ss:$8 sps:$4 sm:$0xff]   ;;  %v1488_v53 = vld [vmem:[%s2148_s1 + $0xb0] ss:$8 sps:$4 sm:$0xff]  }
  0x11   :  { %1063 = vmatprep.subr.bf16.mxu0 %v1444_v17  ;;  %v188_v54 = vrot.slane %v21_v52, %v1804_v49  ;;  %v1489_v56 = vld [vmem:[%s2148_s1 + $0x2b0] ss:$8 sps:$4 sm:$0xff]   ;;  %v1490_v57 = vld [vmem:[%s2148_s1 + $0xc4] ss:$8 sps:$4 sm:$0xff]   ;;  %v195_v60 = vrot.slane %v181_v55, %v1804_v49  ;;  %v1494_v61 = vld [vmem:[%s2148_s1 + $0xc0] ss:$8 sps:$4 sm:$0xff]  }
  0x12   :  { %v1492_v58 = vld [vmem:[%s2148_s1 + $0x2c4] ss:$8 sps:$4 sm:$0xff]   ;;  %v1495_v0 = vld [vmem:[%s2148_s1 + $0x2c0] ss:$8 sps:$4 sm:$0xff]   ;;  %v1496_v1 = vld [vmem:[%s2148_s1 + $0xd4] ss:$8 sps:$4 sm:$0xff]  }
  0x13   :  { %982 = vmatpush1.bf16.msra.mxu1 %v1446_v18  ;;  %v196_v59 = vcombine.high %v188_v54, %v188_v54  ;;  %v197_v63 = vcombine.high %v195_v60, %v195_v60  ;;  %v1498_v2 = vld [vmem:[%s2148_s1 + $0x2d4] ss:$8 sps:$4 sm:$0xff]   ;;  %v1500_v4 = vld [vmem:[%s2148_s1 + $0xd0] ss:$8 sps:$4 sm:$0xff]   ;;  %v1502_v6 = vld [vmem:[%s2148_s1 + $0xe4] ss:$8 sps:$4 sm:$0xff]   ;;  %v1883_v17 = vrot.slane %v188_v54, %v1804_v49  ;;  %v1886_v18 = vrot.slane %v195_v60, %v1804_v49 }
  0x14   :  { %1064 = vmatpush1.bf16.msra.mxu0 %v1447_v19  ;;  %983 = vmatprep.subr.bf16.mxu1 %v1448_v20  ;;  %v1501_v5 = vld [vmem:[%s2148_s1 + $0x2d0] ss:$8 sps:$4 sm:$0xff]   ;;  %v1504_v7 = vld [vmem:[%s2148_s1 + $0x2e4] ss:$8 sps:$4 sm:$0xff]   ;;  %v1506_v8 = vld [vmem:[%s2148_s1 + $0xe0] ss:$8 sps:$4 sm:$0xff]  }
  0x15   :  { %1065 = vmatprep.subr.bf16.mxu0 %v1450_v21  ;;  %v218_v62 = vrot.slane %v196_v59, %v1804_v49  ;;  %v225_v3 = vrot.slane %v197_v63, %v1804_v49  ;;  %v1507_v9 = vld [vmem:[%s2148_s1 + $0x2e0] ss:$8 sps:$4 sm:$0xff]   ;;  %v1508_v10 = vld [vmem:[%s2148_s1 + $0xf4] ss:$8 sps:$4 sm:$0xff]   ;;  %v1512_v12 = vld [vmem:[%s2148_s1 + $0xf0] ss:$8 sps:$4 sm:$0xff]  }
  0x16   :  { %v1510_v11 = vld [vmem:[%s2148_s1 + $0x2f4] ss:$8 sps:$4 sm:$0xff]   ;;  %v1513_v13 = vld [vmem:[%s2148_s1 + $0x2f0] ss:$8 sps:$4 sm:$0xff]   ;;  %v1516_v14 = vld [vmem:[%s2148_s1 + $0x104] ss:$8 sps:$4 sm:$0xff]  }
  0x17   :  { %984 = vmatpush1.bf16.msra.mxu1 %v1452_v22  ;;  %1005 = vmatprep.mubr.bf16.mxu1 %v218_v62  ;;  %v1520_v15 = vld [vmem:[%s2148_s1 + $0x304] ss:$8 sps:$4 sm:$0xff]   ;;  %v1514_v16 = vld [vmem:[%s2148_s1 + $0x100] ss:$8 sps:$4 sm:$0xff]   ;;  %v1523_v20 = vld [vmem:[%s2148_s1 + $0x114] ss:$8 sps:$4 sm:$0xff]   ;;  %v228_v22 = vcombine.high %v218_v62, %v218_v62 }
  0x18   :  { %1066 = vmatpush1.bf16.msra.mxu0 %v1453_v23  ;;  %985 = vmatprep.subr.bf16.mxu1 %v1454_v24  ;;  %v1518_v19 = vld [vmem:[%s2148_s1 + $0x300] ss:$8 sps:$4 sm:$0xff]   ;;  %v1526_v21 = vld [vmem:[%s2148_s1 + $0x314] ss:$8 sps:$4 sm:$0xff]   ;;  %v229_v23 = vcombine.high %v225_v3, %v225_v3  ;;  %v1521_v24 = vld [vmem:[%s2148_s1 + $0x110] ss:$8 sps:$4 sm:$0xff]  }
  0x19   :  { %1067 = vmatprep.subr.bf16.mxu0 %v1456_v25  ;;  %1087 = vmatprep.mubr.bf16.mxu0 %v225_v3  ;;  %v1524_v25 = vld [vmem:[%s2148_s1 + $0x310] ss:$8 sps:$4 sm:$0xff]   ;;  %v1539_v36 = vld [vmem:[%s2148_s1 + $0x140] ss:$8 sps:$4 sm:$0xff]   ;;  %v1547_v38 = vld [vmem:[%s2148_s1 + $0x154] ss:$8 sps:$4 sm:$0xff]  }
  0x1a   :  { %v1542_v37 = vld [vmem:[%s2148_s1 + $0x340] ss:$8 sps:$4 sm:$0xff]   ;;  %v1553_v43 = vld [vmem:[%s2148_s1 + $0x164] ss:$8 sps:$4 sm:$0xff]   ;;  %v1572_v59 = vld [vmem:[%s2148_s1 + $0x390] ss:$8 sps:$4 sm:$0xff]  }
  0x1b   :  { %986 = vmatpush1.bf16.msra.mxu1 %v1458_v26  ;;  %v1529_v26 = vld [vmem:[%s2148_s1 + $0x124] ss:$8 sps:$4 sm:$0xff]   ;;  %v1563_v54 = vld [vmem:[%s2148_s1 + $0x180] ss:$8 sps:$4 sm:$0xff]   ;;  %v1584_v3 = vld [vmem:[%s2148_s1 + $0x3b0] ss:$8 sps:$4 sm:$0xff]  }
  0x1c   :  { %1068 = vmatpush1.bf16.msra.mxu0 %v1459_v27  ;;  %987 = vmatprep.subr.bf16.mxu1 %v1460_v28  ;;  %v1532_v27 = vld [vmem:[%s2148_s1 + $0x324] ss:$8 sps:$4 sm:$0xff]   ;;  %v1527_v28 = vld [vmem:[%s2148_s1 + $0x120] ss:$8 sps:$4 sm:$0xff]  }
  0x1d   :  { %1069 = vmatprep.subr.bf16.mxu0 %v1462_v29  ;;  %v1530_v29 = vld [vmem:[%s2148_s1 + $0x320] ss:$8 sps:$4 sm:$0xff]   ;;  %v1565_v52 = vld [vmem:[%s2148_s1 + $0x184] ss:$8 sps:$4 sm:$0xff]  }
  0x1e   :  { %v1566_v55 = vld [vmem:[%s2148_s1 + $0x380] ss:$8 sps:$4 sm:$0xff]   ;;  %v1577_v60 = vld [vmem:[%s2148_s1 + $0x1a4] ss:$8 sps:$4 sm:$0xff]  }
  0x1f   :  { %988 = vmatpush1.bf16.msra.mxu1 %v1464_v30  ;;  %v1535_v30 = vld [vmem:[%s2148_s1 + $0x134] ss:$8 sps:$4 sm:$0xff]   ;;  %v1575_v62 = vld [vmem:[%s2148_s1 + $0x1a0] ss:$8 sps:$4 sm:$0xff]  }
  0x20   :  { %1070 = vmatpush1.bf16.msra.mxu0 %v1465_v31  ;;  %989 = vmatprep.subr.bf16.mxu1 %v1466_v32  ;;  %v1538_v31 = vld [vmem:[%s2148_s1 + $0x334] ss:$8 sps:$4 sm:$0xff]   ;;  %v1533_v32 = vld [vmem:[%s2148_s1 + $0x130] ss:$8 sps:$4 sm:$0xff]   ;;  %v1578_v63 = vld [vmem:[%s2148_s1 + $0x3a0] ss:$8 sps:$4 sm:$0xff]  }
  0x21   :  { %1071 = vmatprep.subr.bf16.mxu0 %v1468_v33  ;;  %v1536_v33 = vld [vmem:[%s2148_s1 + $0x330] ss:$8 sps:$4 sm:$0xff]  }
  0x23   :  { %990 = vmatpush1.bf16.msra.mxu1 %v1470_v34  ;;  %v1541_v34 = vld [vmem:[%s2148_s1 + $0x144] ss:$8 sps:$4 sm:$0xff]  }
  0x24   :  { %1072 = vmatpush1.bf16.msra.mxu0 %v1471_v35  ;;  %991 = vmatprep.subr.bf16.mxu1 %v1472_v39  ;;  %v1544_v35 = vld [vmem:[%s2148_s1 + $0x344] ss:$8 sps:$4 sm:$0xff]   ;;  %v1550_v39 = vld [vmem:[%s2148_s1 + $0x354] ss:$8 sps:$4 sm:$0xff]  }
  0x25   :  { %1073 = vmatprep.subr.bf16.mxu0 %v1474_v40  ;;  %v1545_v40 = vld [vmem:[%s2148_s1 + $0x150] ss:$8 sps:$4 sm:$0xff]  }
  0x27   :  { %992 = vmatpush1.bf16.msra.mxu1 %v1476_v41  ;;  %v1548_v41 = vld [vmem:[%s2148_s1 + $0x350] ss:$8 sps:$4 sm:$0xff]  }
  0x28   :  { %1074 = vmatpush1.bf16.msra.mxu0 %v1477_v44  ;;  %993 = vmatprep.subr.bf16.mxu1 %v1478_v45  ;;  %v1556_v44 = vld [vmem:[%s2148_s1 + $0x364] ss:$8 sps:$4 sm:$0xff]   ;;  %v1551_v45 = vld [vmem:[%s2148_s1 + $0x160] ss:$8 sps:$4 sm:$0xff]  }
  0x29   :  { %1075 = vmatprep.subr.bf16.mxu0 %v1480_v46  ;;  %v1554_v46 = vld [vmem:[%s2148_s1 + $0x360] ss:$8 sps:$4 sm:$0xff]  }
  0x2b   :  { %994 = vmatpush1.bf16.msra.mxu1 %v1482_v47  ;;  %v1559_v47 = vld [vmem:[%s2148_s1 + $0x174] ss:$8 sps:$4 sm:$0xff]  }
  0x2c   :  { %1076 = vmatpush1.bf16.msra.mxu0 %v1483_v48  ;;  %995 = vmatprep.subr.bf16.mxu1 %v1484_v50  ;;  %v1562_v48 = vld [vmem:[%s2148_s1 + $0x374] ss:$8 sps:$4 sm:$0xff]   ;;  %v1557_v50 = vld [vmem:[%s2148_s1 + $0x170] ss:$8 sps:$4 sm:$0xff]  }
  0x2d   :  { %1077 = vmatprep.subr.bf16.mxu0 %v1486_v51  ;;  %v1560_v51 = vld [vmem:[%s2148_s1 + $0x370] ss:$8 sps:$4 sm:$0xff]  }
  0x2f   :  { %996 = vmatpush1.bf16.msra.mxu1 %v1488_v53  ;;  %v1568_v53 = vld [vmem:[%s2148_s1 + $0x384] ss:$8 sps:$4 sm:$0xff]  }
  0x30   :  { %1078 = vmatpush1.bf16.msra.mxu0 %v1489_v56  ;;  %997 = vmatprep.subr.bf16.mxu1 %v1490_v57  ;;  %v1571_v56 = vld [vmem:[%s2148_s1 + $0x194] ss:$8 sps:$4 sm:$0xff]  }
  0x31   :  { %1079 = vmatprep.subr.bf16.mxu0 %v1492_v58  ;;  %v1574_v57 = vld [vmem:[%s2148_s1 + $0x394] ss:$8 sps:$4 sm:$0xff]   ;;  %v1569_v58 = vld [vmem:[%s2148_s1 + $0x190] ss:$8 sps:$4 sm:$0xff]  }
  0x33   :  { %998 = vmatpush1.bf16.msra.mxu1 %v1494_v61  ;;  %v1580_v61 = vld [vmem:[%s2148_s1 + $0x3a4] ss:$8 sps:$4 sm:$0xff]  }
  0x34   :  { %1080 = vmatpush1.bf16.msra.mxu0 %v1495_v0  ;;  %999 = vmatprep.subr.bf16.mxu1 %v1496_v1  ;;  %v1583_v0 = vld [vmem:[%s2148_s1 + $0x1b4] ss:$8 sps:$4 sm:$0xff]  }
  0x35   :  { %1081 = vmatprep.subr.bf16.mxu0 %v1498_v2  ;;  %v1586_v1 = vld [vmem:[%s2148_s1 + $0x3b4] ss:$8 sps:$4 sm:$0xff]   ;;  %v1581_v2 = vld [vmem:[%s2148_s1 + $0x1b0] ss:$8 sps:$4 sm:$0xff]  }
  0x37   :  { %1000 = vmatpush1.bf16.msra.mxu1 %v1500_v4  ;;  %v1589_v4 = vld [vmem:[%s2148_s1 + $0x1c4] ss:$8 sps:$4 sm:$0xff]  }
  0x38   :  { %1082 = vmatpush1.bf16.msra.mxu0 %v1501_v5  ;;  %1001 = vmatprep.subr.bf16.mxu1 %v1502_v6  ;;  %v1592_v5 = vld [vmem:[%s2148_s1 + $0x3c4] ss:$8 sps:$4 sm:$0xff]   ;;  %v1587_v6 = vld [vmem:[%s2148_s1 + $0x1c0] ss:$8 sps:$4 sm:$0xff]  }
  0x39   :  { %1083 = vmatprep.subr.bf16.mxu0 %v1504_v7  ;;  %v1590_v7 = vld [vmem:[%s2148_s1 + $0x3c0] ss:$8 sps:$4 sm:$0xff]  }
  0x3b   :  { %1002 = vmatpush1.bf16.msra.mxu1 %v1506_v8  ;;  %v1595_v8 = vld [vmem:[%s2148_s1 + $0x1d4] ss:$8 sps:$4 sm:$0xff]  }
  0x3c   :  { %1084 = vmatpush1.bf16.msra.mxu0 %v1507_v9  ;;  %1003 = vmatprep.subr.bf16.mxu1 %v1508_v10  ;;  %v1598_v9 = vld [vmem:[%s2148_s1 + $0x3d4] ss:$8 sps:$4 sm:$0xff]   ;;  %v1593_v10 = vld [vmem:[%s2148_s1 + $0x1d0] ss:$8 sps:$4 sm:$0xff]  }
  0x3d   :  { %1085 = vmatprep.subr.bf16.mxu0 %v1510_v11  ;;  %v1596_v11 = vld [vmem:[%s2148_s1 + $0x3d0] ss:$8 sps:$4 sm:$0xff]  }
  0x3f   :  { %1004 = vmatpush1.bf16.msra.mxu1 %v1512_v12  ;;  %v1601_v12 = vld [vmem:[%s2148_s1 + $0x1e4] ss:$8 sps:$4 sm:$0xff]  }
  0x40   :  { %1086 = vmatpush1.bf16.msra.mxu0 %v1513_v13  ;;  %1014 = vmatprep.subr.bf16.mxu1 %v1516_v14  ;;  %v1604_v13 = vld [vmem:[%s2148_s1 + $0x3e4] ss:$8 sps:$4 sm:$0xff]   ;;  %v1599_v14 = vld [vmem:[%s2148_s1 + $0x1e0] ss:$8 sps:$4 sm:$0xff]  }
  0x41   :  { %1096 = vmatprep.subr.bf16.mxu0 %v1520_v15  ;;  %v1602_v15 = vld [vmem:[%s2148_s1 + $0x3e0] ss:$8 sps:$4 sm:$0xff]  }
  0x42   :  { %1006 = vmatmul.mubr.bf16.vlgmr.msra.gmra.mrb[0].mxu1 %v1883_v17 }
  0x43   :  { %1088 = vmatmul.mubr.bf16.vlgmr.msra.gmra.mrb[0].mxu0 %v1886_v18  ;;  %1015 = vmatpush1.bf16.msra.mxu1 %v1514_v16  ;;  %v1607_v16 = vld [vmem:[%s2148_s1 + $0x1f4] ss:$8 sps:$4 sm:$0xff]  }
  0x44   :  { %1097 = vmatpush1.bf16.msra.mxu0 %v1518_v19  ;;  %1016 = vmatprep.subr.bf16.mxu1 %v1523_v20  ;;  %v1610_v19 = vld [vmem:[%s2148_s1 + $0x3f4] ss:$8 sps:$4 sm:$0xff]   ;;  %v1605_v20 = vld [vmem:[%s2148_s1 + $0x1f0] ss:$8 sps:$4 sm:$0xff]  }
  0x45   :  { %1098 = vmatprep.subr.bf16.mxu0 %v1526_v21  ;;  %1046 = vmatprep.mubr.bf16.mxu1 %v228_v22  ;;  %v1608_v21 = vld [vmem:[%s2148_s1 + $0x3f0] ss:$8 sps:$4 sm:$0xff]   ;;  %v1613_v22 = vld [vmem:[%s2148_s1 + $0x404] ss:$8 sps:$4 sm:$0xff]  }
  0x46   :  { %1128 = vmatprep.mubr.bf16.mxu0 %v229_v23  ;;  %v226_v23 = vcombine.high %v1883_v17, %v1883_v17  ;;  %v1614_v17 = vld [vmem:[%s2148_s1 + $0x410] ss:$8 sps:$4 sm:$0xff]  }
  0x47   :  { %1017 = vmatpush1.bf16.msra.mxu1 %v1521_v24  ;;  %v227_v24 = vcombine.high %v1886_v18, %v1886_v18  ;;  %v1619_v18 = vld [vmem:[%s2148_s1 + $0x424] ss:$8 sps:$4 sm:$0xff]  }
  0x48   :  { %1099 = vmatpush1.bf16.msra.mxu0 %v1524_v25  ;;  %1018 = vmatprep.subr.bf16.mxu1 %v1529_v26  ;;  %v1611_v25 = vld [vmem:[%s2148_s1 + $0x400] ss:$8 sps:$4 sm:$0xff]   ;;  %v1616_v26 = vld [vmem:[%s2148_s1 + $0x414] ss:$8 sps:$4 sm:$0xff]  }
  0x49   :  { %1100 = vmatprep.subr.bf16.mxu0 %v1532_v27  ;;  %v1638_v27 = vmov 0  }
  0x4b   :  { %1019 = vmatpush1.bf16.msra.mxu1 %v1527_v28  ;;  %v1617_v28 = vld [vmem:[%s2148_s1 + $0x420] ss:$8 sps:$4 sm:$0xff]  }
  0x4c   :  { %1101 = vmatpush1.bf16.msra.mxu0 %v1530_v29  ;;  %1020 = vmatprep.subr.bf16.mxu1 %v1535_v30  ;;  %v1622_v29 = vld [vmem:[%s2148_s1 + $0x434] ss:$8 sps:$4 sm:$0xff]   ;;  %v1620_v30 = vld [vmem:[%s2148_s1 + $0x430] ss:$8 sps:$4 sm:$0xff]  }
  0x4d   :  { %1102 = vmatprep.subr.bf16.mxu0 %v1538_v31  ;;  %v1625_v31 = vld [vmem:[%s2148_s1 + $0x444] ss:$8 sps:$4 sm:$0xff]  }
  0x4f   :  { %1021 = vmatpush1.bf16.msra.mxu1 %v1533_v32  ;;  %v1623_v32 = vld [vmem:[%s2148_s1 + $0x440] ss:$8 sps:$4 sm:$0xff]  }
  0x50   :  { %1103 = vmatpush1.bf16.msra.mxu0 %v1536_v33  ;;  %1022 = vmatprep.subr.bf16.mxu1 %v1541_v34  ;;  %v1628_v33 = vld [vmem:[%s2148_s1 + $0x454] ss:$8 sps:$4 sm:$0xff]   ;;  %v1626_v34 = vld [vmem:[%s2148_s1 + $0x450] ss:$8 sps:$4 sm:$0xff]  }
  0x51   :  { %1104 = vmatprep.subr.bf16.mxu0 %v1544_v35  ;;  %v1631_v35 = vld [vmem:[%s2148_s1 + $0x464] ss:$8 sps:$4 sm:$0xff]  }
  0x53   :  { %1023 = vmatpush1.bf16.msra.mxu1 %v1539_v36  ;;  %v1629_v36 = vld [vmem:[%s2148_s1 + $0x460] ss:$8 sps:$4 sm:$0xff]  }
  0x54   :  { %1105 = vmatpush1.bf16.msra.mxu0 %v1542_v37  ;;  %1024 = vmatprep.subr.bf16.mxu1 %v1547_v38  ;;  %v1634_v37 = vld [vmem:[%s2148_s1 + $0x474] ss:$8 sps:$4 sm:$0xff]   ;;  %v1632_v38 = vld [vmem:[%s2148_s1 + $0x470] ss:$8 sps:$4 sm:$0xff]  }
  0x55   :  { %1106 = vmatprep.subr.bf16.mxu0 %v1550_v39  ;;  %v1253_v39 = vld.sshfl [vmem:[%s2149_s0 + $0x8] sm:$0x1 pattern:$0x75316420] }
  0x57   :  { %1025 = vmatpush1.bf16.msra.mxu1 %v1545_v40  ;;  %v243_v40 = vrot.slane %v1253_v39, %v1804_v49 }
  0x58   :  { %1107 = vmatpush1.bf16.msra.mxu0 %v1548_v41  ;;  %1026 = vmatprep.subr.bf16.mxu1 %v1553_v43 }
  0x59   :  { %1108 = vmatprep.subr.bf16.mxu0 %v1556_v44 }
  0x5b   :  { %1027 = vmatpush1.bf16.msra.mxu1 %v1551_v45 }
  0x5c   :  { %1109 = vmatpush1.bf16.msra.mxu0 %v1554_v46  ;;  %1028 = vmatprep.subr.bf16.mxu1 %v1559_v47  ;;  %v171_v46 = vsub.s32 0, %v1786_v42  ;;  %v167_v47 = vld [vmem:[%s2150_s2] sm:$0x3] }
  0x5d   :  { %1110 = vmatprep.subr.bf16.mxu0 %v1562_v48  ;;  %v175_v48 = vsub.s32 1, %v1786_v42 }
  0x5f   :  { %1029 = vmatpush1.bf16.msra.mxu1 %v1557_v50  ;;  %v172_v50 = vrot.slane %v167_v47, %v171_v46 }
  0x60   :  { %1111 = vmatpush1.bf16.msra.mxu0 %v1560_v51  ;;  %1030 = vmatprep.subr.bf16.mxu1 %v1565_v52  ;;  %v176_v51 = vrot.slane %v167_v47, %v175_v48 }
  0x61   :  { %1112 = vmatprep.subr.bf16.mxu0 %v1568_v53 }
  0x63   :  { %1031 = vmatpush1.bf16.msra.mxu1 %v1563_v54 }
  0x64   :  { %1113 = vmatpush1.bf16.msra.mxu0 %v1566_v55  ;;  %1032 = vmatprep.subr.bf16.mxu1 %v1571_v56 }
  0x65   :  { %1114 = vmatprep.subr.bf16.mxu0 %v1574_v57 }
  0x67   :  { %1033 = vmatpush1.bf16.msra.mxu1 %v1569_v58 }
  0x68   :  { %1115 = vmatpush1.bf16.msra.mxu0 %v1572_v59  ;;  %1034 = vmatprep.subr.bf16.mxu1 %v1577_v60 }
  0x69   :  { %1116 = vmatprep.subr.bf16.mxu0 %v1580_v61 }
  0x6b   :  { %1035 = vmatpush1.bf16.msra.mxu1 %v1575_v62 }
  0x6c   :  { %1117 = vmatpush1.bf16.msra.mxu0 %v1578_v63  ;;  %1036 = vmatprep.subr.bf16.mxu1 %v1583_v0 }
  0x6d   :  { %1118 = vmatprep.subr.bf16.mxu0 %v1586_v1 }
  0x6f   :  { %1037 = vmatpush1.bf16.msra.mxu1 %v1581_v2 }
  0x70   :  { %1119 = vmatpush1.bf16.msra.mxu0 %v1584_v3  ;;  %1038 = vmatprep.subr.bf16.mxu1 %v1589_v4 }
  0x71   :  { %1120 = vmatprep.subr.bf16.mxu0 %v1592_v5 }
  0x73   :  { %1039 = vmatpush1.bf16.msra.mxu1 %v1587_v6 }
  0x74   :  { %1121 = vmatpush1.bf16.msra.mxu0 %v1590_v7  ;;  %1040 = vmatprep.subr.bf16.mxu1 %v1595_v8 }
  0x75   :  { %1122 = vmatprep.subr.bf16.mxu0 %v1598_v9 }
  0x77   :  { %1041 = vmatpush1.bf16.msra.mxu1 %v1593_v10  ;;  %v1200_v10 = vld [vmem:[%s2151_s3] sm:$0x3] }
  0x78   :  { %1123 = vmatpush1.bf16.msra.mxu0 %v1596_v11  ;;  %1042 = vmatprep.subr.bf16.mxu1 %v1601_v12  ;;  %v1214_v11 = vld [vmem:[%s2152_s4] sm:$0x3]  ;;  %v1205_v12 = vrot.slane %v1200_v10, %v171_v46 }
  0x79   :  { %1124 = vmatprep.subr.bf16.mxu0 %v1604_v13  ;;  %v1209_v13 = vrot.slane %v1200_v10, %v175_v48 }
  0x7b   :  { %1043 = vmatpush1.bf16.msra.mxu1 %v1599_v14 }
  0x7c   :  { %1125 = vmatpush1.bf16.msra.mxu0 %v1602_v15  ;;  %1044 = vmatprep.subr.bf16.mxu1 %v1607_v16  ;;  %v1219_v15 = vrot.slane %v1214_v11, %v171_v46  ;;  %v1223_v16 = vrot.slane %v1214_v11, %v175_v48 }
  0x7d   :  { %1126 = vmatprep.subr.bf16.mxu0 %v1610_v19 }
  0x7f   :  { %1045 = vmatpush1.bf16.msra.mxu1 %v1605_v20 }
  0x80   :  { %1127 = vmatpush1.bf16.msra.mxu0 %v1608_v21 }
  0x81   :  { %1137 = vmatprep.subr.bf16.mxu0 %v1613_v22 }
  0x82   :  { %1047 = vmatmul.mubr.bf16.vlgmr.msra.gmra.mrb[0].mxu1 %v226_v23 }
  0x83   :  { %1129 = vmatmul.mubr.bf16.vlgmr.msra.gmra.mrb[0].mxu0 %v227_v24 }
  0x84   :  { %1138 = vmatpush1.bf16.msra.mxu0 %v1611_v25  ;;  %1169 = vmatprep.mubr.bf16.mxu0 %v1638_v27 }
  0x85   :  { %1139 = vmatprep.subr.bf16.mxu0 %v1616_v26 }
  0x88   :  { %1140 = vmatpush1.bf16.msra.mxu0 %v1614_v17 }
  0x89   :  { %1141 = vmatprep.subr.bf16.mxu0 %v1619_v18 }
  0x8c   :  { %1142 = vmatpush1.bf16.msra.mxu0 %v1617_v28 }
  0x8d   :  { %1143 = vmatprep.subr.bf16.mxu0 %v1622_v29 }
  0x90   :  { %1144 = vmatpush1.bf16.msra.mxu0 %v1620_v30 }
  0x91   :  { %1145 = vmatprep.subr.bf16.mxu0 %v1625_v31 }
  0x94   :  { %1146 = vmatpush1.bf16.msra.mxu0 %v1623_v32 }
  0x95   :  { %1147 = vmatprep.subr.bf16.mxu0 %v1628_v33 }
  0x98   :  { %1148 = vmatpush1.bf16.msra.mxu0 %v1626_v34 }
  0x99   :  { %1149 = vmatprep.subr.bf16.mxu0 %v1631_v35 }
  0x9c   :  { %1150 = vmatpush1.bf16.msra.mxu0 %v1629_v36 }
  0x9d   :  { %1151 = vmatprep.subr.bf16.mxu0 %v1634_v37 }
  0xa0   :  { %1152 = vmatpush1.bf16.msra.mxu0 %v1632_v38 }
  0xa3   :  { %1170 = vmatmul.mubr.bf16.vlgmr.msra.gmra.mrb[0].mxu0 %v243_v40 }
 0x155   :  { %v1048_v41 = vpop.f32.mrb[0].mxu1 }
 0x156   :  { %v1050_v43 = vpop.f32.mrb[1].mxu1  ;;  %v1400_v52 = vadd.f32 %v1048_v41, %v172_v50 }
 0x157   :  { %v1052_v44 = vpop.f32.mrb[2].mxu1  ;;  %v1402_v53 = vadd.f32 %v1050_v43, %v176_v51 }
 0x158   :  { %v1053_v45 = vpop.f32.mrb[3].mxu1 }
 0x176   :  { %v1171_v54 = vpop.f32.mrb[0].mxu0 }
 0x177   :  { %v1401_v55 = vadd.f32 %v1400_v52, %v1171_v54  ;;  %v1173_v56 = vpop.f32.mrb[1].mxu0 }
 0x178   :  { %v1403_v57 = vadd.f32 %v1402_v53, %v1173_v56  ;;  %v1175_v58 = vpop.f32.mrb[2].mxu0 }
 0x179   :  { %v1176_v59 = vpop.f32.mrb[3].mxu0  ;;  %v1179_v60 = vsel %vm1178_vm0, %v1401_v55, 0.0 }
 0x17a   :  { %v1180_v61 = vsel %vm1178_vm0, %v1403_v57, 0.0 }
 0x17b   :  { %v1181_v62 = vadd.f32 %v1180_v61, %v1179_v60 }
 0x17d   :  { %1182 = vadd.xlane.f32.xlu0 %v1181_v62 }
 0x20a   :  { %v1183_v63 = vpop.xlane.xlu0 %1182 }
 0x20b   :  { %v1185_v0 = vmul.f32 0.00390625, %v1183_v63 }
 0x20d   :  { %v1186_v42 = vsub.f32 %v1401_v55, %v1185_v0  ;;  %v1187_v1 = vsub.f32 %v1403_v57, %v1185_v0 }
 0x20f   :  { %v1188_v2 = vmul.f32 %v1186_v42, %v1186_v42  ;;  %v1189_v3 = vmul.f32 %v1187_v1, %v1187_v1 }
 0x211   :  { %v1190_v4 = vsel %vm1178_vm0, %v1188_v2, 0.0  ;;  %v1191_v5 = vsel %vm1178_vm0, %v1189_v3, 0.0 }
 0x212   :  { %v1192_v6 = vadd.f32 %v1191_v5, %v1190_v4 }
 0x214   :  { %1193 = vadd.xlane.f32.xlu0 %v1192_v6 }
 0x2a1   :  { %v1194_v7 = vpop.xlane.xlu0 %1193 }
 0x2a2   :  { %v1195_v8 = vmul.f32 0.00390625, %v1194_v7 }
 0x2a4   :  { %v1196_v9 = vadd.f32 1e-06, %v1195_v8 }
 0x2a6   :  { %1635 = vrsqrt.f32 %v1196_v9 }
 0x2b0   :  { %v1636_v14 = vpop.eup %1635 }
 0x2b1   :  { %v1198_v19 = vmul.f32 %v1636_v14, %v1186_v42  ;;  %v1199_v20 = vmul.f32 %v1636_v14, %v1187_v1 }
 0x2b3   :  { %v1212_v21 = vmul.f32 %v1205_v12, %v1198_v19  ;;  %v1213_v22 = vmul.f32 %v1209_v13, %v1199_v20 }
 0x2b5   :  { %v1226_v23 = vadd.f32 %v1219_v15, %v1212_v21  ;;  %v1227_v24 = vadd.f32 %v1223_v16, %v1213_v22 }
 0x2b7   :  { %v1398_v25 = vpack.c.bf16 %v1227_v24, %v1226_v23 }
 0x2b9   :  { %v1239_v26 = vrot.slane %v1398_v25, %v1804_v49 }
 0x2bb   :  { %1399 = vst.sshfl [vmem:[%s2153_s5] sm:$0x5 pattern:$0x73625140] %v1239_v26 }

</bundles_post_ra>
